<compile_context>
chip_gen: v5e
topology: v5e:2x2
jax: 0.10.0
libtpu: 0.0.40
codegen_flags: <defaults>
</compile_context>

<pallas_src>
import functools
import math

import jax
import jax.numpy as jnp
from jax.experimental import pallas as pl
from jax.experimental.pallas import tpu as pltpu

_VPU_PATH_MAX_FMAS = 1536      # use the unrolled VPU path when 9*Cin*Cout <= this


# --------------------------------------------------------------------------- #
# pass 1: replicate-padded dilated 3x3 conv + bias + LeakyReLU + BN partials   #
# --------------------------------------------------------------------------- #
def _conv_lrelu_kernel(xm_ref, xt_ref, xb_ref, w_ref, b_ref,      # inputs
                       y_ref, sum_ref, sq_ref,                    # outputs
                       *, d, tile_h, W, cin, cout, neg_slope, use_vpu):
    i = pl.program_id(1)
    n_h = pl.num_programs(1)

    xm = xm_ref[0]                          # (Cin, tile_h, W)   main row tile
    top = xt_ref[0, :, 8 - d:, :]           # (Cin, d, W)  last d rows of tile above
    bot = xb_ref[0, :, :d, :]               # (Cin, d, W)  first d rows of tile below

    # replicate row padding at the image top / bottom (the clamped halo block
    # indices are valid but point at the wrong rows there, so override them).
    row0 = xm[:, 0:1, :]
    rowl = xm[:, tile_h - 1:tile_h, :]
    top = jnp.where(i == 0, jnp.broadcast_to(row0, top.shape), top)
    bot = jnp.where(i == n_h - 1, jnp.broadcast_to(rowl, bot.shape), bot)

    # assemble the (Cin, tile_h + 2d, W + 2d) replicate-padded window in VMEM
    xwin = jnp.concatenate([top, xm, bot], axis=1)
    left = jnp.broadcast_to(xwin[:, :, 0:1], (cin, tile_h + 2 * d, d))
    right = jnp.broadcast_to(xwin[:, :, W - 1:W], (cin, tile_h + 2 * d, d))
    xwin = jnp.concatenate([left, xwin, right], axis=2)

    m = tile_h * W

    if use_vpu:
        # tiny-channel path: spatial (H, W) stays in (sublane, lane); the conv is
        # 9*Cin*Cout scalar-weight FMAs on the VPU, weights/bias read from SMEM.
        xw = xwin.astype(jnp.float32)
        taps = [[xw[ci, kh * d:kh * d + tile_h, kw * d:kw * d + W]
                 for kh in range(3) for kw in range(3)]
                for ci in range(cin)]
        accs = []
        for co in range(cout):
            acc_c = jnp.full((tile_h, W), b_ref[co], jnp.float32)
            for ci in range(cin):
                base = (co * cin + ci) * 9
                for t in range(9):
                    acc_c = acc_c + w_ref[base + t] * taps[ci][t]
            accs.append(acc_c)
        acc = jnp.stack(accs, axis=0).reshape(cout, m)            # (Cout, tile_h*W)
    else:
        # general path: 9 accumulated per-tap channel contractions (no im2col,
        # no 9x K-dim duplication of the tile in VMEM).  Operands keep the input
        # dtype (bf16 stays bf16); accumulation is f32 on the MXU.
        acc = jnp.zeros((cout, m), jnp.float32)
        t = 0
        for kh in range(3):
            for kw in range(3):
                tap = xwin[:, kh * d:kh * d + tile_h,
                           kw * d:kw * d + W].reshape(cin, m)
                acc = acc + jnp.dot(w_ref[t], tap,
                                    preferred_element_type=jnp.float32)
                t += 1
        acc = acc + b_ref[...]                                    # (Cout, 1) bias

    # LeakyReLU
    acc = jnp.where(acc >= 0.0, acc, neg_slope * acc)

    # per-channel partial sums for the two-pass BatchNorm reduction (f32)
    sum_ref[...] = jnp.sum(acc, axis=1).reshape(1, 1, cout, 1)
    sq_ref[...] = jnp.sum(acc * acc, axis=1).reshape(1, 1, cout, 1)

    # lane-dense activation store: block last dim = tile_h * W
    y_ref[...] = acc.reshape(1, cout, m).astype(y_ref.dtype)


# --------------------------------------------------------------------------- #
# pass 2: folded BN affine + residual (fully lane-dense, NCHW-native)          #
# --------------------------------------------------------------------------- #
def _bn_residual_kernel(y_ref, x_ref, scale_ref, shift_ref, out_ref):
    y = y_ref[...].astype(jnp.float32)            # (1, C, tile_h*W)
    s = scale_ref[...][None]                      # (1, C, 1)
    t = shift_ref[...][None]
    out_ref[...] = (y * s + t
                    + x_ref[...].astype(jnp.float32)).astype(out_ref.dtype)


# --------------------------------------------------------------------------- #
# tiling heuristics (generation-aware VMEM budget, megacore-aware grid)        #
# --------------------------------------------------------------------------- #
def _vmem_limit_bytes():
    try:
        cap = int(pltpu.get_tpu_info().vmem_capacity_bytes)
    except Exception:
        cap = 64 * 1024 * 1024          # conservative (v7x per-core) fallback
    return min(cap * 3 // 4, 100 * 1024 * 1024)


def _pick_tile_h(N, C, H, W, d, itemsize, budget_bytes):
    """Largest row tile (multiple of 8 dividing H, lane-dense flat store) that
    fits the per-step VMEM budget; prefers >= 2 grid steps when N == 1."""
    def rup(x, mlt):
        return -(-x // mlt) * mlt

    def need(th):
        m = th * W
        lw = rup(W, 128)
        x_main = 2 * C * rup(th, 8) * lw * itemsize                # dbl-buffered tile
        halos = 4 * C * 8 * lw * itemsize                          # 2 halo blocks x2
        xwin = C * rup(th + 2 * d, 8) * rup(W + 2 * d, 128) * 4    # padded window
        acc = rup(C, 8) * rup(m, 128) * 4
        ybuf = 2 * rup(C, 8) * rup(m, 128) * itemsize
        return x_main + halos + 2 * xwin + 2 * acc + ybuf

    cands = [t for t in range(8, H + 1, 8)
             if H % t == 0 and ((t * W) % 128 == 0 or t == H)]
    if not cands:
        cands = [H]
    cands = sorted(set(cands), reverse=True)
    pref = [t for t in cands if t <= max(H // 2, 8)] if N < 2 else cands
    for t in (pref or cands):
        if need(t) <= budget_bytes:
            return t
    return min(cands)


# --------------------------------------------------------------------------- #
# wrapper                                                                      #
# --------------------------------------------------------------------------- #
def dilated_res_block(x_nchw, w_oihw, bias, gamma, beta, *, dilation,
                      negative_slope, eps=1e-3):
    """Forward of DilatedResBlock. x_nchw: (N, C, H, W); w_oihw: (Cout, Cin, 3, 3)."""
    N, C, H, W = x_nchw.shape
    Cout, Cin, KH, KW = w_oihw.shape
    assert Cin == C and Cout == C, "residual add requires in_channels == out_channels"
    assert KH == 3 and KW == 3, ("padding == dilation preserves spatial size only "
                                 "for kernel_size == 3 (needed for the residual)")
    d = dilation
    assert 1 <= d <= 8, "row halo is served from one 8-row block"  # TODO(synk): d > 8
    assert H % 8 == 0, "row tiling assumes H is a multiple of 8"

    vmem_limit = _vmem_limit_bytes()
    tile_h = _pick_tile_h(N, C, H, W, d, x_nchw.dtype.itemsize, vmem_limit // 2)
    n_h = H // tile_h
    hb = tile_h // 8
    m = tile_h * W
    y_dtype = x_nchw.dtype          # bf16 input -> bf16 intermediate; f32 stays f32

    cparams = pltpu.CompilerParams(
        dimension_semantics=("parallel", "parallel"),
        vmem_limit_bytes=vmem_limit)

    use_vpu = (9 * Cin * Cout) <= _VPU_PATH_MAX_FMAS
    if use_vpu:
        # scalar weights/bias in SMEM, indexed (co, ci, kh, kw)
        w_arg = w_oihw.astype(jnp.float32).reshape(Cout * Cin * 9)
        b_arg = bias.astype(jnp.float32)
        w_spec = pl.BlockSpec(memory_space=pltpu.MemorySpace.SMEM)
        b_spec = pl.BlockSpec(memory_space=pltpu.MemorySpace.SMEM)
    else:
        # per-tap (Cout, Cin) weight matrices for the 9-dot MXU path
        w_arg = jnp.transpose(w_oihw, (2, 3, 0, 1)).reshape(9, Cout, Cin)
        w_arg = w_arg.astype(x_nchw.dtype)
        b_arg = bias.astype(jnp.float32).reshape(Cout, 1)
        w_spec = pl.BlockSpec((9, Cout, Cin), lambda n, i: (0, 0, 0))
        b_spec = pl.BlockSpec((Cout, 1), lambda n, i: (0, 0))

    kern1 = functools.partial(
        _conv_lrelu_kernel, d=d, tile_h=tile_h, W=W, cin=Cin, cout=Cout,
        neg_slope=negative_slope, use_vpu=use_vpu)

    max_hblk = H // 8 - 1
    y, psum, psq = pl.pallas_call(
        kern1,
        grid=(N, n_h),
        in_specs=[
            # main row tile (auto-pipelined / double-buffered)
            pl.BlockSpec((1, C, tile_h, W), lambda n, i: (n, 0, i, 0)),
            # 8-row block just above the tile (clamped at the image top)
            pl.BlockSpec((1, C, 8, W),
                         lambda n, i: (n, 0, jnp.maximum(i * hb - 1, 0), 0)),
            # 8-row block just below the tile (clamped at the image bottom)
            pl.BlockSpec((1, C, 8, W),
                         lambda n, i: (n, 0, jnp.minimum((i + 1) * hb, max_hblk), 0)),
            w_spec,
            b_spec,
        ],
        out_specs=(
            pl.BlockSpec((1, Cout, m), lambda n, i: (n, 0, i)),       # lane-dense y
            pl.BlockSpec((1, 1, Cout, 1), lambda n, i: (n, i, 0, 0)),
            pl.BlockSpec((1, 1, Cout, 1), lambda n, i: (n, i, 0, 0)),
        ),
        out_shape=(
            jax.ShapeDtypeStruct((N, Cout, H * W), y_dtype),
            jax.ShapeDtypeStruct((N, n_h, Cout, 1), jnp.float32),
            jax.ShapeDtypeStruct((N, n_h, Cout, 1), jnp.float32),
        ),
        compiler_params=cparams,
    )(x_nchw, x_nchw, x_nchw, w_arg, b_arg)

    # BatchNorm2d (training mode): batch stats over (N, H, W), biased variance,
    # folded into a single per-channel scale/shift  y*s + t.
    # TODO(synk): running_mean/running_var (track_running_stats) buffer updates
    # are training-side state and do not affect this forward output.
    count = float(N * H * W)
    mean = jnp.sum(psum, axis=(0, 1)).reshape(C) / count
    ex2 = jnp.sum(psq, axis=(0, 1)).reshape(C) / count
    var = jnp.maximum(ex2 - mean * mean, 0.0)
    scale = gamma.astype(jnp.float32) * jax.lax.rsqrt(var + eps)
    shift = beta.astype(jnp.float32) - mean * scale

    # pass 2: lane-dense normalize + affine + residual; the (N, C, H*W) views of
    # x and the output are free metadata reshapes of the contiguous NCHW arrays.
    x_flat = x_nchw.reshape(N, C, H * W)
    out_flat = pl.pallas_call(
        _bn_residual_kernel,
        grid=(N, n_h),
        in_specs=[
            pl.BlockSpec((1, C, m), lambda n, i: (n, 0, i)),
            pl.BlockSpec((1, C, m), lambda n, i: (n, 0, i)),
            pl.BlockSpec((C, 1), lambda n, i: (0, 0)),
            pl.BlockSpec((C, 1), lambda n, i: (0, 0)),
        ],
        out_specs=pl.BlockSpec((1, C, m), lambda n, i: (n, 0, i)),
        out_shape=jax.ShapeDtypeStruct((N, C, H * W), x_nchw.dtype),
        compiler_params=cparams,
    )(y, x_flat, scale.reshape(C, 1), shift.reshape(C, 1))

    return out_flat.reshape(N, C, H, W)


# --------------------------------------------------------------------------- #
# pure-JAX reference                                                           #
# --------------------------------------------------------------------------- #
def _reference(x, w, b, gamma, beta, dilation, neg_slope, eps):
    N, C, H, W = x.shape
    d = dilation
    xpad = jnp.pad(x, ((0, 0), (0, 0), (d, d), (d, d)), mode="edge")
    y = jax.lax.conv_general_dilated(
        xpad, w, window_strides=(1, 1), padding="VALID",
        rhs_dilation=(d, d), dimension_numbers=("NCHW", "OIHW", "NCHW"),
        precision=jax.lax.Precision.HIGHEST)
    y = y + b.reshape(1, C, 1, 1)
    y = jnp.where(y >= 0, y, neg_slope * y)
    mean = jnp.mean(y, axis=(0, 2, 3), keepdims=True)
    var = jnp.mean((y - mean) ** 2, axis=(0, 2, 3), keepdims=True)
    y = (y - mean) * jax.lax.rsqrt(var + eps)
    y = y * gamma.reshape(1, C, 1, 1) + beta.reshape(1, C, 1, 1)
    return y + x


# --------------------------------------------------------------------------- #
# demo / self-check                                                            #
# --------------------------------------------------------------------------- #
if __name__ == "__main__":
    eps = 1e-3   # nn.BatchNorm2d(..., eps=0.001) per the module

    def run_case(key, N, C, H, W, dilation, neg_slope, random_affine):
        kx, kw, kb, kg, kt = jax.random.split(key, 5)
        x = jax.random.normal(kx, (N, C, H, W), jnp.float32)

        # mirrors the module's __init__: kaiming_uniform_(a=neg_slope, fan_in)
        fan_in = C * 9
        gain = math.sqrt(2.0 / (1.0 + neg_slope ** 2))
        w_bound = gain * math.sqrt(3.0 / fan_in)
        w = jax.random.uniform(kw, (C, C, 3, 3), jnp.float32,
                               minval=-w_bound, maxval=w_bound)
        b_bound = 1.0 / math.sqrt(fan_in)
        b = jax.random.uniform(kb, (C,), jnp.float32, minval=-b_bound, maxval=b_bound)
        if random_affine:
            gamma = 1.0 + 0.1 * jax.random.normal(kg, (C,), jnp.float32)
            beta = 0.1 * jax.random.normal(kt, (C,), jnp.float32)
        else:
            gamma = jnp.ones((C,), jnp.float32)     # BatchNorm2d default affine init
            beta = jnp.zeros((C,), jnp.float32)

        fwd = jax.jit(functools.partial(dilated_res_block, dilation=dilation,
                                        negative_slope=neg_slope, eps=eps))
        out = jax.block_until_ready(fwd(x, w, b, gamma, beta))
        assert out.shape == (N, C, H, W)

        ref = jax.block_until_ready(
            _reference(x, w, b, gamma, beta, dilation, neg_slope, eps))
        err = float(jnp.max(jnp.abs(out - ref)))
        assert err < 2e-2, f"max abs error vs reference too large: {err}"

    key = jax.random.PRNGKey(0)
    k1, k2 = jax.random.split(key)
    # small-C (VPU/SMEM) path, d=2, 1 row tile per sample, both halos replicated
    run_case(k1, N=2, C=4, H=16, W=16, dilation=2, neg_slope=0.2, random_affine=False)
    # larger-C (9-dot MXU) path, d=1, 2 row tiles -> exercises real row halos
    run_case(k2, N=1, C=32, H=16, W=16, dilation=1, neg_slope=0.2, random_affine=True)

    print("KERNEL_OK")
</pallas_src>

<mosaic_0001>
module attributes {stable_mosaic.version = 11 : i64} {
  func.func @_conv_lrelu_kernel(%arg0: i32, %arg1: i32, %arg2: memref<1x4x16x16xf32, #tpu.memory_space<vmem>>, %arg3: memref<1x4x8x16xf32, #tpu.memory_space<vmem>>, %arg4: memref<1x4x8x16xf32, #tpu.memory_space<vmem>>, %arg5: memref<144xf32, #tpu.memory_space<smem>>, %arg6: memref<4xf32, #tpu.memory_space<smem>>, %arg7: memref<1x4x256xf32, #tpu.memory_space<vmem>>, %arg8: memref<1x1x4x1xf32, #tpu.memory_space<vmem>>, %arg9: memref<1x1x4x1xf32, #tpu.memory_space<vmem>>) attributes {dimension_semantics = [#tpu.dimension_semantics<parallel>, #tpu.dimension_semantics<parallel>], iteration_bounds = array<i64: 2, 1>, scalar_prefetch = 0 : i64, scratch_operands = 0 : i64, tpu.core_type = #tpu.core_type<tc>, window_params = [{transform_indices = @transform_0, window_bounds = array<i64: 1, 4, 16, 16>}, {transform_indices = @transform_1, window_bounds = array<i64: 1, 4, 8, 16>}, {transform_indices = @transform_2, window_bounds = array<i64: 1, 4, 8, 16>}, {transform_indices = @transform_3, window_bounds = array<i64: 144>}, {transform_indices = @transform_4, window_bounds = array<i64: 4>}, {transform_indices = @transform_5, window_bounds = array<i64: 1, 4, 256>}, {transform_indices = @transform_6, window_bounds = array<i64: 1, 1, 4, 1>}, {transform_indices = @transform_7, window_bounds = array<i64: 1, 1, 4, 1>}]} {
    %c0 = arith.constant 0 : index
    %c0_0 = arith.constant 0 : index
    %c0_1 = arith.constant 0 : index
    %c0_2 = arith.constant 0 : index
    %0 = vector.load %arg2[%c0, %c0_0, %c0_1, %c0_2] : memref<1x4x16x16xf32, #tpu.memory_space<vmem>>, vector<1x4x16x16xf32>
    %1 = vector.shape_cast %0 : vector<1x4x16x16xf32> to vector<4x16x16xf32>
    %c0_3 = arith.constant 0 : index
    %c0_4 = arith.constant 0 : index
    %c6 = arith.constant 6 : index
    %c0_5 = arith.constant 0 : index
    %2 = vector.load %arg3[%c0_3, %c0_4, %c6, %c0_5] : memref<1x4x8x16xf32, #tpu.memory_space<vmem>>, vector<1x4x2x16xf32>
    %3 = vector.shape_cast %2 : vector<1x4x2x16xf32> to vector<4x2x16xf32>
    %c0_6 = arith.constant 0 : index
    %c0_7 = arith.constant 0 : index
    %c0_8 = arith.constant 0 : index
    %c0_9 = arith.constant 0 : index
    %4 = vector.load %arg4[%c0_6, %c0_7, %c0_8, %c0_9] : memref<1x4x8x16xf32, #tpu.memory_space<vmem>>, vector<1x4x2x16xf32>
    %5 = vector.shape_cast %4 : vector<1x4x2x16xf32> to vector<4x2x16xf32>
    %6 = vector.extract_strided_slice %1 {offsets = [0, 0, 0], sizes = [4, 1, 16], strides = [1, 1, 1]} : vector<4x16x16xf32> to vector<4x1x16xf32>
    %7 = vector.extract_strided_slice %1 {offsets = [0, 15, 0], sizes = [4, 1, 16], strides = [1, 1, 1]} : vector<4x16x16xf32> to vector<4x1x16xf32>
    %c0_i32 = arith.constant 0 : i32
    %8 = arith.cmpi eq, %arg1, %c0_i32 : i32
    %9 = vector.shape_cast %6 : vector<4x1x16xf32> to vector<4x1x16xf32>
    %10 = vector.broadcast %9 : vector<4x1x16xf32> to vector<4x2x16xf32>
    %11 = arith.select %8, %10, %3 : vector<4x2x16xf32>
    %c0_i32_10 = arith.constant 0 : i32
    %12 = arith.cmpi eq, %arg1, %c0_i32_10 : i32
    %13 = vector.shape_cast %7 : vector<4x1x16xf32> to vector<4x1x16xf32>
    %14 = vector.broadcast %13 : vector<4x1x16xf32> to vector<4x2x16xf32>
    %15 = arith.select %12, %14, %5 : vector<4x2x16xf32>
    %16 = tpu.concatenate %11, %1, %15 in 1 : vector<4x2x16xf32>, vector<4x16x16xf32>, vector<4x2x16xf32> -> vector<4x20x16xf32>
    %17 = vector.extract_strided_slice %16 {offsets = [0, 0, 0], sizes = [4, 20, 1], strides = [1, 1, 1]} : vector<4x20x16xf32> to vector<4x20x1xf32>
    %18 = vector.shape_cast %17 : vector<4x20x1xf32> to vector<4x20x1xf32>
    %19 = vector.broadcast %18 : vector<4x20x1xf32> to vector<4x20x2xf32>
    %20 = vector.extract_strided_slice %16 {offsets = [0, 0, 15], sizes = [4, 20, 1], strides = [1, 1, 1]} : vector<4x20x16xf32> to vector<4x20x1xf32>
    %21 = vector.shape_cast %20 : vector<4x20x1xf32> to vector<4x20x1xf32>
    %22 = vector.broadcast %21 : vector<4x20x1xf32> to vector<4x20x2xf32>
    %23 = tpu.concatenate %19, %16, %22 in 2 : vector<4x20x2xf32>, vector<4x20x16xf32>, vector<4x20x2xf32> -> vector<4x20x20xf32>
    %24 = vector.extract_strided_slice %23 {offsets = [0, 0, 0], sizes = [1, 16, 16], strides = [1, 1, 1]} : vector<4x20x20xf32> to vector<1x16x16xf32>
    %25 = vector.shape_cast %24 : vector<1x16x16xf32> to vector<16x16xf32>
    %26 = vector.extract_strided_slice %23 {offsets = [0, 0, 2], sizes = [1, 16, 16], strides = [1, 1, 1]} : vector<4x20x20xf32> to vector<1x16x16xf32>
    %27 = vector.shape_cast %26 : vector<1x16x16xf32> to vector<16x16xf32>
    %28 = vector.extract_strided_slice %23 {offsets = [0, 0, 4], sizes = [1, 16, 16], strides = [1, 1, 1]} : vector<4x20x20xf32> to vector<1x16x16xf32>
    %29 = vector.shape_cast %28 : vector<1x16x16xf32> to vector<16x16xf32>
    %30 = vector.extract_strided_slice %23 {offsets = [0, 2, 0], sizes = [1, 16, 16], strides = [1, 1, 1]} : vector<4x20x20xf32> to vector<1x16x16xf32>
    %31 = vector.shape_cast %30 : vector<1x16x16xf32> to vector<16x16xf32>
    %32 = vector.extract_strided_slice %23 {offsets = [0, 2, 2], sizes = [1, 16, 16], strides = [1, 1, 1]} : vector<4x20x20xf32> to vector<1x16x16xf32>
    %33 = vector.shape_cast %32 : vector<1x16x16xf32> to vector<16x16xf32>
    %34 = vector.extract_strided_slice %23 {offsets = [0, 2, 4], sizes = [1, 16, 16], strides = [1, 1, 1]} : vector<4x20x20xf32> to vector<1x16x16xf32>
    %35 = vector.shape_cast %34 : vector<1x16x16xf32> to vector<16x16xf32>
    %36 = vector.extract_strided_slice %23 {offsets = [0, 4, 0], sizes = [1, 16, 16], strides = [1, 1, 1]} : vector<4x20x20xf32> to vector<1x16x16xf32>
    %37 = vector.shape_cast %36 : vector<1x16x16xf32> to vector<16x16xf32>
    %38 = vector.extract_strided_slice %23 {offsets = [0, 4, 2], sizes = [1, 16, 16], strides = [1, 1, 1]} : vector<4x20x20xf32> to vector<1x16x16xf32>
    %39 = vector.shape_cast %38 : vector<1x16x16xf32> to vector<16x16xf32>
    %40 = vector.extract_strided_slice %23 {offsets = [0, 4, 4], sizes = [1, 16, 16], strides = [1, 1, 1]} : vector<4x20x20xf32> to vector<1x16x16xf32>
    %41 = vector.shape_cast %40 : vector<1x16x16xf32> to vector<16x16xf32>
    %42 = vector.extract_strided_slice %23 {offsets = [1, 0, 0], sizes = [1, 16, 16], strides = [1, 1, 1]} : vector<4x20x20xf32> to vector<1x16x16xf32>
    %43 = vector.shape_cast %42 : vector<1x16x16xf32> to vector<16x16xf32>
    %44 = vector.extract_strided_slice %23 {offsets = [1, 0, 2], sizes = [1, 16, 16], strides = [1, 1, 1]} : vector<4x20x20xf32> to vector<1x16x16xf32>
    %45 = vector.shape_cast %44 : vector<1x16x16xf32> to vector<16x16xf32>
    %46 = vector.extract_strided_slice %23 {offsets = [1, 0, 4], sizes = [1, 16, 16], strides = [1, 1, 1]} : vector<4x20x20xf32> to vector<1x16x16xf32>
    %47 = vector.shape_cast %46 : vector<1x16x16xf32> to vector<16x16xf32>
    %48 = vector.extract_strided_slice %23 {offsets = [1, 2, 0], sizes = [1, 16, 16], strides = [1, 1, 1]} : vector<4x20x20xf32> to vector<1x16x16xf32>
    %49 = vector.shape_cast %48 : vector<1x16x16xf32> to vector<16x16xf32>
    %50 = vector.extract_strided_slice %23 {offsets = [1, 2, 2], sizes = [1, 16, 16], strides = [1, 1, 1]} : vector<4x20x20xf32> to vector<1x16x16xf32>
    %51 = vector.shape_cast %50 : vector<1x16x16xf32> to vector<16x16xf32>
    %52 = vector.extract_strided_slice %23 {offsets = [1, 2, 4], sizes = [1, 16, 16], strides = [1, 1, 1]} : vector<4x20x20xf32> to vector<1x16x16xf32>
    %53 = vector.shape_cast %52 : vector<1x16x16xf32> to vector<16x16xf32>
    %54 = vector.extract_strided_slice %23 {offsets = [1, 4, 0], sizes = [1, 16, 16], strides = [1, 1, 1]} : vector<4x20x20xf32> to vector<1x16x16xf32>
    %55 = vector.shape_cast %54 : vector<1x16x16xf32> to vector<16x16xf32>
    %56 = vector.extract_strided_slice %23 {offsets = [1, 4, 2], sizes = [1, 16, 16], strides = [1, 1, 1]} : vector<4x20x20xf32> to vector<1x16x16xf32>
    %57 = vector.shape_cast %56 : vector<1x16x16xf32> to vector<16x16xf32>
    %58 = vector.extract_strided_slice %23 {offsets = [1, 4, 4], sizes = [1, 16, 16], strides = [1, 1, 1]} : vector<4x20x20xf32> to vector<1x16x16xf32>
    %59 = vector.shape_cast %58 : vector<1x16x16xf32> to vector<16x16xf32>
    %60 = vector.extract_strided_slice %23 {offsets = [2, 0, 0], sizes = [1, 16, 16], strides = [1, 1, 1]} : vector<4x20x20xf32> to vector<1x16x16xf32>
    %61 = vector.shape_cast %60 : vector<1x16x16xf32> to vector<16x16xf32>
    %62 = vector.extract_strided_slice %23 {offsets = [2, 0, 2], sizes = [1, 16, 16], strides = [1, 1, 1]} : vector<4x20x20xf32> to vector<1x16x16xf32>
    %63 = vector.shape_cast %62 : vector<1x16x16xf32> to vector<16x16xf32>
    %64 = vector.extract_strided_slice %23 {offsets = [2, 0, 4], sizes = [1, 16, 16], strides = [1, 1, 1]} : vector<4x20x20xf32> to vector<1x16x16xf32>
    %65 = vector.shape_cast %64 : vector<1x16x16xf32> to vector<16x16xf32>
    %66 = vector.extract_strided_slice %23 {offsets = [2, 2, 0], sizes = [1, 16, 16], strides = [1, 1, 1]} : vector<4x20x20xf32> to vector<1x16x16xf32>
    %67 = vector.shape_cast %66 : vector<1x16x16xf32> to vector<16x16xf32>
    %68 = vector.extract_strided_slice %23 {offsets = [2, 2, 2], sizes = [1, 16, 16], strides = [1, 1, 1]} : vector<4x20x20xf32> to vector<1x16x16xf32>
    %69 = vector.shape_cast %68 : vector<1x16x16xf32> to vector<16x16xf32>
    %70 = vector.extract_strided_slice %23 {offsets = [2, 2, 4], sizes = [1, 16, 16], strides = [1, 1, 1]} : vector<4x20x20xf32> to vector<1x16x16xf32>
    %71 = vector.shape_cast %70 : vector<1x16x16xf32> to vector<16x16xf32>
    %72 = vector.extract_strided_slice %23 {offsets = [2, 4, 0], sizes = [1, 16, 16], strides = [1, 1, 1]} : vector<4x20x20xf32> to vector<1x16x16xf32>
    %73 = vector.shape_cast %72 : vector<1x16x16xf32> to vector<16x16xf32>
    %74 = vector.extract_strided_slice %23 {offsets = [2, 4, 2], sizes = [1, 16, 16], strides = [1, 1, 1]} : vector<4x20x20xf32> to vector<1x16x16xf32>
    %75 = vector.shape_cast %74 : vector<1x16x16xf32> to vector<16x16xf32>
    %76 = vector.extract_strided_slice %23 {offsets = [2, 4, 4], sizes = [1, 16, 16], strides = [1, 1, 1]} : vector<4x20x20xf32> to vector<1x16x16xf32>
    %77 = vector.shape_cast %76 : vector<1x16x16xf32> to vector<16x16xf32>
    %78 = vector.extract_strided_slice %23 {offsets = [3, 0, 0], sizes = [1, 16, 16], strides = [1, 1, 1]} : vector<4x20x20xf32> to vector<1x16x16xf32>
    %79 = vector.shape_cast %78 : vector<1x16x16xf32> to vector<16x16xf32>
    %80 = vector.extract_strided_slice %23 {offsets = [3, 0, 2], sizes = [1, 16, 16], strides = [1, 1, 1]} : vector<4x20x20xf32> to vector<1x16x16xf32>
    %81 = vector.shape_cast %80 : vector<1x16x16xf32> to vector<16x16xf32>
    %82 = vector.extract_strided_slice %23 {offsets = [3, 0, 4], sizes = [1, 16, 16], strides = [1, 1, 1]} : vector<4x20x20xf32> to vector<1x16x16xf32>
    %83 = vector.shape_cast %82 : vector<1x16x16xf32> to vector<16x16xf32>
    %84 = vector.extract_strided_slice %23 {offsets = [3, 2, 0], sizes = [1, 16, 16], strides = [1, 1, 1]} : vector<4x20x20xf32> to vector<1x16x16xf32>
    %85 = vector.shape_cast %84 : vector<1x16x16xf32> to vector<16x16xf32>
    %86 = vector.extract_strided_slice %23 {offsets = [3, 2, 2], sizes = [1, 16, 16], strides = [1, 1, 1]} : vector<4x20x20xf32> to vector<1x16x16xf32>
    %87 = vector.shape_cast %86 : vector<1x16x16xf32> to vector<16x16xf32>
    %88 = vector.extract_strided_slice %23 {offsets = [3, 2, 4], sizes = [1, 16, 16], strides = [1, 1, 1]} : vector<4x20x20xf32> to vector<1x16x16xf32>
    %89 = vector.shape_cast %88 : vector<1x16x16xf32> to vector<16x16xf32>
    %90 = vector.extract_strided_slice %23 {offsets = [3, 4, 0], sizes = [1, 16, 16], strides = [1, 1, 1]} : vector<4x20x20xf32> to vector<1x16x16xf32>
    %91 = vector.shape_cast %90 : vector<1x16x16xf32> to vector<16x16xf32>
    %92 = vector.extract_strided_slice %23 {offsets = [3, 4, 2], sizes = [1, 16, 16], strides = [1, 1, 1]} : vector<4x20x20xf32> to vector<1x16x16xf32>
    %93 = vector.shape_cast %92 : vector<1x16x16xf32> to vector<16x16xf32>
    %94 = vector.extract_strided_slice %23 {offsets = [3, 4, 4], sizes = [1, 16, 16], strides = [1, 1, 1]} : vector<4x20x20xf32> to vector<1x16x16xf32>
    %95 = vector.shape_cast %94 : vector<1x16x16xf32> to vector<16x16xf32>
    %c0_11 = arith.constant 0 : index
    %96 = memref.load %arg6[%c0_11] : memref<4xf32, #tpu.memory_space<smem>>
    %97 = vector.broadcast %96 : f32 to vector<16x16xf32>
    %c0_12 = arith.constant 0 : index
    %98 = memref.load %arg5[%c0_12] : memref<144xf32, #tpu.memory_space<smem>>
    %99 = vector.broadcast %98 : f32 to vector<16x16xf32>
    %100 = arith.mulf %99, %25 : vector<16x16xf32>
    %101 = arith.addf %97, %100 : vector<16x16xf32>
    %c1 = arith.constant 1 : index
    %102 = memref.load %arg5[%c1] : memref<144xf32, #tpu.memory_space<smem>>
    %103 = vector.broadcast %102 : f32 to vector<16x16xf32>
    %104 = arith.mulf %103, %27 : vector<16x16xf32>
    %105 = arith.addf %101, %104 : vector<16x16xf32>
    %c2 = arith.constant 2 : index
    %106 = memref.load %arg5[%c2] : memref<144xf32, #tpu.memory_space<smem>>
    %107 = vector.broadcast %106 : f32 to vector<16x16xf32>
    %108 = arith.mulf %107, %29 : vector<16x16xf32>
    %109 = arith.addf %105, %108 : vector<16x16xf32>
    %c3 = arith.constant 3 : index
    %110 = memref.load %arg5[%c3] : memref<144xf32, #tpu.memory_space<smem>>
    %111 = vector.broadcast %110 : f32 to vector<16x16xf32>
    %112 = arith.mulf %111, %31 : vector<16x16xf32>
    %113 = arith.addf %109, %112 : vector<16x16xf32>
    %c4 = arith.constant 4 : index
    %114 = memref.load %arg5[%c4] : memref<144xf32, #tpu.memory_space<smem>>
    %115 = vector.broadcast %114 : f32 to vector<16x16xf32>
    %116 = arith.mulf %115, %33 : vector<16x16xf32>
    %117 = arith.addf %113, %116 : vector<16x16xf32>
    %c5 = arith.constant 5 : index
    %118 = memref.load %arg5[%c5] : memref<144xf32, #tpu.memory_space<smem>>
    %119 = vector.broadcast %118 : f32 to vector<16x16xf32>
    %120 = arith.mulf %119, %35 : vector<16x16xf32>
    %121 = arith.addf %117, %120 : vector<16x16xf32>
    %c6_13 = arith.constant 6 : index
    %122 = memref.load %arg5[%c6_13] : memref<144xf32, #tpu.memory_space<smem>>
    %123 = vector.broadcast %122 : f32 to vector<16x16xf32>
    %124 = arith.mulf %123, %37 : vector<16x16xf32>
    %125 = arith.addf %121, %124 : vector<16x16xf32>
    %c7 = arith.constant 7 : index
    %126 = memref.load %arg5[%c7] : memref<144xf32, #tpu.memory_space<smem>>
    %127 = vector.broadcast %126 : f32 to vector<16x16xf32>
    %128 = arith.mulf %127, %39 : vector<16x16xf32>
    %129 = arith.addf %125, %128 : vector<16x16xf32>
    %c8 = arith.constant 8 : index
    %130 = memref.load %arg5[%c8] : memref<144xf32, #tpu.memory_space<smem>>
    %131 = vector.broadcast %130 : f32 to vector<16x16xf32>
    %132 = arith.mulf %131, %41 : vector<16x16xf32>
    %133 = arith.addf %129, %132 : vector<16x16xf32>
    %c9 = arith.constant 9 : index
    %134 = memref.load %arg5[%c9] : memref<144xf32, #tpu.memory_space<smem>>
    %135 = vector.broadcast %134 : f32 to vector<16x16xf32>
    %136 = arith.mulf %135, %43 : vector<16x16xf32>
    %137 = arith.addf %133, %136 : vector<16x16xf32>
    %c10 = arith.constant 10 : index
    %138 = memref.load %arg5[%c10] : memref<144xf32, #tpu.memory_space<smem>>
    %139 = vector.broadcast %138 : f32 to vector<16x16xf32>
    %140 = arith.mulf %139, %45 : vector<16x16xf32>
    %141 = arith.addf %137, %140 : vector<16x16xf32>
    %c11 = arith.constant 11 : index
    %142 = memref.load %arg5[%c11] : memref<144xf32, #tpu.memory_space<smem>>
    %143 = vector.broadcast %142 : f32 to vector<16x16xf32>
    %144 = arith.mulf %143, %47 : vector<16x16xf32>
    %145 = arith.addf %141, %144 : vector<16x16xf32>
    %c12 = arith.constant 12 : index
    %146 = memref.load %arg5[%c12] : memref<144xf32, #tpu.memory_space<smem>>
    %147 = vector.broadcast %146 : f32 to vector<16x16xf32>
    %148 = arith.mulf %147, %49 : vector<16x16xf32>
    %149 = arith.addf %145, %148 : vector<16x16xf32>
    %c13 = arith.constant 13 : index
    %150 = memref.load %arg5[%c13] : memref<144xf32, #tpu.memory_space<smem>>
    %151 = vector.broadcast %150 : f32 to vector<16x16xf32>
    %152 = arith.mulf %151, %51 : vector<16x16xf32>
    %153 = arith.addf %149, %152 : vector<16x16xf32>
    %c14 = arith.constant 14 : index
    %154 = memref.load %arg5[%c14] : memref<144xf32, #tpu.memory_space<smem>>
    %155 = vector.broadcast %154 : f32 to vector<16x16xf32>
    %156 = arith.mulf %155, %53 : vector<16x16xf32>
    %157 = arith.addf %153, %156 : vector<16x16xf32>
    %c15 = arith.constant 15 : index
    %158 = memref.load %arg5[%c15] : memref<144xf32, #tpu.memory_space<smem>>
    %159 = vector.broadcast %158 : f32 to vector<16x16xf32>
    %160 = arith.mulf %159, %55 : vector<16x16xf32>
    %161 = arith.addf %157, %160 : vector<16x16xf32>
    %c16 = arith.constant 16 : index
    %162 = memref.load %arg5[%c16] : memref<144xf32, #tpu.memory_space<smem>>
    %163 = vector.broadcast %162 : f32 to vector<16x16xf32>
    %164 = arith.mulf %163, %57 : vector<16x16xf32>
    %165 = arith.addf %161, %164 : vector<16x16xf32>
    %c17 = arith.constant 17 : index
    %166 = memref.load %arg5[%c17] : memref<144xf32, #tpu.memory_space<smem>>
    %167 = vector.broadcast %166 : f32 to vector<16x16xf32>
    %168 = arith.mulf %167, %59 : vector<16x16xf32>
    %169 = arith.addf %165, %168 : vector<16x16xf32>
    %c18 = arith.constant 18 : index
    %170 = memref.load %arg5[%c18] : memref<144xf32, #tpu.memory_space<smem>>
    %171 = vector.broadcast %170 : f32 to vector<16x16xf32>
    %172 = arith.mulf %171, %61 : vector<16x16xf32>
    %173 = arith.addf %169, %172 : vector<16x16xf32>
    %c19 = arith.constant 19 : index
    %174 = memref.load %arg5[%c19] : memref<144xf32, #tpu.memory_space<smem>>
    %175 = vector.broadcast %174 : f32 to vector<16x16xf32>
    %176 = arith.mulf %175, %63 : vector<16x16xf32>
    %177 = arith.addf %173, %176 : vector<16x16xf32>
    %c20 = arith.constant 20 : index
    %178 = memref.load %arg5[%c20] : memref<144xf32, #tpu.memory_space<smem>>
    %179 = vector.broadcast %178 : f32 to vector<16x16xf32>
    %180 = arith.mulf %179, %65 : vector<16x16xf32>
    %181 = arith.addf %177, %180 : vector<16x16xf32>
    %c21 = arith.constant 21 : index
    %182 = memref.load %arg5[%c21] : memref<144xf32, #tpu.memory_space<smem>>
    %183 = vector.broadcast %182 : f32 to vector<16x16xf32>
    %184 = arith.mulf %183, %67 : vector<16x16xf32>
    %185 = arith.addf %181, %184 : vector<16x16xf32>
    %c22 = arith.constant 22 : index
    %186 = memref.load %arg5[%c22] : memref<144xf32, #tpu.memory_space<smem>>
    %187 = vector.broadcast %186 : f32 to vector<16x16xf32>
    %188 = arith.mulf %187, %69 : vector<16x16xf32>
    %189 = arith.addf %185, %188 : vector<16x16xf32>
    %c23 = arith.constant 23 : index
    %190 = memref.load %arg5[%c23] : memref<144xf32, #tpu.memory_space<smem>>
    %191 = vector.broadcast %190 : f32 to vector<16x16xf32>
    %192 = arith.mulf %191, %71 : vector<16x16xf32>
    %193 = arith.addf %189, %192 : vector<16x16xf32>
    %c24 = arith.constant 24 : index
    %194 = memref.load %arg5[%c24] : memref<144xf32, #tpu.memory_space<smem>>
    %195 = vector.broadcast %194 : f32 to vector<16x16xf32>
    %196 = arith.mulf %195, %73 : vector<16x16xf32>
    %197 = arith.addf %193, %196 : vector<16x16xf32>
    %c25 = arith.constant 25 : index
    %198 = memref.load %arg5[%c25] : memref<144xf32, #tpu.memory_space<smem>>
    %199 = vector.broadcast %198 : f32 to vector<16x16xf32>
    %200 = arith.mulf %199, %75 : vector<16x16xf32>
    %201 = arith.addf %197, %200 : vector<16x16xf32>
    %c26 = arith.constant 26 : index
    %202 = memref.load %arg5[%c26] : memref<144xf32, #tpu.memory_space<smem>>
    %203 = vector.broadcast %202 : f32 to vector<16x16xf32>
    %204 = arith.mulf %203, %77 : vector<16x16xf32>
    %205 = arith.addf %201, %204 : vector<16x16xf32>
    %c27 = arith.constant 27 : index
    %206 = memref.load %arg5[%c27] : memref<144xf32, #tpu.memory_space<smem>>
    %207 = vector.broadcast %206 : f32 to vector<16x16xf32>
    %208 = arith.mulf %207, %79 : vector<16x16xf32>
    %209 = arith.addf %205, %208 : vector<16x16xf32>
    %c28 = arith.constant 28 : index
    %210 = memref.load %arg5[%c28] : memref<144xf32, #tpu.memory_space<smem>>
    %211 = vector.broadcast %210 : f32 to vector<16x16xf32>
    %212 = arith.mulf %211, %81 : vector<16x16xf32>
    %213 = arith.addf %209, %212 : vector<16x16xf32>
    %c29 = arith.constant 29 : index
    %214 = memref.load %arg5[%c29] : memref<144xf32, #tpu.memory_space<smem>>
    %215 = vector.broadcast %214 : f32 to vector<16x16xf32>
    %216 = arith.mulf %215, %83 : vector<16x16xf32>
    %217 = arith.addf %213, %216 : vector<16x16xf32>
    %c30 = arith.constant 30 : index
    %218 = memref.load %arg5[%c30] : memref<144xf32, #tpu.memory_space<smem>>
    %219 = vector.broadcast %218 : f32 to vector<16x16xf32>
    %220 = arith.mulf %219, %85 : vector<16x16xf32>
    %221 = arith.addf %217, %220 : vector<16x16xf32>
    %c31 = arith.constant 31 : index
    %222 = memref.load %arg5[%c31] : memref<144xf32, #tpu.memory_space<smem>>
    %223 = vector.broadcast %222 : f32 to vector<16x16xf32>
    %224 = arith.mulf %223, %87 : vector<16x16xf32>
    %225 = arith.addf %221, %224 : vector<16x16xf32>
    %c32 = arith.constant 32 : index
    %226 = memref.load %arg5[%c32] : memref<144xf32, #tpu.memory_space<smem>>
    %227 = vector.broadcast %226 : f32 to vector<16x16xf32>
    %228 = arith.mulf %227, %89 : vector<16x16xf32>
    %229 = arith.addf %225, %228 : vector<16x16xf32>
    %c33 = arith.constant 33 : index
    %230 = memref.load %arg5[%c33] : memref<144xf32, #tpu.memory_space<smem>>
    %231 = vector.broadcast %230 : f32 to vector<16x16xf32>
    %232 = arith.mulf %231, %91 : vector<16x16xf32>
    %233 = arith.addf %229, %232 : vector<16x16xf32>
    %c34 = arith.constant 34 : index
    %234 = memref.load %arg5[%c34] : memref<144xf32, #tpu.memory_space<smem>>
    %235 = vector.broadcast %234 : f32 to vector<16x16xf32>
    %236 = arith.mulf %235, %93 : vector<16x16xf32>
    %237 = arith.addf %233, %236 : vector<16x16xf32>
    %c35 = arith.constant 35 : index
    %238 = memref.load %arg5[%c35] : memref<144xf32, #tpu.memory_space<smem>>
    %239 = vector.broadcast %238 : f32 to vector<16x16xf32>
    %240 = arith.mulf %239, %95 : vector<16x16xf32>
    %241 = arith.addf %237, %240 : vector<16x16xf32>
    %c1_14 = arith.constant 1 : index
    %242 = memref.load %arg6[%c1_14] : memref<4xf32, #tpu.memory_space<smem>>
    %243 = vector.broadcast %242 : f32 to vector<16x16xf32>
    %c36 = arith.constant 36 : index
    %244 = memref.load %arg5[%c36] : memref<144xf32, #tpu.memory_space<smem>>
    %245 = vector.broadcast %244 : f32 to vector<16x16xf32>
    %246 = arith.mulf %245, %25 : vector<16x16xf32>
    %247 = arith.addf %243, %246 : vector<16x16xf32>
    %c37 = arith.constant 37 : index
    %248 = memref.load %arg5[%c37] : memref<144xf32, #tpu.memory_space<smem>>
    %249 = vector.broadcast %248 : f32 to vector<16x16xf32>
    %250 = arith.mulf %249, %27 : vector<16x16xf32>
    %251 = arith.addf %247, %250 : vector<16x16xf32>
    %c38 = arith.constant 38 : index
    %252 = memref.load %arg5[%c38] : memref<144xf32, #tpu.memory_space<smem>>
    %253 = vector.broadcast %252 : f32 to vector<16x16xf32>
    %254 = arith.mulf %253, %29 : vector<16x16xf32>
    %255 = arith.addf %251, %254 : vector<16x16xf32>
    %c39 = arith.constant 39 : index
    %256 = memref.load %arg5[%c39] : memref<144xf32, #tpu.memory_space<smem>>
    %257 = vector.broadcast %256 : f32 to vector<16x16xf32>
    %258 = arith.mulf %257, %31 : vector<16x16xf32>
    %259 = arith.addf %255, %258 : vector<16x16xf32>
    %c40 = arith.constant 40 : index
    %260 = memref.load %arg5[%c40] : memref<144xf32, #tpu.memory_space<smem>>
    %261 = vector.broadcast %260 : f32 to vector<16x16xf32>
    %262 = arith.mulf %261, %33 : vector<16x16xf32>
    %263 = arith.addf %259, %262 : vector<16x16xf32>
    %c41 = arith.constant 41 : index
    %264 = memref.load %arg5[%c41] : memref<144xf32, #tpu.memory_space<smem>>
    %265 = vector.broadcast %264 : f32 to vector<16x16xf32>
    %266 = arith.mulf %265, %35 : vector<16x16xf32>
    %267 = arith.addf %263, %266 : vector<16x16xf32>
    %c42 = arith.constant 42 : index
    %268 = memref.load %arg5[%c42] : memref<144xf32, #tpu.memory_space<smem>>
    %269 = vector.broadcast %268 : f32 to vector<16x16xf32>
    %270 = arith.mulf %269, %37 : vector<16x16xf32>
    %271 = arith.addf %267, %270 : vector<16x16xf32>
    %c43 = arith.constant 43 : index
    %272 = memref.load %arg5[%c43] : memref<144xf32, #tpu.memory_space<smem>>
    %273 = vector.broadcast %272 : f32 to vector<16x16xf32>
    %274 = arith.mulf %273, %39 : vector<16x16xf32>
    %275 = arith.addf %271, %274 : vector<16x16xf32>
    %c44 = arith.constant 44 : index
    %276 = memref.load %arg5[%c44] : memref<144xf32, #tpu.memory_space<smem>>
    %277 = vector.broadcast %276 : f32 to vector<16x16xf32>
    %278 = arith.mulf %277, %41 : vector<16x16xf32>
    %279 = arith.addf %275, %278 : vector<16x16xf32>
    %c45 = arith.constant 45 : index
    %280 = memref.load %arg5[%c45] : memref<144xf32, #tpu.memory_space<smem>>
    %281 = vector.broadcast %280 : f32 to vector<16x16xf32>
    %282 = arith.mulf %281, %43 : vector<16x16xf32>
    %283 = arith.addf %279, %282 : vector<16x16xf32>
    %c46 = arith.constant 46 : index
    %284 = memref.load %arg5[%c46] : memref<144xf32, #tpu.memory_space<smem>>
    %285 = vector.broadcast %284 : f32 to vector<16x16xf32>
    %286 = arith.mulf %285, %45 : vector<16x16xf32>
    %287 = arith.addf %283, %286 : vector<16x16xf32>
    %c47 = arith.constant 47 : index
    %288 = memref.load %arg5[%c47] : memref<144xf32, #tpu.memory_space<smem>>
    %289 = vector.broadcast %288 : f32 to vector<16x16xf32>
    %290 = arith.mulf %289, %47 : vector<16x16xf32>
    %291 = arith.addf %287, %290 : vector<16x16xf32>
    %c48 = arith.constant 48 : index
    %292 = memref.load %arg5[%c48] : memref<144xf32, #tpu.memory_space<smem>>
    %293 = vector.broadcast %292 : f32 to vector<16x16xf32>
    %294 = arith.mulf %293, %49 : vector<16x16xf32>
    %295 = arith.addf %291, %294 : vector<16x16xf32>
    %c49 = arith.constant 49 : index
    %296 = memref.load %arg5[%c49] : memref<144xf32, #tpu.memory_space<smem>>
    %297 = vector.broadcast %296 : f32 to vector<16x16xf32>
    %298 = arith.mulf %297, %51 : vector<16x16xf32>
    %299 = arith.addf %295, %298 : vector<16x16xf32>
    %c50 = arith.constant 50 : index
    %300 = memref.load %arg5[%c50] : memref<144xf32, #tpu.memory_space<smem>>
    %301 = vector.broadcast %300 : f32 to vector<16x16xf32>
    %302 = arith.mulf %301, %53 : vector<16x16xf32>
    %303 = arith.addf %299, %302 : vector<16x16xf32>
    %c51 = arith.constant 51 : index
    %304 = memref.load %arg5[%c51] : memref<144xf32, #tpu.memory_space<smem>>
    %305 = vector.broadcast %304 : f32 to vector<16x16xf32>
    %306 = arith.mulf %305, %55 : vector<16x16xf32>
    %307 = arith.addf %303, %306 : vector<16x16xf32>
    %c52 = arith.constant 52 : index
    %308 = memref.load %arg5[%c52] : memref<144xf32, #tpu.memory_space<smem>>
    %309 = vector.broadcast %308 : f32 to vector<16x16xf32>
    %310 = arith.mulf %309, %57 : vector<16x16xf32>
    %311 = arith.addf %307, %310 : vector<16x16xf32>
    %c53 = arith.constant 53 : index
    %312 = memref.load %arg5[%c53] : memref<144xf32, #tpu.memory_space<smem>>
    %313 = vector.broadcast %312 : f32 to vector<16x16xf32>
    %314 = arith.mulf %313, %59 : vector<16x16xf32>
    %315 = arith.addf %311, %314 : vector<16x16xf32>
    %c54 = arith.constant 54 : index
    %316 = memref.load %arg5[%c54] : memref<144xf32, #tpu.memory_space<smem>>
    %317 = vector.broadcast %316 : f32 to vector<16x16xf32>
    %318 = arith.mulf %317, %61 : vector<16x16xf32>
    %319 = arith.addf %315, %318 : vector<16x16xf32>
    %c55 = arith.constant 55 : index
    %320 = memref.load %arg5[%c55] : memref<144xf32, #tpu.memory_space<smem>>
    %321 = vector.broadcast %320 : f32 to vector<16x16xf32>
    %322 = arith.mulf %321, %63 : vector<16x16xf32>
    %323 = arith.addf %319, %322 : vector<16x16xf32>
    %c56 = arith.constant 56 : index
    %324 = memref.load %arg5[%c56] : memref<144xf32, #tpu.memory_space<smem>>
    %325 = vector.broadcast %324 : f32 to vector<16x16xf32>
    %326 = arith.mulf %325, %65 : vector<16x16xf32>
    %327 = arith.addf %323, %326 : vector<16x16xf32>
    %c57 = arith.constant 57 : index
    %328 = memref.load %arg5[%c57] : memref<144xf32, #tpu.memory_space<smem>>
    %329 = vector.broadcast %328 : f32 to vector<16x16xf32>
    %330 = arith.mulf %329, %67 : vector<16x16xf32>
    %331 = arith.addf %327, %330 : vector<16x16xf32>
    %c58 = arith.constant 58 : index
    %332 = memref.load %arg5[%c58] : memref<144xf32, #tpu.memory_space<smem>>
    %333 = vector.broadcast %332 : f32 to vector<16x16xf32>
    %334 = arith.mulf %333, %69 : vector<16x16xf32>
    %335 = arith.addf %331, %334 : vector<16x16xf32>
    %c59 = arith.constant 59 : index
    %336 = memref.load %arg5[%c59] : memref<144xf32, #tpu.memory_space<smem>>
    %337 = vector.broadcast %336 : f32 to vector<16x16xf32>
    %338 = arith.mulf %337, %71 : vector<16x16xf32>
    %339 = arith.addf %335, %338 : vector<16x16xf32>
    %c60 = arith.constant 60 : index
    %340 = memref.load %arg5[%c60] : memref<144xf32, #tpu.memory_space<smem>>
    %341 = vector.broadcast %340 : f32 to vector<16x16xf32>
    %342 = arith.mulf %341, %73 : vector<16x16xf32>
    %343 = arith.addf %339, %342 : vector<16x16xf32>
    %c61 = arith.constant 61 : index
    %344 = memref.load %arg5[%c61] : memref<144xf32, #tpu.memory_space<smem>>
    %345 = vector.broadcast %344 : f32 to vector<16x16xf32>
    %346 = arith.mulf %345, %75 : vector<16x16xf32>
    %347 = arith.addf %343, %346 : vector<16x16xf32>
    %c62 = arith.constant 62 : index
    %348 = memref.load %arg5[%c62] : memref<144xf32, #tpu.memory_space<smem>>
    %349 = vector.broadcast %348 : f32 to vector<16x16xf32>
    %350 = arith.mulf %349, %77 : vector<16x16xf32>
    %351 = arith.addf %347, %350 : vector<16x16xf32>
    %c63 = arith.constant 63 : index
    %352 = memref.load %arg5[%c63] : memref<144xf32, #tpu.memory_space<smem>>
    %353 = vector.broadcast %352 : f32 to vector<16x16xf32>
    %354 = arith.mulf %353, %79 : vector<16x16xf32>
    %355 = arith.addf %351, %354 : vector<16x16xf32>
    %c64 = arith.constant 64 : index
    %356 = memref.load %arg5[%c64] : memref<144xf32, #tpu.memory_space<smem>>
    %357 = vector.broadcast %356 : f32 to vector<16x16xf32>
    %358 = arith.mulf %357, %81 : vector<16x16xf32>
    %359 = arith.addf %355, %358 : vector<16x16xf32>
    %c65 = arith.constant 65 : index
    %360 = memref.load %arg5[%c65] : memref<144xf32, #tpu.memory_space<smem>>
    %361 = vector.broadcast %360 : f32 to vector<16x16xf32>
    %362 = arith.mulf %361, %83 : vector<16x16xf32>
    %363 = arith.addf %359, %362 : vector<16x16xf32>
    %c66 = arith.constant 66 : index
    %364 = memref.load %arg5[%c66] : memref<144xf32, #tpu.memory_space<smem>>
    %365 = vector.broadcast %364 : f32 to vector<16x16xf32>
    %366 = arith.mulf %365, %85 : vector<16x16xf32>
    %367 = arith.addf %363, %366 : vector<16x16xf32>
    %c67 = arith.constant 67 : index
    %368 = memref.load %arg5[%c67] : memref<144xf32, #tpu.memory_space<smem>>
    %369 = vector.broadcast %368 : f32 to vector<16x16xf32>
    %370 = arith.mulf %369, %87 : vector<16x16xf32>
    %371 = arith.addf %367, %370 : vector<16x16xf32>
    %c68 = arith.constant 68 : index
    %372 = memref.load %arg5[%c68] : memref<144xf32, #tpu.memory_space<smem>>
    %373 = vector.broadcast %372 : f32 to vector<16x16xf32>
    %374 = arith.mulf %373, %89 : vector<16x16xf32>
    %375 = arith.addf %371, %374 : vector<16x16xf32>
    %c69 = arith.constant 69 : index
    %376 = memref.load %arg5[%c69] : memref<144xf32, #tpu.memory_space<smem>>
    %377 = vector.broadcast %376 : f32 to vector<16x16xf32>
    %378 = arith.mulf %377, %91 : vector<16x16xf32>
    %379 = arith.addf %375, %378 : vector<16x16xf32>
    %c70 = arith.constant 70 : index
    %380 = memref.load %arg5[%c70] : memref<144xf32, #tpu.memory_space<smem>>
    %381 = vector.broadcast %380 : f32 to vector<16x16xf32>
    %382 = arith.mulf %381, %93 : vector<16x16xf32>
    %383 = arith.addf %379, %382 : vector<16x16xf32>
    %c71 = arith.constant 71 : index
    %384 = memref.load %arg5[%c71] : memref<144xf32, #tpu.memory_space<smem>>
    %385 = vector.broadcast %384 : f32 to vector<16x16xf32>
    %386 = arith.mulf %385, %95 : vector<16x16xf32>
    %387 = arith.addf %383, %386 : vector<16x16xf32>
    %c2_15 = arith.constant 2 : index
    %388 = memref.load %arg6[%c2_15] : memref<4xf32, #tpu.memory_space<smem>>
    %389 = vector.broadcast %388 : f32 to vector<16x16xf32>
    %c72 = arith.constant 72 : index
    %390 = memref.load %arg5[%c72] : memref<144xf32, #tpu.memory_space<smem>>
    %391 = vector.broadcast %390 : f32 to vector<16x16xf32>
    %392 = arith.mulf %391, %25 : vector<16x16xf32>
    %393 = arith.addf %389, %392 : vector<16x16xf32>
    %c73 = arith.constant 73 : index
    %394 = memref.load %arg5[%c73] : memref<144xf32, #tpu.memory_space<smem>>
    %395 = vector.broadcast %394 : f32 to vector<16x16xf32>
    %396 = arith.mulf %395, %27 : vector<16x16xf32>
    %397 = arith.addf %393, %396 : vector<16x16xf32>
    %c74 = arith.constant 74 : index
    %398 = memref.load %arg5[%c74] : memref<144xf32, #tpu.memory_space<smem>>
    %399 = vector.broadcast %398 : f32 to vector<16x16xf32>
    %400 = arith.mulf %399, %29 : vector<16x16xf32>
    %401 = arith.addf %397, %400 : vector<16x16xf32>
    %c75 = arith.constant 75 : index
    %402 = memref.load %arg5[%c75] : memref<144xf32, #tpu.memory_space<smem>>
    %403 = vector.broadcast %402 : f32 to vector<16x16xf32>
    %404 = arith.mulf %403, %31 : vector<16x16xf32>
    %405 = arith.addf %401, %404 : vector<16x16xf32>
    %c76 = arith.constant 76 : index
    %406 = memref.load %arg5[%c76] : memref<144xf32, #tpu.memory_space<smem>>
    %407 = vector.broadcast %406 : f32 to vector<16x16xf32>
    %408 = arith.mulf %407, %33 : vector<16x16xf32>
    %409 = arith.addf %405, %408 : vector<16x16xf32>
    %c77 = arith.constant 77 : index
    %410 = memref.load %arg5[%c77] : memref<144xf32, #tpu.memory_space<smem>>
    %411 = vector.broadcast %410 : f32 to vector<16x16xf32>
    %412 = arith.mulf %411, %35 : vector<16x16xf32>
    %413 = arith.addf %409, %412 : vector<16x16xf32>
    %c78 = arith.constant 78 : index
    %414 = memref.load %arg5[%c78] : memref<144xf32, #tpu.memory_space<smem>>
    %415 = vector.broadcast %414 : f32 to vector<16x16xf32>
    %416 = arith.mulf %415, %37 : vector<16x16xf32>
    %417 = arith.addf %413, %416 : vector<16x16xf32>
    %c79 = arith.constant 79 : index
    %418 = memref.load %arg5[%c79] : memref<144xf32, #tpu.memory_space<smem>>
    %419 = vector.broadcast %418 : f32 to vector<16x16xf32>
    %420 = arith.mulf %419, %39 : vector<16x16xf32>
    %421 = arith.addf %417, %420 : vector<16x16xf32>
    %c80 = arith.constant 80 : index
    %422 = memref.load %arg5[%c80] : memref<144xf32, #tpu.memory_space<smem>>
    %423 = vector.broadcast %422 : f32 to vector<16x16xf32>
    %424 = arith.mulf %423, %41 : vector<16x16xf32>
    %425 = arith.addf %421, %424 : vector<16x16xf32>
    %c81 = arith.constant 81 : index
    %426 = memref.load %arg5[%c81] : memref<144xf32, #tpu.memory_space<smem>>
    %427 = vector.broadcast %426 : f32 to vector<16x16xf32>
    %428 = arith.mulf %427, %43 : vector<16x16xf32>
    %429 = arith.addf %425, %428 : vector<16x16xf32>
    %c82 = arith.constant 82 : index
    %430 = memref.load %arg5[%c82] : memref<144xf32, #tpu.memory_space<smem>>
    %431 = vector.broadcast %430 : f32 to vector<16x16xf32>
    %432 = arith.mulf %431, %45 : vector<16x16xf32>
    %433 = arith.addf %429, %432 : vector<16x16xf32>
    %c83 = arith.constant 83 : index
    %434 = memref.load %arg5[%c83] : memref<144xf32, #tpu.memory_space<smem>>
    %435 = vector.broadcast %434 : f32 to vector<16x16xf32>
    %436 = arith.mulf %435, %47 : vector<16x16xf32>
    %437 = arith.addf %433, %436 : vector<16x16xf32>
    %c84 = arith.constant 84 : index
    %438 = memref.load %arg5[%c84] : memref<144xf32, #tpu.memory_space<smem>>
    %439 = vector.broadcast %438 : f32 to vector<16x16xf32>
    %440 = arith.mulf %439, %49 : vector<16x16xf32>
    %441 = arith.addf %437, %440 : vector<16x16xf32>
    %c85 = arith.constant 85 : index
    %442 = memref.load %arg5[%c85] : memref<144xf32, #tpu.memory_space<smem>>
    %443 = vector.broadcast %442 : f32 to vector<16x16xf32>
    %444 = arith.mulf %443, %51 : vector<16x16xf32>
    %445 = arith.addf %441, %444 : vector<16x16xf32>
    %c86 = arith.constant 86 : index
    %446 = memref.load %arg5[%c86] : memref<144xf32, #tpu.memory_space<smem>>
    %447 = vector.broadcast %446 : f32 to vector<16x16xf32>
    %448 = arith.mulf %447, %53 : vector<16x16xf32>
    %449 = arith.addf %445, %448 : vector<16x16xf32>
    %c87 = arith.constant 87 : index
    %450 = memref.load %arg5[%c87] : memref<144xf32, #tpu.memory_space<smem>>
    %451 = vector.broadcast %450 : f32 to vector<16x16xf32>
    %452 = arith.mulf %451, %55 : vector<16x16xf32>
    %453 = arith.addf %449, %452 : vector<16x16xf32>
    %c88 = arith.constant 88 : index
    %454 = memref.load %arg5[%c88] : memref<144xf32, #tpu.memory_space<smem>>
    %455 = vector.broadcast %454 : f32 to vector<16x16xf32>
    %456 = arith.mulf %455, %57 : vector<16x16xf32>
    %457 = arith.addf %453, %456 : vector<16x16xf32>
    %c89 = arith.constant 89 : index
    %458 = memref.load %arg5[%c89] : memref<144xf32, #tpu.memory_space<smem>>
    %459 = vector.broadcast %458 : f32 to vector<16x16xf32>
    %460 = arith.mulf %459, %59 : vector<16x16xf32>
    %461 = arith.addf %457, %460 : vector<16x16xf32>
    %c90 = arith.constant 90 : index
    %462 = memref.load %arg5[%c90] : memref<144xf32, #tpu.memory_space<smem>>
    %463 = vector.broadcast %462 : f32 to vector<16x16xf32>
    %464 = arith.mulf %463, %61 : vector<16x16xf32>
    %465 = arith.addf %461, %464 : vector<16x16xf32>
    %c91 = arith.constant 91 : index
    %466 = memref.load %arg5[%c91] : memref<144xf32, #tpu.memory_space<smem>>
    %467 = vector.broadcast %466 : f32 to vector<16x16xf32>
    %468 = arith.mulf %467, %63 : vector<16x16xf32>
    %469 = arith.addf %465, %468 : vector<16x16xf32>
    %c92 = arith.constant 92 : index
    %470 = memref.load %arg5[%c92] : memref<144xf32, #tpu.memory_space<smem>>
    %471 = vector.broadcast %470 : f32 to vector<16x16xf32>
    %472 = arith.mulf %471, %65 : vector<16x16xf32>
    %473 = arith.addf %469, %472 : vector<16x16xf32>
    %c93 = arith.constant 93 : index
    %474 = memref.load %arg5[%c93] : memref<144xf32, #tpu.memory_space<smem>>
    %475 = vector.broadcast %474 : f32 to vector<16x16xf32>
    %476 = arith.mulf %475, %67 : vector<16x16xf32>
    %477 = arith.addf %473, %476 : vector<16x16xf32>
    %c94 = arith.constant 94 : index
    %478 = memref.load %arg5[%c94] : memref<144xf32, #tpu.memory_space<smem>>
    %479 = vector.broadcast %478 : f32 to vector<16x16xf32>
    %480 = arith.mulf %479, %69 : vector<16x16xf32>
    %481 = arith.addf %477, %480 : vector<16x16xf32>
    %c95 = arith.constant 95 : index
    %482 = memref.load %arg5[%c95] : memref<144xf32, #tpu.memory_space<smem>>
    %483 = vector.broadcast %482 : f32 to vector<16x16xf32>
    %484 = arith.mulf %483, %71 : vector<16x16xf32>
    %485 = arith.addf %481, %484 : vector<16x16xf32>
    %c96 = arith.constant 96 : index
    %486 = memref.load %arg5[%c96] : memref<144xf32, #tpu.memory_space<smem>>
    %487 = vector.broadcast %486 : f32 to vector<16x16xf32>
    %488 = arith.mulf %487, %73 : vector<16x16xf32>
    %489 = arith.addf %485, %488 : vector<16x16xf32>
    %c97 = arith.constant 97 : index
    %490 = memref.load %arg5[%c97] : memref<144xf32, #tpu.memory_space<smem>>
    %491 = vector.broadcast %490 : f32 to vector<16x16xf32>
    %492 = arith.mulf %491, %75 : vector<16x16xf32>
    %493 = arith.addf %489, %492 : vector<16x16xf32>
    %c98 = arith.constant 98 : index
    %494 = memref.load %arg5[%c98] : memref<144xf32, #tpu.memory_space<smem>>
    %495 = vector.broadcast %494 : f32 to vector<16x16xf32>
    %496 = arith.mulf %495, %77 : vector<16x16xf32>
    %497 = arith.addf %493, %496 : vector<16x16xf32>
    %c99 = arith.constant 99 : index
    %498 = memref.load %arg5[%c99] : memref<144xf32, #tpu.memory_space<smem>>
    %499 = vector.broadcast %498 : f32 to vector<16x16xf32>
    %500 = arith.mulf %499, %79 : vector<16x16xf32>
    %501 = arith.addf %497, %500 : vector<16x16xf32>
    %c100 = arith.constant 100 : index
    %502 = memref.load %arg5[%c100] : memref<144xf32, #tpu.memory_space<smem>>
    %503 = vector.broadcast %502 : f32 to vector<16x16xf32>
    %504 = arith.mulf %503, %81 : vector<16x16xf32>
    %505 = arith.addf %501, %504 : vector<16x16xf32>
    %c101 = arith.constant 101 : index
    %506 = memref.load %arg5[%c101] : memref<144xf32, #tpu.memory_space<smem>>
    %507 = vector.broadcast %506 : f32 to vector<16x16xf32>
    %508 = arith.mulf %507, %83 : vector<16x16xf32>
    %509 = arith.addf %505, %508 : vector<16x16xf32>
    %c102 = arith.constant 102 : index
    %510 = memref.load %arg5[%c102] : memref<144xf32, #tpu.memory_space<smem>>
    %511 = vector.broadcast %510 : f32 to vector<16x16xf32>
    %512 = arith.mulf %511, %85 : vector<16x16xf32>
    %513 = arith.addf %509, %512 : vector<16x16xf32>
    %c103 = arith.constant 103 : index
    %514 = memref.load %arg5[%c103] : memref<144xf32, #tpu.memory_space<smem>>
    %515 = vector.broadcast %514 : f32 to vector<16x16xf32>
    %516 = arith.mulf %515, %87 : vector<16x16xf32>
    %517 = arith.addf %513, %516 : vector<16x16xf32>
    %c104 = arith.constant 104 : index
    %518 = memref.load %arg5[%c104] : memref<144xf32, #tpu.memory_space<smem>>
    %519 = vector.broadcast %518 : f32 to vector<16x16xf32>
    %520 = arith.mulf %519, %89 : vector<16x16xf32>
    %521 = arith.addf %517, %520 : vector<16x16xf32>
    %c105 = arith.constant 105 : index
    %522 = memref.load %arg5[%c105] : memref<144xf32, #tpu.memory_space<smem>>
    %523 = vector.broadcast %522 : f32 to vector<16x16xf32>
    %524 = arith.mulf %523, %91 : vector<16x16xf32>
    %525 = arith.addf %521, %524 : vector<16x16xf32>
    %c106 = arith.constant 106 : index
    %526 = memref.load %arg5[%c106] : memref<144xf32, #tpu.memory_space<smem>>
    %527 = vector.broadcast %526 : f32 to vector<16x16xf32>
    %528 = arith.mulf %527, %93 : vector<16x16xf32>
    %529 = arith.addf %525, %528 : vector<16x16xf32>
    %c107 = arith.constant 107 : index
    %530 = memref.load %arg5[%c107] : memref<144xf32, #tpu.memory_space<smem>>
    %531 = vector.broadcast %530 : f32 to vector<16x16xf32>
    %532 = arith.mulf %531, %95 : vector<16x16xf32>
    %533 = arith.addf %529, %532 : vector<16x16xf32>
    %c3_16 = arith.constant 3 : index
    %534 = memref.load %arg6[%c3_16] : memref<4xf32, #tpu.memory_space<smem>>
    %535 = vector.broadcast %534 : f32 to vector<16x16xf32>
    %c108 = arith.constant 108 : index
    %536 = memref.load %arg5[%c108] : memref<144xf32, #tpu.memory_space<smem>>
    %537 = vector.broadcast %536 : f32 to vector<16x16xf32>
    %538 = arith.mulf %537, %25 : vector<16x16xf32>
    %539 = arith.addf %535, %538 : vector<16x16xf32>
    %c109 = arith.constant 109 : index
    %540 = memref.load %arg5[%c109] : memref<144xf32, #tpu.memory_space<smem>>
    %541 = vector.broadcast %540 : f32 to vector<16x16xf32>
    %542 = arith.mulf %541, %27 : vector<16x16xf32>
    %543 = arith.addf %539, %542 : vector<16x16xf32>
    %c110 = arith.constant 110 : index
    %544 = memref.load %arg5[%c110] : memref<144xf32, #tpu.memory_space<smem>>
    %545 = vector.broadcast %544 : f32 to vector<16x16xf32>
    %546 = arith.mulf %545, %29 : vector<16x16xf32>
    %547 = arith.addf %543, %546 : vector<16x16xf32>
    %c111 = arith.constant 111 : index
    %548 = memref.load %arg5[%c111] : memref<144xf32, #tpu.memory_space<smem>>
    %549 = vector.broadcast %548 : f32 to vector<16x16xf32>
    %550 = arith.mulf %549, %31 : vector<16x16xf32>
    %551 = arith.addf %547, %550 : vector<16x16xf32>
    %c112 = arith.constant 112 : index
    %552 = memref.load %arg5[%c112] : memref<144xf32, #tpu.memory_space<smem>>
    %553 = vector.broadcast %552 : f32 to vector<16x16xf32>
    %554 = arith.mulf %553, %33 : vector<16x16xf32>
    %555 = arith.addf %551, %554 : vector<16x16xf32>
    %c113 = arith.constant 113 : index
    %556 = memref.load %arg5[%c113] : memref<144xf32, #tpu.memory_space<smem>>
    %557 = vector.broadcast %556 : f32 to vector<16x16xf32>
    %558 = arith.mulf %557, %35 : vector<16x16xf32>
    %559 = arith.addf %555, %558 : vector<16x16xf32>
    %c114 = arith.constant 114 : index
    %560 = memref.load %arg5[%c114] : memref<144xf32, #tpu.memory_space<smem>>
    %561 = vector.broadcast %560 : f32 to vector<16x16xf32>
    %562 = arith.mulf %561, %37 : vector<16x16xf32>
    %563 = arith.addf %559, %562 : vector<16x16xf32>
    %c115 = arith.constant 115 : index
    %564 = memref.load %arg5[%c115] : memref<144xf32, #tpu.memory_space<smem>>
    %565 = vector.broadcast %564 : f32 to vector<16x16xf32>
    %566 = arith.mulf %565, %39 : vector<16x16xf32>
    %567 = arith.addf %563, %566 : vector<16x16xf32>
    %c116 = arith.constant 116 : index
    %568 = memref.load %arg5[%c116] : memref<144xf32, #tpu.memory_space<smem>>
    %569 = vector.broadcast %568 : f32 to vector<16x16xf32>
    %570 = arith.mulf %569, %41 : vector<16x16xf32>
    %571 = arith.addf %567, %570 : vector<16x16xf32>
    %c117 = arith.constant 117 : index
    %572 = memref.load %arg5[%c117] : memref<144xf32, #tpu.memory_space<smem>>
    %573 = vector.broadcast %572 : f32 to vector<16x16xf32>
    %574 = arith.mulf %573, %43 : vector<16x16xf32>
    %575 = arith.addf %571, %574 : vector<16x16xf32>
    %c118 = arith.constant 118 : index
    %576 = memref.load %arg5[%c118] : memref<144xf32, #tpu.memory_space<smem>>
    %577 = vector.broadcast %576 : f32 to vector<16x16xf32>
    %578 = arith.mulf %577, %45 : vector<16x16xf32>
    %579 = arith.addf %575, %578 : vector<16x16xf32>
    %c119 = arith.constant 119 : index
    %580 = memref.load %arg5[%c119] : memref<144xf32, #tpu.memory_space<smem>>
    %581 = vector.broadcast %580 : f32 to vector<16x16xf32>
    %582 = arith.mulf %581, %47 : vector<16x16xf32>
    %583 = arith.addf %579, %582 : vector<16x16xf32>
    %c120 = arith.constant 120 : index
    %584 = memref.load %arg5[%c120] : memref<144xf32, #tpu.memory_space<smem>>
    %585 = vector.broadcast %584 : f32 to vector<16x16xf32>
    %586 = arith.mulf %585, %49 : vector<16x16xf32>
    %587 = arith.addf %583, %586 : vector<16x16xf32>
    %c121 = arith.constant 121 : index
    %588 = memref.load %arg5[%c121] : memref<144xf32, #tpu.memory_space<smem>>
    %589 = vector.broadcast %588 : f32 to vector<16x16xf32>
    %590 = arith.mulf %589, %51 : vector<16x16xf32>
    %591 = arith.addf %587, %590 : vector<16x16xf32>
    %c122 = arith.constant 122 : index
    %592 = memref.load %arg5[%c122] : memref<144xf32, #tpu.memory_space<smem>>
    %593 = vector.broadcast %592 : f32 to vector<16x16xf32>
    %594 = arith.mulf %593, %53 : vector<16x16xf32>
    %595 = arith.addf %591, %594 : vector<16x16xf32>
    %c123 = arith.constant 123 : index
    %596 = memref.load %arg5[%c123] : memref<144xf32, #tpu.memory_space<smem>>
    %597 = vector.broadcast %596 : f32 to vector<16x16xf32>
    %598 = arith.mulf %597, %55 : vector<16x16xf32>
    %599 = arith.addf %595, %598 : vector<16x16xf32>
    %c124 = arith.constant 124 : index
    %600 = memref.load %arg5[%c124] : memref<144xf32, #tpu.memory_space<smem>>
    %601 = vector.broadcast %600 : f32 to vector<16x16xf32>
    %602 = arith.mulf %601, %57 : vector<16x16xf32>
    %603 = arith.addf %599, %602 : vector<16x16xf32>
    %c125 = arith.constant 125 : index
    %604 = memref.load %arg5[%c125] : memref<144xf32, #tpu.memory_space<smem>>
    %605 = vector.broadcast %604 : f32 to vector<16x16xf32>
    %606 = arith.mulf %605, %59 : vector<16x16xf32>
    %607 = arith.addf %603, %606 : vector<16x16xf32>
    %c126 = arith.constant 126 : index
    %608 = memref.load %arg5[%c126] : memref<144xf32, #tpu.memory_space<smem>>
    %609 = vector.broadcast %608 : f32 to vector<16x16xf32>
    %610 = arith.mulf %609, %61 : vector<16x16xf32>
    %611 = arith.addf %607, %610 : vector<16x16xf32>
    %c127 = arith.constant 127 : index
    %612 = memref.load %arg5[%c127] : memref<144xf32, #tpu.memory_space<smem>>
    %613 = vector.broadcast %612 : f32 to vector<16x16xf32>
    %614 = arith.mulf %613, %63 : vector<16x16xf32>
    %615 = arith.addf %611, %614 : vector<16x16xf32>
    %c128 = arith.constant 128 : index
    %616 = memref.load %arg5[%c128] : memref<144xf32, #tpu.memory_space<smem>>
    %617 = vector.broadcast %616 : f32 to vector<16x16xf32>
    %618 = arith.mulf %617, %65 : vector<16x16xf32>
    %619 = arith.addf %615, %618 : vector<16x16xf32>
    %c129 = arith.constant 129 : index
    %620 = memref.load %arg5[%c129] : memref<144xf32, #tpu.memory_space<smem>>
    %621 = vector.broadcast %620 : f32 to vector<16x16xf32>
    %622 = arith.mulf %621, %67 : vector<16x16xf32>
    %623 = arith.addf %619, %622 : vector<16x16xf32>
    %c130 = arith.constant 130 : index
    %624 = memref.load %arg5[%c130] : memref<144xf32, #tpu.memory_space<smem>>
    %625 = vector.broadcast %624 : f32 to vector<16x16xf32>
    %626 = arith.mulf %625, %69 : vector<16x16xf32>
    %627 = arith.addf %623, %626 : vector<16x16xf32>
    %c131 = arith.constant 131 : index
    %628 = memref.load %arg5[%c131] : memref<144xf32, #tpu.memory_space<smem>>
    %629 = vector.broadcast %628 : f32 to vector<16x16xf32>
    %630 = arith.mulf %629, %71 : vector<16x16xf32>
    %631 = arith.addf %627, %630 : vector<16x16xf32>
    %c132 = arith.constant 132 : index
    %632 = memref.load %arg5[%c132] : memref<144xf32, #tpu.memory_space<smem>>
    %633 = vector.broadcast %632 : f32 to vector<16x16xf32>
    %634 = arith.mulf %633, %73 : vector<16x16xf32>
    %635 = arith.addf %631, %634 : vector<16x16xf32>
    %c133 = arith.constant 133 : index
    %636 = memref.load %arg5[%c133] : memref<144xf32, #tpu.memory_space<smem>>
    %637 = vector.broadcast %636 : f32 to vector<16x16xf32>
    %638 = arith.mulf %637, %75 : vector<16x16xf32>
    %639 = arith.addf %635, %638 : vector<16x16xf32>
    %c134 = arith.constant 134 : index
    %640 = memref.load %arg5[%c134] : memref<144xf32, #tpu.memory_space<smem>>
    %641 = vector.broadcast %640 : f32 to vector<16x16xf32>
    %642 = arith.mulf %641, %77 : vector<16x16xf32>
    %643 = arith.addf %639, %642 : vector<16x16xf32>
    %c135 = arith.constant 135 : index
    %644 = memref.load %arg5[%c135] : memref<144xf32, #tpu.memory_space<smem>>
    %645 = vector.broadcast %644 : f32 to vector<16x16xf32>
    %646 = arith.mulf %645, %79 : vector<16x16xf32>
    %647 = arith.addf %643, %646 : vector<16x16xf32>
    %c136 = arith.constant 136 : index
    %648 = memref.load %arg5[%c136] : memref<144xf32, #tpu.memory_space<smem>>
    %649 = vector.broadcast %648 : f32 to vector<16x16xf32>
    %650 = arith.mulf %649, %81 : vector<16x16xf32>
    %651 = arith.addf %647, %650 : vector<16x16xf32>
    %c137 = arith.constant 137 : index
    %652 = memref.load %arg5[%c137] : memref<144xf32, #tpu.memory_space<smem>>
    %653 = vector.broadcast %652 : f32 to vector<16x16xf32>
    %654 = arith.mulf %653, %83 : vector<16x16xf32>
    %655 = arith.addf %651, %654 : vector<16x16xf32>
    %c138 = arith.constant 138 : index
    %656 = memref.load %arg5[%c138] : memref<144xf32, #tpu.memory_space<smem>>
    %657 = vector.broadcast %656 : f32 to vector<16x16xf32>
    %658 = arith.mulf %657, %85 : vector<16x16xf32>
    %659 = arith.addf %655, %658 : vector<16x16xf32>
    %c139 = arith.constant 139 : index
    %660 = memref.load %arg5[%c139] : memref<144xf32, #tpu.memory_space<smem>>
    %661 = vector.broadcast %660 : f32 to vector<16x16xf32>
    %662 = arith.mulf %661, %87 : vector<16x16xf32>
    %663 = arith.addf %659, %662 : vector<16x16xf32>
    %c140 = arith.constant 140 : index
    %664 = memref.load %arg5[%c140] : memref<144xf32, #tpu.memory_space<smem>>
    %665 = vector.broadcast %664 : f32 to vector<16x16xf32>
    %666 = arith.mulf %665, %89 : vector<16x16xf32>
    %667 = arith.addf %663, %666 : vector<16x16xf32>
    %c141 = arith.constant 141 : index
    %668 = memref.load %arg5[%c141] : memref<144xf32, #tpu.memory_space<smem>>
    %669 = vector.broadcast %668 : f32 to vector<16x16xf32>
    %670 = arith.mulf %669, %91 : vector<16x16xf32>
    %671 = arith.addf %667, %670 : vector<16x16xf32>
    %c142 = arith.constant 142 : index
    %672 = memref.load %arg5[%c142] : memref<144xf32, #tpu.memory_space<smem>>
    %673 = vector.broadcast %672 : f32 to vector<16x16xf32>
    %674 = arith.mulf %673, %93 : vector<16x16xf32>
    %675 = arith.addf %671, %674 : vector<16x16xf32>
    %c143 = arith.constant 143 : index
    %676 = memref.load %arg5[%c143] : memref<144xf32, #tpu.memory_space<smem>>
    %677 = vector.broadcast %676 : f32 to vector<16x16xf32>
    %678 = arith.mulf %677, %95 : vector<16x16xf32>
    %679 = arith.addf %675, %678 : vector<16x16xf32>
    %680 = vector.shape_cast %241 : vector<16x16xf32> to vector<1x16x16xf32>
    %681 = vector.shape_cast %387 : vector<16x16xf32> to vector<1x16x16xf32>
    %682 = vector.shape_cast %533 : vector<16x16xf32> to vector<1x16x16xf32>
    %683 = vector.shape_cast %679 : vector<16x16xf32> to vector<1x16x16xf32>
    %684 = tpu.concatenate %680, %681, %682, %683 in 0 : vector<1x16x16xf32>, vector<1x16x16xf32>, vector<1x16x16xf32>, vector<1x16x16xf32> -> vector<4x16x16xf32>
    %685 = vector.shape_cast %684 : vector<4x16x16xf32> to vector<4x256xf32>
    %cst = arith.constant 0.000000e+00 : f32
    %686 = vector.broadcast %cst : f32 to vector<4x256xf32>
    %687 = arith.cmpf oge, %685, %686 : vector<4x256xf32>
    %cst_17 = arith.constant 2.000000e-01 : f32
    %688 = vector.broadcast %cst_17 : f32 to vector<4x256xf32>
    %689 = arith.mulf %688, %685 : vector<4x256xf32>
    %690 = arith.select %687, %685, %689 : vector<4x256xi1>, vector<4x256xf32>
    %cst_18 = arith.constant dense<0.000000e+00> : vector<4xf32>
    %691 = vector.multi_reduction <add>, %690, %cst_18 [1] : vector<4x256xf32> to vector<4xf32>
    %692 = vector.shape_cast %691 : vector<4xf32> to vector<1x1x4x1xf32>
    %c0_19 = arith.constant 0 : index
    %c0_20 = arith.constant 0 : index
    %c0_21 = arith.constant 0 : index
    %c0_22 = arith.constant 0 : index
    %693 = vector.load %arg8[%c0_19, %c0_20, %c0_21, %c0_22] : memref<1x1x4x1xf32, #tpu.memory_space<vmem>>, vector<1x1x4x1xf32>
    tpu.vector_store %arg8[%c0_19, %c0_20, %c0_21, %c0_22], %692 {strides = array<i32>} : memref<1x1x4x1xf32, #tpu.memory_space<vmem>>, vector<1x1x4x1xf32>,
    %694 = arith.mulf %690, %690 : vector<4x256xf32>
    %cst_23 = arith.constant dense<0.000000e+00> : vector<4xf32>
    %695 = vector.multi_reduction <add>, %694, %cst_23 [1] : vector<4x256xf32> to vector<4xf32>
    %696 = vector.shape_cast %695 : vector<4xf32> to vector<1x1x4x1xf32>
    %c0_24 = arith.constant 0 : index
    %c0_25 = arith.constant 0 : index
    %c0_26 = arith.constant 0 : index
    %c0_27 = arith.constant 0 : index
    %697 = vector.load %arg9[%c0_24, %c0_25, %c0_26, %c0_27] : memref<1x1x4x1xf32, #tpu.memory_space<vmem>>, vector<1x1x4x1xf32>
    tpu.vector_store %arg9[%c0_24, %c0_25, %c0_26, %c0_27], %696 {strides = array<i32>} : memref<1x1x4x1xf32, #tpu.memory_space<vmem>>, vector<1x1x4x1xf32>,
    %698 = vector.shape_cast %690 : vector<4x256xf32> to vector<1x4x256xf32>
    %c0_28 = arith.constant 0 : index
    %c0_29 = arith.constant 0 : index
    %c0_30 = arith.constant 0 : index
    %699 = vector.load %arg7[%c0_28, %c0_29, %c0_30] : memref<1x4x256xf32, #tpu.memory_space<vmem>>, vector<1x4x256xf32>
    tpu.vector_store %arg7[%c0_28, %c0_29, %c0_30], %698 {strides = array<i32>} : memref<1x4x256xf32, #tpu.memory_space<vmem>>, vector<1x4x256xf32>,
    return
  }
  func.func @transform_0(%arg0: i32, %arg1: i32) -> (i32, i32, i32, i32) {
    %c0_i32 = arith.constant 0 : i32
    %c0_i32_0 = arith.constant 0 : i32
    %c0_i32_1 = arith.constant 0 : i32
    return %arg0, %c0_i32, %arg1, %c0_i32_0 : i32, i32, i32, i32
  }
  func.func @transform_1(%arg0: i32, %arg1: i32) -> (i32, i32, i32, i32) {
    %c2_i32 = arith.constant 2 : i32
    %0 = arith.muli %arg1, %c2_i32 : i32
    %c1_i32 = arith.constant 1 : i32
    %1 = arith.subi %0, %c1_i32 : i32
    %c0_i32 = arith.constant 0 : i32
    %2 = arith.maxsi %1, %c0_i32 : i32
    %c0_i32_0 = arith.constant 0 : i32
    %c0_i32_1 = arith.constant 0 : i32
    %c0_i32_2 = arith.constant 0 : i32
    return %arg0, %c0_i32_0, %2, %c0_i32_1 : i32, i32, i32, i32
  }
  func.func @transform_2(%arg0: i32, %arg1: i32) -> (i32, i32, i32, i32) {
    %c1_i32 = arith.constant 1 : i32
    %0 = arith.addi %arg1, %c1_i32 : i32
    %c2_i32 = arith.constant 2 : i32
    %1 = arith.muli %0, %c2_i32 : i32
    %c1_i32_0 = arith.constant 1 : i32
    %2 = arith.minsi %1, %c1_i32_0 : i32
    %c0_i32 = arith.constant 0 : i32
    %c0_i32_1 = arith.constant 0 : i32
    %c0_i32_2 = arith.constant 0 : i32
    return %arg0, %c0_i32, %2, %c0_i32_1 : i32, i32, i32, i32
  }
  func.func @transform_3(%arg0: i32, %arg1: i32) -> i32 {
    %c0_i32 = arith.constant 0 : i32
    %c0_i32_0 = arith.constant 0 : i32
    return %c0_i32 : i32
  }
  func.func @transform_4(%arg0: i32, %arg1: i32) -> i32 {
    %c0_i32 = arith.constant 0 : i32
    %c0_i32_0 = arith.constant 0 : i32
    return %c0_i32 : i32
  }
  func.func @transform_5(%arg0: i32, %arg1: i32) -> (i32, i32, i32) {
    %c0_i32 = arith.constant 0 : i32
    %c0_i32_0 = arith.constant 0 : i32
    return %arg0, %c0_i32, %arg1 : i32, i32, i32
  }
  func.func @transform_6(%arg0: i32, %arg1: i32) -> (i32, i32, i32, i32) {
    %c0_i32 = arith.constant 0 : i32
    %c0_i32_0 = arith.constant 0 : i32
    %c0_i32_1 = arith.constant 0 : i32
    return %arg0, %arg1, %c0_i32, %c0_i32_0 : i32, i32, i32, i32
  }
  func.func @transform_7(%arg0: i32, %arg1: i32) -> (i32, i32, i32, i32) {
    %c0_i32 = arith.constant 0 : i32
    %c0_i32_0 = arith.constant 0 : i32
    %c0_i32_1 = arith.constant 0 : i32
    return %arg0, %arg1, %c0_i32, %c0_i32_0 : i32, i32, i32, i32
  }
}

module attributes {stable_mosaic.version = 11 : i64} {
  func.func @_bn_residual_kernel(%arg0: i32, %arg1: i32, %arg2: memref<1x4x256xf32, #tpu.memory_space<vmem>>, %arg3: memref<1x4x256xf32, #tpu.memory_space<vmem>>, %arg4: memref<4x1xf32, #tpu.memory_space<vmem>>, %arg5: memref<4x1xf32, #tpu.memory_space<vmem>>, %arg6: memref<1x4x256xf32, #tpu.memory_space<vmem>>) attributes {dimension_semantics = [#tpu.dimension_semantics<parallel>, #tpu.dimension_semantics<parallel>], iteration_bounds = array<i64: 2, 1>, scalar_prefetch = 0 : i64, scratch_operands = 0 : i64, tpu.core_type = #tpu.core_type<tc>, window_params = [{transform_indices = @transform_0, window_bounds = array<i64: 1, 4, 256>}, {transform_indices = @transform_1, window_bounds = array<i64: 1, 4, 256>}, {pipeline_mode = #tpu.pipeline_mode<synchronous>, transform_indices = @transform_2, window_bounds = array<i64: 4, 1>}, {pipeline_mode = #tpu.pipeline_mode<synchronous>, transform_indices = @transform_3, window_bounds = array<i64: 4, 1>}, {transform_indices = @transform_4, window_bounds = array<i64: 1, 4, 256>}]} {
    %c0 = arith.constant 0 : index
    %c0_0 = arith.constant 0 : index
    %c0_1 = arith.constant 0 : index
    %0 = vector.load %arg2[%c0, %c0_0, %c0_1] : memref<1x4x256xf32, #tpu.memory_space<vmem>>, vector<1x4x256xf32>
    %c0_2 = arith.constant 0 : index
    %c0_3 = arith.constant 0 : index
    %1 = vector.load %arg4[%c0_2, %c0_3] : memref<4x1xf32, #tpu.memory_space<vmem>>, vector<4x1xf32>
    %2 = vector.shape_cast %1 : vector<4x1xf32> to vector<1x4x1xf32>
    %c0_4 = arith.constant 0 : index
    %c0_5 = arith.constant 0 : index
    %3 = vector.load %arg5[%c0_4, %c0_5] : memref<4x1xf32, #tpu.memory_space<vmem>>, vector<4x1xf32>
    %4 = vector.shape_cast %3 : vector<4x1xf32> to vector<1x4x1xf32>
    %5 = vector.broadcast %2 : vector<1x4x1xf32> to vector<1x4x256xf32>
    %6 = arith.mulf %0, %5 : vector<1x4x256xf32>
    %7 = vector.broadcast %4 : vector<1x4x1xf32> to vector<1x4x256xf32>
    %8 = arith.addf %6, %7 : vector<1x4x256xf32>
    %c0_6 = arith.constant 0 : index
    %c0_7 = arith.constant 0 : index
    %c0_8 = arith.constant 0 : index
    %9 = vector.load %arg3[%c0_6, %c0_7, %c0_8] : memref<1x4x256xf32, #tpu.memory_space<vmem>>, vector<1x4x256xf32>
    %10 = arith.addf %8, %9 : vector<1x4x256xf32>
    %c0_9 = arith.constant 0 : index
    %c0_10 = arith.constant 0 : index
    %c0_11 = arith.constant 0 : index
    %11 = vector.load %arg6[%c0_9, %c0_10, %c0_11] : memref<1x4x256xf32, #tpu.memory_space<vmem>>, vector<1x4x256xf32>
    tpu.vector_store %arg6[%c0_9, %c0_10, %c0_11], %10 {strides = array<i32>} : memref<1x4x256xf32, #tpu.memory_space<vmem>>, vector<1x4x256xf32>,
    return
  }
  func.func @transform_0(%arg0: i32, %arg1: i32) -> (i32, i32, i32) {
    %c0_i32 = arith.constant 0 : i32
    %c0_i32_0 = arith.constant 0 : i32
    return %arg0, %c0_i32, %arg1 : i32, i32, i32
  }
  func.func @transform_1(%arg0: i32, %arg1: i32) -> (i32, i32, i32) {
    %c0_i32 = arith.constant 0 : i32
    %c0_i32_0 = arith.constant 0 : i32
    return %arg0, %c0_i32, %arg1 : i32, i32, i32
  }
  func.func @transform_2(%arg0: i32, %arg1: i32) -> (i32, i32) {
    %c0_i32 = arith.constant 0 : i32
    %c0_i32_0 = arith.constant 0 : i32
    %c0_i32_1 = arith.constant 0 : i32
    return %c0_i32, %c0_i32_0 : i32, i32
  }
  func.func @transform_3(%arg0: i32, %arg1: i32) -> (i32, i32) {
    %c0_i32 = arith.constant 0 : i32
    %c0_i32_0 = arith.constant 0 : i32
    %c0_i32_1 = arith.constant 0 : i32
    return %c0_i32, %c0_i32_0 : i32, i32
  }
  func.func @transform_4(%arg0: i32, %arg1: i32) -> (i32, i32, i32) {
    %c0_i32 = arith.constant 0 : i32
    %c0_i32_0 = arith.constant 0 : i32
    return %arg0, %c0_i32, %arg1 : i32, i32, i32
  }
}

</mosaic_0001>

<bundles_post_ra>
// kernel: dilated_res_block.3
= control target key start
LH: loop header
LB: loop body
LE: loop exit
PB: predicated region body
PF: predicated region fallthrough
CT: control target
= control target key end

     0   :  { %s498_s15 = smov 0   ;;  %s500_s16 = smov 0   ;;  %s540_s0 = inlined_call_operand.vmem [shape: f32[2,4,256], index: 0, kind: input, shape index: {}]   ;;  %s541_s1 = inlined_call_operand.vmem [shape: f32[2,4,256], index: 1, kind: input, shape index: {}]   ;;  %s542_s2 = inlined_call_operand.vmem [shape: f32[4,1], index: 2, kind: input, shape index: {}]   ;;  %s543_s3 = inlined_call_operand.vmem [shape: f32[4,1], index: 3, kind: input, shape index: {}]   ;;  %s544_s4 = inlined_call_operand.vmem [shape: f32[2,4,256], index: 4, kind: output, shape index: {}]  }
   0x1   :  { %s502_s17 = smov 0  }
   0x2 LB: > { %s26_s18 = sadd.s32 1, %s465_s16  ;;  %p408_p0 = scmp.ge.s32.totalorder %s469_s17, 1  ;;  %s469_s17 = sphi %s502_s17, %s14_s17   ;;  %s465_s16 = sphi %s500_s16, %s546_s16   ;;  %s461_s15 = sphi %s498_s15, %s545_s15  }
   0x3   : > { %p28_p1 = scmp.ge.s32.totalorder %s26_s18, 2  ;;  %p200_p2 = scmp.lt.s32.totalorder %s469_s17, 3 }
   0x5   : > { %s548_s18 = smov (%p28_p1, %s26_s18), 0  ;;  %p201_p3 = pnand %p408_p0, %p200_p2 }
   0x6   : > { %p244_p4 = scmp.lt.s32.totalorder (!%p201_p3), %s461_s15, 1 }
   0x7   : > { %204 = sbr.rel (%p201_p3) target bundleno = 144 (0x90), region = 36 }
   0xc   : > { %v274_v0 = vld [vmem:[%s542_s2] sm:$0xf]  ;;  %v471_v1 = vmov 0   ;;  %s550_s15 = smov (!%p244_p4, %s461_s15), 1  ;;  %v472_v3 = vmov 839922192  }
   0xd   : > { %446 = vset.pattern.permute.xlu0 %v471_v1  ;;  %v275_v2 = vld [vmem:[%s543_s3] sm:$0xf]  ;;  %v281_v4 = vunpack.c.l.s4 %v472_v3  ;;  %s417_s23 = sshll.u32 %s550_s15, 3 }
   0xe   : > { %278 = vperm.xlu0 %446, %v274_v0   ;;  %s251_s26 = scalar_lea.vmem %s540_s0, %s417_s23  ;;  %s261_s29 = scalar_lea.vmem %s541_s1, %s417_s23 }
   0xf   : > { %v282_v6 = vunpack.c.0.s8 %v281_v4  ;;  %v273_v8 = vld [vmem:[%s251_s26] sm:$0xff]  ;;  %s271_s6 = scalar_lea.vmem %s544_s4, %s417_s23 }
  0x10   : > { %v296_v12 = vld [vmem:[%s261_s29] sm:$0xff] }
  0x16   : > { %288 = vperm.xlu0 %446, %v275_v2  }
  0x80   : > { %v279_v5 = vpop.permute.xlu0 %278 }
  0x81   : > { %v283_v7 = vperm.slane %v279_v5, %v282_v6 }
  0x83   : > { %v285_v10 = vmul.f32 %v283_v7, %v273_v8 }
  0x88   : > { %v289_v9 = vpop.permute.xlu0 %288 }
  0x89   : > { %v293_v11 = vperm.slane %v289_v9, %v282_v6 }
  0x8b   : > { %v295_v13 = vadd.f32 %v293_v11, %v285_v10 }
  0x8d   : > { %v297_v14 = vadd.f32 %v296_v12, %v295_v13 }
  0x8f   : > { %298 = vst [vmem:[%s271_s6] sm:$0xff] %v297_v14 }
  0x90 PF: > { %s14_s17 = sadd.s32 1, %s469_s17   ;;  %s545_s15 = smov %s465_s16 }
  0x91   : > { %p11_p5 = scmp.ge.s32.totalorder %s14_s17, 4   ;;  %s546_s16 = smov %s548_s18 }
  0x93   :  { %13 = sbr.rel (!%p11_p5) target bundleno = 2 (0x2), region = 69 }

// kernel: dilated_res_block.2
= control target key start
LH: loop header
LB: loop body
LE: loop exit
PB: predicated region body
PF: predicated region fallthrough
CT: control target
= control target key end

     0   :  { %13 = vsyncpa [#allocation5], 0  ;;  %s5626_s0 = inlined_call_operand.vmem [shape: f32[2,4,16,16], index: 0, kind: input, shape index: {}, may-alias: {0,1,2}]   ;;  %s5627_s1 = inlined_call_operand.vmem [shape: f32[2,4,16,16], index: 1, kind: input, shape index: {}, may-alias: {0,1,2}]   ;;  %s5628_s2 = inlined_call_operand.vmem [shape: f32[2,4,16,16], index: 2, kind: input, shape index: {}, may-alias: {0,1,2}]   ;;  %s5629_s3 = inlined_call_operand.vmem [shape: f32[144], index: 3, kind: input, shape index: {}]   ;;  %s5630_s4 = inlined_call_operand.vmem [shape: f32[4], index: 4, kind: input, shape index: {}]   ;;  %s5631_s5 = inlined_call_operand.vmem [shape: f32[2,4,256], index: 5, kind: output, shape index: {0}]   ;;  %s5632_s6 = inlined_call_operand.vmem [shape: f32[2,1,4,1], index: 6, kind: output, shape index: {1}]   ;;  %s5633_s7 = inlined_call_operand.vmem [shape: f32[2,1,4,1], index: 7, kind: output, shape index: {2}]  }
   0x1   :  { %14 = vsyncpa [#allocation7], 0  ;;  %s4081_s1 = smov 0   ;;  %s4083_s2 = smov 0  }
   0x2   :  { %s4085_s24 = smov 0  }
   0x3 LB: > { %s3697_s25 = sadd.s32 4294967295, %s4023_s24   ;;  %s32_s26 = sadd.s32 1, %s4019_s2  ;;  %s4023_s24 = sphi %s4085_s24, %s20_s24   ;;  %s4019_s2 = sphi %s4083_s2, %s5723_s2   ;;  %s4015_s1 = sphi %s4081_s1, %s5722_s1  }
   0x4   : > { %p34_p0 = scmp.ge.s32.totalorder %s32_s26, 2  ;;  %p3699_p1 = scmp.ge.s32.totalorder %s4023_s24, 1 }
   0x5   : > { %p263_p2 = scmp.lt.s32.totalorder %s4023_s24, 3  ;;  %p4106_p4 = scmp.eq.s32.totalorder %s3697_s25, 0 }
   0x6   : > { %s5725_s26 = smov (%p34_p0, %s32_s26), 0  ;;  %s275_s8 = sshll.u32 %s5629_s3, 4  ;;  %s276_s8 = int_to_ptr.vmem [resolvable:$true] %s275_s8 }
   0x7   : > { %p4102_p3 = pnand %p3699_p1, %p263_p2  ;;  %s285_s11 = sshll.u32 %s5630_s4, 4  ;;  %s286_s11 = int_to_ptr.vmem [resolvable:$true] %s285_s11 }
   0x8   : > { %s4025_s12 = smov [#allocation4]   ;;  %s4026_s13 = smov [#allocation6]  }
   0x9   : > { %p3882_p5 = pneg %p4102_p3  ;;  %p3702_p7 = scmp.ge.s32.totalorder %s4023_s24, 2 }
   0xa   : > { %431 = sbr.rel (%p4102_p3) target bundleno = 1115 (0x45b), region = 108 }
   0xb   : > { %p3883_p6 = pnand %p4106_p4, %p3882_p5 }
   0xd   : > { %3885 = dma.vmem_to_smem (!%p3883_p6), %s276_s8, 32, %s4025_s12, [#allocation5]  }
   0xe   : > { %3888 = dma.vmem_to_smem (!%p3883_p6), %s286_s11, 16, %s4026_s13, [#allocation7]  }
   0xf   : > { %4006 = dma.done.wait (%p4106_p4), [#allocation5], 32  }
  0x10   : > { %4008 = vsyncadd (%p4106_p4), [#allocation5], 4294967264 }
  0x11   : > { %4010 = dma.done.wait (%p4106_p4), [#allocation7], 16  }
  0x12   : > { %4012 = vsyncadd (%p4106_p4), [#allocation7], 4294967280 }
  0x13   : > { %457 = sfence }
  0x14   : > { %p515_p8 = scmp.lt.s32.totalorder %s4015_s1, 1  ;;  %v4027_v0 = vmov 0   ;;  %vm600_vm0 = vcmask 1041408   ;;  %v4028_v41 = vmov 15   ;;  %s4029_s18 = smov 2   ;;  %vm781_vm1 = vcmask 15360  }
  0x15   : > { %3951 = vset.pattern.permute.xlu2 %v4027_v0  ;;  %3950 = vset.pattern.permute.xlu1 %v4027_v0  ;;  %s4177_s19 = sld [smem:[#allocation4 + $0x1]]  ;;  %vm794_vm2 = vcmask 146432   ;;  %s4030_s21 = smov 126   ;;  %vm851_vm3 = vcmask 1045504   ;;  %vm911_vm4 = vcmask 1043456   ;;  %vm3250_vm5 = vcmask 1047556  }
  0x16   : > { %3949 = vset.pattern.permute.xlu0 %v4027_v0  ;;  %s5727_s1 = smov (!%p515_p8, %s4015_s1), 1  ;;  %s4180_s20 = sld [smem:[#allocation4 + $0xa]]  ;;  %vm3418_vm6 = vcmask 130048   ;;  %vm3420_vm7 = vcmask 261120   ;;  %vm3422_vm8 = vcmask 392192   ;;  %vm3424_vm9 = vcmask 523264  }
  0x17   : > { %s3871_s14 = sshll.u32 %s5727_s1, 6  ;;  %s3723_s22 = sld [smem:[#allocation4 + $0x4]]  ;;  %vm3426_vm10 = vcmask 654336   ;;  %vm3430_vm11 = vcmask 916480   ;;  %vm3428_vm12 = vcmask 785408   ;;  %vm3450_vm15 = vcmask 3072  }
  0x18   : > { %s4139_s17 = scalar_lea.vmem %s5626_s0, %s3871_s14  ;;  %s4213_s23 = sld [smem:[#allocation4 + $0x2]] }
  0x19   : > { %v558_v1 = vld [vmem:[%s4139_s17 + $0x10] sm:$0xff]  ;;  %v559_v2 = vld [vmem:[%s4139_s17 + $0x18] sm:$0xff]  ;;  %v556_v3 = vld [vmem:[%s4139_s17] sm:$0xff]  ;;  %s3726_s25 = sld [smem:[#allocation4 + $0x7]]  ;;  %s4031_s28 = smov 124  }
  0x1a   : > { %v604_v4 = vrot.slane %v558_v1, 6  ;;  %v605_v5 = vrot.slane %v559_v2, 6  ;;  %v574_v6 = vperm.slane %v558_v1, 0  ;;  %v573_v7 = vperm.slane %v556_v3, 0  ;;  %v557_v8 = vld [vmem:[%s4139_s17 + $0x8] sm:$0xff]  ;;  %v560_v23 = vld [vmem:[%s4139_s17 + $0x20] sm:$0xff] }
  0x1b   : > { %v601_v9 = vrot.slane %v556_v3, 6  ;;  %v585_v10 = vperm.slane %v559_v2, 7  ;;  %v584_v11 = vperm.slane %v557_v8, 7  ;;  %v602_v16 = vrot.slane %v557_v8, 6  ;;  %v561_v18 = vld [vmem:[%s4139_s17 + $0x28] sm:$0xff]  ;;  %v563_v28 = vld [vmem:[%s4139_s17 + $0x38] sm:$0xff] }
  0x1c   : > { %v606_v12 = vsel %vm600_vm0, %v604_v4, %v605_v5  ;;  %v634_v13 = vsel %vm600_vm0, %v574_v6, %v604_v4  ;;  %v586_v21 = vperm.slane %v561_v18, 7  ;;  %v608_v24 = vrot.slane %v561_v18, 6  ;;  %v562_v33 = vld [vmem:[%s4139_s17 + $0x30] sm:$0xff]  ;;  %s3727_s27 = sld [smem:[#allocation4 + $0x8]] }
  0x1d   : > { %661 = vperm.xlu2 %3951, %v606_v12   ;;  %657 = vperm.xlu1 %3950, %v634_v13   ;;  %v633_v14 = vsel %vm600_vm0, %v573_v7, %v601_v9  ;;  %v626_v15 = vrot.slane %v585_v10, 6  ;;  %v625_v17 = vrot.slane %v584_v11, 6  ;;  %v603_v22 = vsel %vm600_vm0, %v601_v9, %v602_v16  ;;  %s3724_s29 = sld [smem:[#allocation4 + $0x5]] }
  0x1e   : > { %643 = vperm.xlu0 %3949, %v633_v14   ;;  %v627_v25 = vrot.slane %v586_v21, 6  ;;  %v607_v26 = vrot.slane %v560_v23, 6  ;;  %v575_v27 = vperm.slane %v560_v23, 0  ;;  %v587_v31 = vperm.slane %v563_v28, 7  ;;  %s3732_s30 = sld [smem:[#allocation4 + $0xd]] }
  0x1f   : > { %v638_v19 = vsel %vm600_vm0, %v605_v5, %v626_v15  ;;  %v637_v20 = vsel %vm600_vm0, %v602_v16, %v625_v17  ;;  %v611_v34 = vrot.slane %v563_v28, 6  ;;  %v610_v36 = vrot.slane %v562_v33, 6  ;;  %s3733_s8 = sld [smem:[#allocation4 + $0xe]] }
  0x20   : > { %v639_v29 = vsel %vm600_vm0, %v608_v24, %v627_v25  ;;  %v609_v30 = vsel %vm600_vm0, %v607_v26, %v608_v24  ;;  %v635_v32 = vsel %vm600_vm0, %v575_v27, %v607_v26  ;;  %v628_v35 = vrot.slane %v587_v31, 6  ;;  %s4304_s9 = sld [smem:[#allocation4 + $0xb]] }
  0x21   : > { %v576_v37 = vperm.slane %v562_v33, 0  ;;  %v612_v39 = vsel %vm600_vm0, %v610_v36, %v611_v34  ;;  %v816_v61 = vstv %s4177_s19  ;;  %v970_v4 = vstv %s4180_s20  ;;  %s3736_s10 = sld [smem:[#allocation4 + $0x11]] }
  0x22   : > { %v640_v38 = vsel %vm600_vm0, %v611_v34, %v628_v35  ;;  %v862_v15 = vstv %s3723_s22  ;;  %v830_v24 = vstv %s4213_s23  ;;  %v4228_v28 = vstv %s3726_s25  ;;  %s3735_s11 = sld [smem:[#allocation4 + $0x10]] }
  0x23   : > { %v636_v40 = vsel %vm600_vm0, %v576_v37, %v610_v36  ;;  %v943_v34 = vstv %s3727_s27  ;;  %s4333_s12 = sld [smem:[#allocation4 + $0x13]] }
  0x24   : > { %s3741_s13 = sld [smem:[#allocation4 + $0x16]] }
  0x25   : > { %666 = vperm.xlu2 %3951, %v638_v19   ;;  %652 = vperm.xlu1 %3950, %v637_v20   ;;  %s3742_s14 = sld [smem:[#allocation4 + $0x17]] }
  0x26   : > { %647 = vperm.xlu0 %3949, %v603_v22   ;;  %s3739_s15 = sld [smem:[#allocation4 + $0x14]] }
  0x27   : > { %s3745_s16 = sld [smem:[#allocation4 + $0x1a]] }
  0x28   : > { %s3744_s17 = sld [smem:[#allocation4 + $0x19]] }
  0x29   : > { %s3750_s19 = sld [smem:[#allocation4 + $0x1f]] }
  0x2a   : > { %s3751_s20 = sld [smem:[#allocation4 + $0x20]] }
  0x2b   : > { %s3748_s22 = sld [smem:[#allocation4 + $0x1d]] }
  0x2c   : > { %s3754_s23 = sld [smem:[#allocation4 + $0x23]] }
  0x2d   : > { %680 = vperm.xlu2 %3951, %v639_v29   ;;  %675 = vperm.xlu1 %3950, %v609_v30   ;;  %s3753_s25 = sld [smem:[#allocation4 + $0x22]] }
  0x2e   : > { %671 = vperm.xlu0 %3949, %v635_v32   ;;  %s4419_s27 = sld [smem:[#allocation4 + $0x25]] }
  0x35   : > { %694 = vperm.xlu2 %3951, %v640_v38   ;;  %689 = vperm.xlu1 %3950, %v612_v39  }
  0x36   : > { %685 = vperm.xlu0 %3949, %v636_v40  }
  0x3d   : > { %3954 = vset.pattern.permute.xlu2 %v4028_v41  ;;  %3953 = vset.pattern.permute.xlu1 %v4028_v41 }
  0x3e   : > { %3952 = vset.pattern.permute.xlu0 %v4028_v41  ;;  %706 = vperm.xlu2 %3954, %v637_v20  }
  0x3f   : > { %702 = vperm.xlu1 %3953, %v603_v22   ;;  %698 = vperm.xlu0 %3952, %v633_v14  }
  0x46   : > { %714 = vperm.xlu2 %3954, %v606_v12  }
  0x47   : > { %710 = vperm.xlu1 %3953, %v634_v13   ;;  %718 = vperm.xlu0 %3952, %v638_v19  }
  0x4e   : > { %726 = vperm.xlu2 %3954, %v609_v30  }
  0x4f   : > { %722 = vperm.xlu1 %3953, %v635_v32   ;;  %730 = vperm.xlu0 %3952, %v639_v29  }
  0x56   : > { %738 = vperm.xlu2 %3954, %v612_v39  }
  0x57   : > { %734 = vperm.xlu1 %3953, %v636_v40   ;;  %742 = vperm.xlu0 %3952, %v640_v38  }
  0x5e   : > { %747 = vrot.lane.b32.xlu2 %v603_v22, %s4029_s18 }
  0x5f   : > { %745 = vrot.lane.b32.xlu1 %v633_v14, %s4029_s18  ;;  %749 = vrot.lane.b32.xlu0 %v637_v20, %s4029_s18 }
  0x66   : > { %753 = vrot.lane.b32.xlu2 %v606_v12, %s4029_s18 }
  0x67   : > { %751 = vrot.lane.b32.xlu1 %v634_v13, %s4029_s18  ;;  %755 = vrot.lane.b32.xlu0 %v638_v19, %s4029_s18 }
  0x6e   : > { %759 = vrot.lane.b32.xlu2 %v609_v30, %s4029_s18 }
  0x6f   : > { %757 = vrot.lane.b32.xlu1 %v635_v32, %s4029_s18  ;;  %761 = vrot.lane.b32.xlu0 %v639_v29, %s4029_s18 }
  0x76   : > { %765 = vrot.lane.b32.xlu2 %v612_v39, %s4029_s18 }
  0x77   : > { %763 = vrot.lane.b32.xlu1 %v636_v40, %s4029_s18  ;;  %767 = vrot.lane.b32.xlu0 %v640_v38, %s4029_s18  ;;  %v662_v42 = vpop.permute.xlu2 %661  ;;  %s4372_s18 = sld [smem:[#allocation4 + $0x1c]] }
  0x7f   : > { %v4161_v43 = vpop.permute.xlu2 %666 }
  0x87   : > { %v4163_v44 = vpop.permute.xlu2 %680 }
  0x8f   : > { %v4165_v45 = vpop.permute.xlu1 %657  ;;  %v4167_v46 = vpop.permute.xlu2 %694 }
  0x90   : > { %v644_v47 = vpop.permute.xlu0 %643 }
  0x97   : > { %v4169_v48 = vpop.permute.xlu1 %652 }
  0x98   : > { %v648_v49 = vpop.permute.xlu0 %647  ;;  %v4171_v50 = vpop.permute.xlu2 %706 }
  0x9f   : > { %v676_v51 = vpop.permute.xlu1 %675 }
  0xa0   : > { %v4173_v52 = vpop.permute.xlu0 %671  ;;  %v715_v53 = vpop.permute.xlu2 %714 }
  0xa7   : > { %v690_v54 = vpop.permute.xlu1 %689 }
  0xa8   : > { %v4175_v55 = vpop.permute.xlu0 %685  ;;  %v727_v56 = vpop.permute.xlu2 %726 }
  0xb0   : > { %v739_v57 = vpop.permute.xlu2 %738 }
  0xb1   : > { %v703_v58 = vpop.permute.xlu1 %702  ;;  %v699_v59 = vpop.permute.xlu0 %698 }
  0xb8   : > { %v748_v60 = vpop.permute.xlu2 %747 }
  0xb9   : > { %v783_v62 = vsel %vm781_vm1, %v648_v49, %v748_v60  ;;  %v4183_v63 = vpop.permute.xlu1 %710  ;;  %v4185_v0 = vpop.permute.xlu0 %718 }
  0xba   : > { %v4188_v1 = vsel %vm794_vm2, %v783_v62, %v703_v58 }
  0xbb   : > { %v818_v2 = vmul.f32 %v816_v61, %v4188_v1  ;;  %v864_v22 = vmul.f32 %v862_v15, %v4188_v1  ;;  %v4238_v33 = vmul.f32 %v4228_v28, %v4188_v1  ;;  %v945_v41 = vmul.f32 %v943_v34, %v4188_v1 }
  0xbd   : > { %823 = vrot.lane.b32.xlu2 %v818_v2, %s4030_s21  ;;  %v870_v31 = vrot.slane %v864_v22, 2 }
  0xc0   : > { %v754_v3 = vpop.permute.xlu2 %753 }
  0xc1   : > { %v786_v5 = vsel %vm781_vm1, %v662_v42, %v754_v3  ;;  %v4194_v6 = vpop.permute.xlu1 %722  ;;  %v4196_v7 = vpop.permute.xlu0 %730  ;;  %v930_v42 = vrot.slane %v4238_v33, 4 }
  0xc2   : > { %v4199_v8 = vsel %vm794_vm2, %v786_v5, %v715_v53 }
  0xc3   : > { %v972_v9 = vmul.f32 %v970_v4, %v4199_v8 }
  0xc5   : > { %977 = vrot.lane.b32.xlu2 %v972_v9, %s4030_s21 }
  0xc8   : > { %v760_v10 = vpop.permute.xlu2 %759 }
  0xc9   : > { %v789_v11 = vsel %vm781_vm1, %v676_v51, %v760_v10  ;;  %v4206_v12 = vpop.permute.xlu1 %734  ;;  %v4208_v13 = vpop.permute.xlu0 %742 }
  0xca   : > { %v4211_v14 = vsel %vm794_vm2, %v789_v11, %v727_v56  ;;  %v1015_v11 = vstv %s3732_s30  ;;  %s3761_s30 = sld [smem:[#allocation4 + $0x29]] }
  0xcb   : > { %5648 = vst [vmem:[#allocation10_spill] sm:$0xff] %v4211_v14 }
  0xd0   : > { %v766_v16 = vpop.permute.xlu2 %765 }
  0xd1   : > { %v792_v17 = vsel %vm781_vm1, %v690_v54, %v766_v16  ;;  %v746_v18 = vpop.permute.xlu1 %745  ;;  %v750_v19 = vpop.permute.xlu0 %749  ;;  %v883_v54 = vstv %s3724_s29  ;;  %s3760_s29 = sld [smem:[#allocation4 + $0x28]] }
  0xd2   : > { %v4217_v20 = vsel %vm794_vm2, %v792_v17, %v739_v57  ;;  %v782_v21 = vsel %vm781_vm1, %v644_v47, %v746_v18  ;;  %v784_v32 = vsel %vm781_vm1, %v4169_v48, %v750_v19  ;;  %v832_v47 = vmul.f32 %v830_v24, %v4188_v1 }
  0xd3   : > { %5649 = vst [vmem:[#allocation11_spill] sm:$0xff] %v4217_v20  ;;  %v4222_v23 = vsel %vm794_vm2, %v782_v21, %v699_v59  ;;  %v4245_v40 = vsel %vm794_vm2, %v784_v32, %v4171_v50  ;;  %v951_v50 = vrot.slane %v945_v41, 4  ;;  %v885_v2 = vmul.f32 %v883_v54, %v4188_v1 }
  0xd4   : > { %v831_v25 = vmul.f32 %v830_v24, %v4222_v23  ;;  %v817_v26 = vmul.f32 %v816_v61, %v4222_v23  ;;  %v863_v27 = vmul.f32 %v862_v15, %v4222_v23  ;;  %v923_v29 = vmul.f32 %v4228_v28, %v4222_v23 }
  0xd5   : > { %v944_v36 = vmul.f32 %v943_v34, %v4222_v23  ;;  %v865_v51 = vmul.f32 %v862_v15, %v4245_v40  ;;  %v886_v57 = vmul.f32 %v883_v54, %v4245_v40  ;;  %v1017_v24 = vmul.f32 %v1015_v11, %v4199_v8 }
  0xd6   : > { %835 = vrot.lane.b32.xlu0 %v831_v25, %s4031_s28  ;;  %821 = vrot.lane.b32.xlu1 %v817_v26, %s4030_s21  ;;  %v869_v30 = vrot.slane %v863_v27, 2  ;;  %v929_v39 = vrot.slane %v923_v29, 4  ;;  %v1036_v29 = vstv %s3733_s8  ;;  %s4448_s8 = sld [smem:[#allocation4 + $0x26]] }
  0xd7   : > { %v950_v48 = vrot.slane %v944_v36, 4  ;;  %v872_v60 = vrot.slane %v865_v51, 2  ;;  %v893_v9 = vrot.slane %v886_v57, 2  ;;  %v1038_v32 = vmul.f32 %v1036_v29, %v4199_v8 }
  0xd8   : > { %v871_v35 = vsel %vm851_vm3, %v869_v30, %v870_v31  ;;  %v931_v49 = vsel %vm911_vm4, %v929_v39, %v930_v42  ;;  %v1095_v39 = vstv %s3736_s10  ;;  %v1074_v51 = vstv %s3735_s11  ;;  %s3763_s10 = sld [smem:[#allocation4 + $0x2b]] }
  0xd9   : > { %v752_v37 = vpop.permute.xlu1 %751  ;;  %874 = vrot.lane.b32.xlu2 %v871_v35, %s4030_s21  ;;  %v756_v38 = vpop.permute.xlu0 %755  ;;  %v952_v56 = vsel %vm911_vm4, %v950_v48, %v951_v50  ;;  %v873_v10 = vsel %vm851_vm3, %v870_v31, %v872_v60  ;;  %v1076_v57 = vmul.f32 %v1074_v51, %v4199_v8  ;;  %s4481_s11 = sld [smem:[#allocation4 + $0x2e]] }
  0xda   : > { %v785_v53 = vsel %vm781_vm1, %v4165_v45, %v752_v37  ;;  %v787_v19 = vsel %vm781_vm1, %v4161_v43, %v756_v38  ;;  %v1044_v38 = vrot.slane %v1038_v32, 2 }
  0xdb   : > { %v4262_v58 = vsel %vm794_vm2, %v785_v53, %v4183_v63 }
  0xdc   : > { %v971_v5 = vmul.f32 %v970_v4, %v4262_v58  ;;  %v1016_v15 = vmul.f32 %v1015_v11, %v4262_v58 }
  0xde   : > { %934 = vrot.lane.b32.xlu0 %v931_v49, %s4030_s21  ;;  %837 = vrot.lane.b32.xlu1 %v832_v47, %s4031_s28  ;;  %v1022_v43 = vrot.slane %v1016_v15, 2  ;;  %v1096_v47 = vmul.f32 %v1095_v39, %v4262_v58  ;;  %v1097_v49 = vmul.f32 %v1095_v39, %v4199_v8 }
  0xe1   : > { %v758_v59 = vpop.permute.xlu1 %757  ;;  %955 = vrot.lane.b32.xlu2 %v952_v56, %s4031_s28  ;;  %v762_v45 = vpop.permute.xlu0 %761  ;;  %v1103_v56 = vrot.slane %v1097_v49, 4 }
  0xe2   : > { %v788_v61 = vsel %vm781_vm1, %v4173_v52, %v758_v59  ;;  %v790_v62 = vsel %vm781_vm1, %v4163_v44, %v762_v45  ;;  %v884_v52 = vmul.f32 %v883_v54, %v4222_v23  ;;  %v946_v44 = vmul.f32 %v943_v34, %v4245_v40 }
  0xe3   : > { %v4272_v3 = vsel %vm794_vm2, %v788_v61, %v4194_v6  ;;  %v4276_v63 = vsel %vm794_vm2, %v790_v62, %v4196_v7  ;;  %v891_v6 = vrot.slane %v885_v2, 2  ;;  %v984_v34 = vstv %s4304_s9  ;;  %s3764_s9 = sld [smem:[#allocation4 + $0x2c]] }
  0xe4   : > { %5650 = vst [vmem:[#allocation12_spill] sm:$0xff] %v4276_v63  ;;  %v890_v17 = vrot.slane %v884_v52, 2  ;;  %v953_v18 = vrot.slane %v946_v44, 4  ;;  %v985_v35 = vmul.f32 %v984_v34, %v4262_v58  ;;  %v986_v33 = vmul.f32 %v984_v34, %v4199_v8 }
  0xe5   : > { %v894_v7 = vsel %vm851_vm3, %v891_v6, %v893_v9  ;;  %v1075_v54 = vmul.f32 %v1074_v51, %v4262_v58  ;;  %v1082_v61 = vrot.slane %v1076_v57, 4  ;;  %v1122_v62 = vstv %s4333_s12  ;;  %s3769_s12 = sld [smem:[#allocation4 + $0x31]] }
  0xe6   : > { %975 = vrot.lane.b32.xlu1 %v971_v5, %s4030_s21  ;;  %876 = vrot.lane.b32.xlu0 %v873_v10, %s4030_s21  ;;  %v954_v27 = vsel %vm911_vm4, %v951_v50, %v953_v18  ;;  %v1037_v50 = vmul.f32 %v1036_v29, %v4262_v58  ;;  %v1124_v52 = vmul.f32 %v1122_v62, %v4211_v14  ;;  %v1167_v44 = vstv %s3741_s13  ;;  %s3770_s13 = sld [smem:[#allocation4 + $0x32]] }
  0xe7   : > { %v1081_v60 = vrot.slane %v1075_v54, 4  ;;  %v1169_v15 = vmul.f32 %v1167_v44, %v4211_v14 }
  0xe8   : > { %v1043_v45 = vrot.slane %v1037_v50, 2 }
  0xe9   : > { %v764_v16 = vpop.permute.xlu1 %763  ;;  %897 = vrot.lane.b32.xlu2 %v894_v7, %s4031_s28  ;;  %v768_v4 = vpop.permute.xlu0 %767  ;;  %v1083_v5 = vsel %vm911_vm4, %v1081_v60, %v1082_v61  ;;  %v1175_v18 = vrot.slane %v1169_v15, 2 }
  0xea   : > { %v791_v21 = vsel %vm781_vm1, %v4175_v55, %v764_v16  ;;  %v793_v22 = vsel %vm781_vm1, %v4167_v46, %v768_v4  ;;  %v4308_v55 = vsel %vm794_vm2, %v787_v19, %v4185_v0  ;;  %v892_v46 = vsel %vm851_vm3, %v890_v17, %v891_v6 }
  0xeb   : > { %v4298_v25 = vsel %vm794_vm2, %v791_v21, %v4206_v12  ;;  %v4302_v26 = vsel %vm794_vm2, %v793_v22, %v4208_v13  ;;  %v925_v12 = vmul.f32 %v4228_v28, %v4245_v40  ;;  %v1023_v13 = vrot.slane %v1017_v24, 2 }
  0xec   : > { %5651 = vst [vmem:[#allocation13_spill] sm:$0xff] %v4298_v25  ;;  %v1039_v31 = vmul.f32 %v1036_v29, %v4308_v55  ;;  %v1018_v37 = vmul.f32 %v1015_v11, %v4308_v55  ;;  %v1045_v2 = vsel %vm851_vm3, %v1043_v45, %v1044_v38  ;;  %v1077_v9 = vmul.f32 %v1074_v51, %v4308_v55 }
  0xed   : > { %v1024_v30 = vsel %vm851_vm3, %v1022_v43, %v1023_v13  ;;  %v932_v0 = vrot.slane %v925_v12, 4  ;;  %v1098_v10 = vmul.f32 %v1095_v39, %v4308_v55  ;;  %v1168_v6 = vmul.f32 %v1167_v44, %v4272_v3 }
  0xee   : > { %895 = vrot.lane.b32.xlu1 %v892_v46, %s4031_s28  ;;  %957 = vrot.lane.b32.xlu0 %v954_v27, %s4031_s28  ;;  %v1046_v28 = vrot.slane %v1039_v31, 2  ;;  %v1025_v48 = vrot.slane %v1018_v37, 2  ;;  %v1084_v11 = vrot.slane %v1077_v9, 4  ;;  %v1188_v19 = vstv %s3742_s14  ;;  %s4514_s14 = sld [smem:[#allocation4 + $0x2f]] }
  0xef   : > { %v933_v36 = vsel %vm911_vm4, %v930_v42, %v932_v0  ;;  %v1102_v42 = vrot.slane %v1096_v47, 4  ;;  %v1105_v7 = vrot.slane %v1098_v10, 4  ;;  %v1174_v16 = vrot.slane %v1168_v6, 2 }
  0xf0   : > { %v1047_v41 = vsel %vm851_vm3, %v1044_v38, %v1046_v28  ;;  %v1026_v53 = vsel %vm851_vm3, %v1023_v13, %v1025_v48  ;;  %v1085_v4 = vsel %vm911_vm4, %v1082_v61, %v1084_v11  ;;  %v1191_v22 = vmul.f32 %v1188_v19, %v4276_v63 }
  0xf1   : > { %1027 = vrot.lane.b32.xlu2 %v1024_v30, %s4030_s21  ;;  %v1104_v59 = vsel %vm911_vm4, %v1102_v42, %v1103_v56  ;;  %v1106_v17 = vsel %vm911_vm4, %v1103_v56, %v1105_v7  ;;  %v1176_v21 = vsel %vm851_vm3, %v1174_v16, %v1175_v18  ;;  %v1190_v24 = vmul.f32 %v1188_v19, %v4211_v14 }
  0xf2   : > { %v1136_v43 = vstv %s3739_s15  ;;  %v1123_v46 = vmul.f32 %v1122_v62, %v4272_v3  ;;  %v1198_v12 = vrot.slane %v1191_v22, 2  ;;  %v1170_v13 = vmul.f32 %v1167_v44, %v4276_v63  ;;  %s3773_s15 = sld [smem:[#allocation4 + $0x35]] }
  0xf3   : > { %v1137_v27 = vmul.f32 %v1136_v43, %v4272_v3  ;;  %v1196_v29 = vrot.slane %v1190_v24, 2  ;;  %v1247_v30 = vstv %s3745_s16  ;;  %v1189_v38 = vmul.f32 %v1188_v19, %v4272_v3  ;;  %s3772_s16 = sld [smem:[#allocation4 + $0x34]] }
  0xf4   : > { %v1248_v0 = vmul.f32 %v1247_v30, %v4272_v3  ;;  %v1177_v32 = vrot.slane %v1170_v13, 2  ;;  %v1249_v34 = vmul.f32 %v1247_v30, %v4211_v14  ;;  %v1250_v57 = vmul.f32 %v1247_v30, %v4276_v63 }
  0xf5   : > { %v1199_v31 = vsel %vm851_vm3, %v1196_v29, %v1198_v12  ;;  %v1319_v45 = vstv %s3750_s19  ;;  %v1340_v6 = vstv %s3751_s20  ;;  %v1399_v24 = vstv %s3754_s23  ;;  %s3779_s19 = sld [smem:[#allocation4 + $0x3b]] }
  0xf6   : > { %936 = vrot.lane.b32.xlu1 %v933_v36, %s4030_s21  ;;  %989 = vrot.lane.b32.xlu0 %v985_v35, %s4031_s28  ;;  %v1138_v35 = vmul.f32 %v1136_v43, %v4211_v14  ;;  %v1254_v28 = vrot.slane %v1248_v0, 4  ;;  %v1226_v36 = vstv %s3744_s17  ;;  %v1178_v37 = vsel %vm851_vm3, %v1175_v18, %v1177_v32  ;;  %s4547_s17 = sld [smem:[#allocation4 + $0x37]] }
  0xf7   : > { %v1227_v39 = vmul.f32 %v1226_v36, %v4272_v3  ;;  %v1228_v47 = vmul.f32 %v1226_v36, %v4211_v14  ;;  %v1229_v56 = vmul.f32 %v1226_v36, %v4276_v63  ;;  %v1320_v60 = vmul.f32 %v1319_v45, %v4298_v25  ;;  %s4580_s20 = sld [smem:[#allocation4 + $0x38]] }
  0xf8   : > { %v1257_v62 = vrot.slane %v1250_v57, 4  ;;  %v1343_v7 = vmul.f32 %v1340_v6, %v4302_v26  ;;  %v1342_v15 = vmul.f32 %v1340_v6, %v4217_v20  ;;  %v1401_v12 = vmul.f32 %v1399_v24, %v4217_v20  ;;  %s3781_s23 = sld [smem:[#allocation4 + $0x3d]] }
  0xf9   : > { %1050 = vrot.lane.b32.xlu2 %v1047_v41, %s4031_s28  ;;  %v1255_v41 = vrot.slane %v1249_v34, 4  ;;  %v1233_v42 = vrot.slane %v1227_v39, 4  ;;  %v1234_v51 = vrot.slane %v1228_v47, 4  ;;  %v1236_v61 = vrot.slane %v1229_v56, 4 }
  0xfa   : > { %v1326_v9 = vrot.slane %v1320_v60, 2  ;;  %v1350_v19 = vrot.slane %v1343_v7, 2  ;;  %v1348_v22 = vrot.slane %v1342_v15, 2  ;;  %v1341_v32 = vmul.f32 %v1340_v6, %v4298_v25 }
  0xfb   : > { %v1256_v48 = vsel %vm911_vm4, %v1254_v28, %v1255_v41  ;;  %v1235_v54 = vsel %vm911_vm4, %v1233_v42, %v1234_v51  ;;  %v1237_v10 = vsel %vm911_vm4, %v1234_v51, %v1236_v61  ;;  %v1428_v47 = vstv %s4419_s27  ;;  %s3787_s27 = sld [smem:[#allocation4 + $0x43]] }
  0xfc   : > { %v1351_v43 = vsel %vm851_vm3, %v1348_v22, %v1350_v19  ;;  %v1402_v51 = vmul.f32 %v1399_v24, %v4302_v26 }
  0xfe   : > { %991 = vrot.lane.b32.xlu1 %v986_v33, %s4031_s28  ;;  %1029 = vrot.lane.b32.xlu0 %v1026_v53, %s4030_s21  ;;  %v1195_v33 = vrot.slane %v1189_v38, 2  ;;  %v1274_v53 = vstv %s4372_s18  ;;  %s3778_s18 = sld [smem:[#allocation4 + $0x3a]] }
 0x100   : > { %v1197_v50 = vsel %vm851_vm3, %v1195_v33, %v1196_v29 }
 0x101   : > { %1107 = vrot.lane.b32.xlu2 %v1104_v59, %s4031_s28  ;;  %v1276_v59 = vmul.f32 %v1274_v53, %v4217_v20 }
 0x106   : > { %1048 = vrot.lane.b32.xlu1 %v1045_v2, %s4031_s28  ;;  %1086 = vrot.lane.b32.xlu0 %v1083_v5, %s4030_s21  ;;  %v1321_v2 = vmul.f32 %v1319_v45, %v4217_v20 }
 0x108   : > { %v1327_v44 = vrot.slane %v1321_v2, 2 }
 0x109   : > { %1129 = vrot.lane.b32.xlu2 %v1124_v52, %s4030_s21  ;;  %v1258_v52 = vsel %vm911_vm4, %v1255_v41, %v1257_v62 }
 0x10a   : > { %v1328_v11 = vsel %vm851_vm3, %v1326_v9, %v1327_v44 }
 0x10e   : > { %1088 = vrot.lane.b32.xlu1 %v1085_v4, %s4030_s21  ;;  %1109 = vrot.lane.b32.xlu0 %v1106_v17, %s4031_s28  ;;  %v1288_v4 = vstv %s3748_s22  ;;  %v1275_v17 = vmul.f32 %v1274_v53, %v4298_v25  ;;  %v1430_v53 = vmul.f32 %v1428_v47, %v4188_v1  ;;  %s3782_s22 = sld [smem:[#allocation4 + $0x3e]] }
 0x10f   : > { %v1289_v18 = vmul.f32 %v1288_v4, %v4298_v25  ;;  %v1290_v29 = vmul.f32 %v1288_v4, %v4217_v20 }
 0x111   : > { %1179 = vrot.lane.b32.xlu2 %v1176_v21, %s4030_s21  ;;  %v1322_v21 = vmul.f32 %v1319_v45, %v4302_v26  ;;  %v1409_v45 = vrot.slane %v1402_v51, 4 }
 0x116   : > { %1127 = vrot.lane.b32.xlu1 %v1123_v46, %s4030_s21  ;;  %1141 = vrot.lane.b32.xlu0 %v1137_v27, %s4031_s28  ;;  %v1400_v46 = vmul.f32 %v1399_v24, %v4298_v25  ;;  %v1329_v27 = vrot.slane %v1322_v21, 2 }
 0x117   : > { %v4381_v49 = vpop.permute.xlu2 %823 }
 0x118   : > { %v1406_v30 = vrot.slane %v1400_v46, 4  ;;  %v1330_v0 = vsel %vm851_vm3, %v1327_v44, %v1329_v27 }
 0x119   : > { %1202 = vrot.lane.b32.xlu2 %v1199_v31, %s4031_s28  ;;  %v1378_v31 = vstv %s3753_s25  ;;  %s4613_s25 = sld [smem:[#allocation4 + $0x40]] }
 0x11a   : > { %v1379_v34 = vmul.f32 %v1378_v31, %v4298_v25  ;;  %v1380_v28 = vmul.f32 %v1378_v31, %v4217_v20  ;;  %v1381_v42 = vmul.f32 %v1378_v31, %v4302_v26 }
 0x11c   : > { %v1385_v38 = vrot.slane %v1379_v34, 4  ;;  %v1386_v41 = vrot.slane %v1380_v28, 4 }
 0x11e   : > { %1143 = vrot.lane.b32.xlu1 %v1138_v35, %s4031_s28  ;;  %1181 = vrot.lane.b32.xlu0 %v1178_v37, %s4030_s21  ;;  %v1407_v35 = vrot.slane %v1401_v12, 4  ;;  %v1347_v37 = vrot.slane %v1341_v32, 2  ;;  %v1387_v33 = vsel %vm911_vm4, %v1385_v38, %v1386_v41 }
 0x11f   : > { %v4395_v5 = vpop.permute.xlu2 %977 }
 0x120   : > { %v1408_v36 = vsel %vm911_vm4, %v1406_v30, %v1407_v35  ;;  %v1410_v9 = vsel %vm911_vm4, %v1407_v35, %v1409_v45  ;;  %v1532_v35 = vstv %s3763_s10  ;;  %s4676_s10 = sld [smem:[#allocation4 + $0x24]] }
 0x121   : > { %1259 = vrot.lane.b32.xlu2 %v1256_v48, %s4031_s28  ;;  %v1349_v48 = vsel %vm851_vm3, %v1347_v37, %v1348_v22  ;;  %v1533_v37 = vmul.f32 %v1532_v35, %v4222_v23 }
 0x123   : > { %v1539_v51 = vrot.slane %v1533_v37, 4 }
 0x126   : > { %1200 = vrot.lane.b32.xlu1 %v1197_v50, %s4031_s28  ;;  %1238 = vrot.lane.b32.xlu0 %v1235_v54, %s4030_s21  ;;  %v1473_v50 = vstv %s3760_s29  ;;  %s3788_s29 = sld [smem:[#allocation4 + $0x44]] }
 0x127   : > { %v1474_v57 = vmul.f32 %v1473_v50, %v4222_v23  ;;  %v1475_v60 = vmul.f32 %v1473_v50, %v4188_v1  ;;  %v1476_v22 = vmul.f32 %v1473_v50, %v4245_v40 }
 0x129   : > { %1281 = vrot.lane.b32.xlu2 %v1276_v59, %s4030_s21  ;;  %v1388_v59 = vrot.slane %v1381_v42, 4  ;;  %v1480_v62 = vrot.slane %v1474_v57, 2  ;;  %v1483_v30 = vrot.slane %v1476_v22, 2  ;;  %v1580_v57 = vstv %s4481_s11  ;;  %s4681_s11 = sld [smem:[#allocation4 + $0x49]] }
 0x12b   : > { %v1389_v2 = vsel %vm911_vm4, %v1386_v41, %v1388_v59  ;;  %v1534_v41 = vmul.f32 %v1532_v35, %v4188_v1 }
 0x12d   : > { %v1540_v50 = vrot.slane %v1534_v41, 4 }
 0x12e   : > { %1240 = vrot.lane.b32.xlu1 %v1237_v10, %s4030_s21  ;;  %1261 = vrot.lane.b32.xlu0 %v1258_v52, %s4031_s28  ;;  %v1481_v10 = vrot.slane %v1475_v60, 2  ;;  %v1494_v52 = vstv %s3761_s30  ;;  %v1535_v60 = vmul.f32 %v1532_v35, %v4245_v40  ;;  %v1594_v35 = vstv %s4514_s14  ;;  %s4646_s30 = sld [smem:[#allocation4 + $0x41]] }
 0x12f   : > { %v1497_v7 = vmul.f32 %v1494_v52, %v4245_v40  ;;  %v1496_v15 = vmul.f32 %v1494_v52, %v4188_v1  ;;  %v1541_v45 = vsel %vm911_vm4, %v1539_v51, %v1540_v50  ;;  %s3759_s14 = sld [smem:[#allocation4 + $0x27]] }
 0x130   : > { %v1484_v28 = vsel %vm851_vm3, %v1481_v10, %v1483_v30 }
 0x131   : > { %1331 = vrot.lane.b32.xlu2 %v1328_v11, %s4030_s21  ;;  %v1482_v11 = vsel %vm851_vm3, %v1480_v62, %v1481_v10  ;;  %v1504_v21 = vrot.slane %v1497_v7, 2  ;;  %v1502_v24 = vrot.slane %v1496_v15, 2  ;;  %v1542_v7 = vrot.slane %v1535_v60, 4 }
 0x133   : > { %v4405_v16 = vpop.permute.xlu2 %874  ;;  %v1505_v12 = vsel %vm851_vm3, %v1502_v24, %v1504_v21  ;;  %v1543_v21 = vsel %vm911_vm4, %v1540_v50, %v1542_v7 }
 0x136   : > { %1279 = vrot.lane.b32.xlu1 %v1275_v17, %s4030_s21  ;;  %1293 = vrot.lane.b32.xlu0 %v1289_v18, %s4031_s28  ;;  %v1442_v17 = vstv %s4448_s8  ;;  %v1429_v18 = vmul.f32 %v1428_v47, %v4222_v23  ;;  %s3791_s8 = sld [smem:[#allocation4 + $0x47]] }
 0x137   : > { %v1443_v19 = vmul.f32 %v1442_v17, %v4222_v23  ;;  %v1444_v32 = vmul.f32 %v1442_v17, %v4188_v1 }
 0x139   : > { %1354 = vrot.lane.b32.xlu2 %v1351_v43, %s4031_s28  ;;  %v1553_v43 = vstv %s3764_s9  ;;  %s3790_s9 = sld [smem:[#allocation4 + $0x46]] }
 0x13a   : > { %v1555_v31 = vmul.f32 %v1553_v43, %v4188_v1  ;;  %v1556_v62 = vmul.f32 %v1553_v43, %v4245_v40 }
 0x13b   : > { %v4416_v13 = vpop.permute.xlu2 %955 }
 0x13c   : > { %v1561_v38 = vrot.slane %v1555_v31, 4  ;;  %v1563_v15 = vrot.slane %v1556_v62, 4  ;;  %v1596_v62 = vmul.f32 %v1594_v35, %v4199_v8 }
 0x13e   : > { %1295 = vrot.lane.b32.xlu1 %v1290_v29, %s4031_s28  ;;  %1333 = vrot.lane.b32.xlu0 %v1330_v0, %s4030_s21  ;;  %v1554_v29 = vmul.f32 %v1553_v43, %v4222_v23  ;;  %v1564_v22 = vsel %vm911_vm4, %v1561_v38, %v1563_v15  ;;  %v1646_v43 = vstv %s3770_s13  ;;  %s4689_s13 = sld [smem:[#allocation6 + $0x1]] }
 0x13f   : > { %v1649_v31 = vmul.f32 %v1646_v43, %v4308_v55  ;;  %v1647_v7 = vmul.f32 %v1646_v43, %v4262_v58 }
 0x140   : > { %v1560_v34 = vrot.slane %v1554_v29, 4 }
 0x141   : > { %1411 = vrot.lane.b32.xlu2 %v1408_v36, %s4031_s28  ;;  %v1495_v36 = vmul.f32 %v1494_v52, %v4222_v23  ;;  %v1656_v37 = vrot.slane %v1649_v31, 2 }
 0x143   : > { %v4429_v39 = vpop.permute.xlu2 %897  ;;  %v1501_v42 = vrot.slane %v1495_v36, 2  ;;  %v1595_v36 = vmul.f32 %v1594_v35, %v4262_v58  ;;  %v1732_v35 = vstv %s4547_s17  ;;  %s4719_s17 = sld [smem:[#allocation4 + $0x4a]] }
 0x145   : > { %v1503_v59 = vsel %vm851_vm3, %v1501_v42, %v1502_v24 }
 0x146   : > { %1352 = vrot.lane.b32.xlu1 %v1349_v48, %s4031_s28  ;;  %1390 = vrot.lane.b32.xlu0 %v1387_v33, %s4030_s21  ;;  %v1562_v33 = vsel %vm911_vm4, %v1560_v34, %v1561_v38 }
 0x148   : > { %v4439_v54 = vpop.permute.xlu1 %821  ;;  %v4441_v56 = vpop.permute.xlu0 %835 }
 0x149   : > { %1435 = vrot.lane.b32.xlu2 %v1430_v53, %s4030_s21 }
 0x14b   : > { %v4446_v61 = vpop.permute.xlu2 %1027 }
 0x14e   : > { %1392 = vrot.lane.b32.xlu1 %v1389_v2, %s4030_s21  ;;  %1413 = vrot.lane.b32.xlu0 %v1410_v9, %s4031_s28  ;;  %v1582_v2 = vmul.f32 %v1580_v57, %v4199_v8  ;;  %v1625_v9 = vstv %s3769_s12  ;;  %s3797_s12 = sld [smem:[#allocation4 + $0x4c]] }
 0x14f   : > { %v1627_v17 = vmul.f32 %v1625_v9, %v4199_v8  ;;  %v1628_v38 = vmul.f32 %v1625_v9, %v4308_v55 }
 0x150   : > { %v4454_v44 = vpop.permute.xlu1 %837  ;;  %v4456_v6 = vpop.permute.xlu0 %934 }
 0x151   : > { %1485 = vrot.lane.b32.xlu2 %v1482_v11, %s4030_s21  ;;  %v1626_v11 = vmul.f32 %v1625_v9, %v4262_v58  ;;  %v1633_v24 = vrot.slane %v1627_v17, 2  ;;  %v1684_v9 = vstv %s3772_s16  ;;  %s3762_s16 = sld [smem:[#allocation4 + $0x2a]] }
 0x152   : > { %v1685_v15 = vmul.f32 %v1684_v9, %v4262_v58 }
 0x153   : > { %v4462_v4 = vpop.permute.xlu2 %1050 }
 0x156   : > { %1433 = vrot.lane.b32.xlu1 %v1429_v18, %s4030_s21  ;;  %1447 = vrot.lane.b32.xlu0 %v1443_v19, %s4031_s28  ;;  %v1632_v19 = vrot.slane %v1626_v11, 2 }
 0x158   : > { %v4470_v46 = vpop.permute.xlu1 %975  ;;  %v4472_v27 = vpop.permute.xlu0 %876  ;;  %v1634_v30 = vsel %vm851_vm3, %v1632_v19, %v1633_v24  ;;  %v1686_v19 = vmul.f32 %v1684_v9, %v4199_v8 }
 0x159   : > { %1508 = vrot.lane.b32.xlu2 %v1505_v12, %s4031_s28 }
 0x15b   : > { %v4478_v0 = vpop.permute.xlu2 %1107 }
 0x15c   : > { %5652 = vst [vmem:[#allocation14_spill] sm:$0xff] %v4478_v0 }
 0x15e   : > { %1449 = vrot.lane.b32.xlu1 %v1444_v32, %s4031_s28  ;;  %1487 = vrot.lane.b32.xlu0 %v1484_v28, %s4030_s21  ;;  %v1648_v32 = vmul.f32 %v1646_v43, %v4199_v8  ;;  %v1581_v28 = vmul.f32 %v1580_v57, %v4262_v58  ;;  %v1691_v43 = vrot.slane %v1685_v15, 4 }
 0x160   : > { %v4489_v47 = vpop.permute.xlu1 %895  ;;  %v4491_v48 = vpop.permute.xlu0 %957  ;;  %v1654_v41 = vrot.slane %v1648_v32, 2  ;;  %v1692_v32 = vrot.slane %v1686_v19, 4 }
 0x161   : > { %1565 = vrot.lane.b32.xlu2 %v1562_v33, %s4031_s28  ;;  %v1705_v33 = vstv %s3773_s15  ;;  %s3798_s15 = sld [smem:[#allocation4 + $0x4d]] }
 0x162   : > { %v1657_v50 = vsel %vm851_vm3, %v1654_v41, %v1656_v37  ;;  %v1706_v57 = vmul.f32 %v1705_v33, %v4262_v58  ;;  %v1687_v37 = vmul.f32 %v1684_v9, %v4308_v55 }
 0x163   : > { %v4495_v53 = vpop.permute.xlu2 %1129 }
 0x164   : > { %5653 = vst [vmem:[#allocation15_spill] sm:$0xff] %v4495_v53 }
 0x166   : > { %1506 = vrot.lane.b32.xlu1 %v1503_v59, %s4031_s28  ;;  %1544 = vrot.lane.b32.xlu0 %v1541_v45, %s4030_s21  ;;  %v1635_v59 = vrot.slane %v1628_v38, 2  ;;  %v1707_v45 = vmul.f32 %v1705_v33, %v4199_v8  ;;  %v1708_v38 = vmul.f32 %v1705_v33, %v4308_v55 }
 0x167   : > { %v2104_v0 = vstv %s3798_s15  ;;  %s3780_s15 = sld [smem:[#allocation4 + $0x3c]] }
 0x168   : > { %v4505_v10 = vpop.permute.xlu1 %936  ;;  %v4507_v52 = vpop.permute.xlu0 %989  ;;  %v1636_v11 = vsel %vm851_vm3, %v1633_v24, %v1635_v59  ;;  %v1713_v17 = vrot.slane %v1707_v45, 4  ;;  %v1653_v24 = vrot.slane %v1647_v7, 2 }
 0x169   : > { %1587 = vrot.lane.b32.xlu2 %v1582_v2, %s4030_s21  ;;  %v1712_v2 = vrot.slane %v1706_v57, 4  ;;  %v1777_v57 = vstv %s3778_s18  ;;  %s3801_s18 = sld [smem:[#allocation4 + $0x50]] }
 0x16a   : > { %v1779_v33 = vmul.f32 %v1777_v57, %v4211_v14 }
 0x16b   : > { %v4512_v18 = vpop.permute.xlu2 %1179 }
 0x16c   : > { %5654 = vst [vmem:[#allocation16_spill] sm:$0xff] %v4512_v18  ;;  %v1785_v19 = vrot.slane %v1779_v33, 2  ;;  %v1857_v33 = vstv %s3782_s22  ;;  %s3768_s22 = sld [smem:[#allocation4 + $0x30]] }
 0x16e   : > { %1546 = vrot.lane.b32.xlu1 %v1543_v21, %s4030_s21  ;;  %1567 = vrot.lane.b32.xlu0 %v1564_v22, %s4031_s28 }
 0x170   : > { %v4520_v12 = vpop.permute.xlu1 %991  ;;  %v4522_v29 = vpop.permute.xlu0 %1029 }
 0x171   : > { %1637 = vrot.lane.b32.xlu2 %v1634_v30, %s4030_s21  ;;  %v1714_v30 = vsel %vm911_vm4, %v1712_v2, %v1713_v17  ;;  %v1715_v2 = vrot.slane %v1708_v38, 4  ;;  %v1733_v38 = vmul.f32 %v1732_v35, %v4272_v3 }
 0x173   : > { %v4528_v34 = vpop.permute.xlu2 %1202  ;;  %v1716_v15 = vsel %vm911_vm4, %v1713_v17, %v1715_v2 }
 0x174   : > { %5655 = vst [vmem:[#allocation17_spill] sm:$0xff] %v4528_v34 }
 0x176   : > { %1585 = vrot.lane.b32.xlu1 %v1581_v28, %s4030_s21  ;;  %1599 = vrot.lane.b32.xlu0 %v1595_v36, %s4031_s28  ;;  %v1655_v28 = vsel %vm851_vm3, %v1653_v24, %v1654_v41  ;;  %v1693_v36 = vsel %vm911_vm4, %v1691_v43, %v1692_v32  ;;  %v1778_v41 = vmul.f32 %v1777_v57, %v4272_v3 }
 0x178   : > { %v4536_v42 = vpop.permute.xlu1 %1048  ;;  %v4538_v51 = vpop.permute.xlu0 %1086 }
 0x179   : > { %5656 = vst [vmem:[#allocation18_spill] sm:$0xff] %v4538_v51  ;;  %1660 = vrot.lane.b32.xlu2 %v1657_v50, %s4031_s28  ;;  %v1734_v50 = vmul.f32 %v1732_v35, %v4211_v14  ;;  %v1858_v35 = vmul.f32 %v1857_v33, %v4272_v3 }
 0x17b   : > { %v4544_v60 = vpop.permute.xlu2 %1259 }
 0x17c   : > { %5657 = vst [vmem:[#allocation19_spill] sm:$0xff] %v4544_v60 }
 0x17e   : > { %1601 = vrot.lane.b32.xlu1 %v1596_v62, %s4031_s28  ;;  %1639 = vrot.lane.b32.xlu0 %v1636_v11, %s4030_s21  ;;  %v1694_v62 = vrot.slane %v1687_v37, 4  ;;  %v1784_v11 = vrot.slane %v1778_v41, 2  ;;  %v1746_v37 = vstv %s4580_s20  ;;  %s4754_s20 = sld [smem:[#allocation4 + $0x2d]] }
 0x180   : > { %v4555_v21 = vpop.permute.xlu1 %1088  ;;  %v4557_v22 = vpop.permute.xlu0 %1109  ;;  %v1695_v7 = vsel %vm911_vm4, %v1692_v32, %v1694_v62  ;;  %v1780_v62 = vmul.f32 %v1777_v57, %v4276_v63 }
 0x181   : > { %5658 = vst [vmem:[#allocation20_spill] sm:$0xff] %v4555_v21  ;;  %1717 = vrot.lane.b32.xlu2 %v1714_v30, %s4031_s28  ;;  %v1798_v30 = vstv %s3779_s19  ;;  %s3800_s19 = sld [smem:[#allocation4 + $0x4f]] }
 0x182   : > { %5659 = vst [vmem:[#allocation21_spill] sm:$0xff] %v4557_v22  ;;  %v1800_v32 = vmul.f32 %v1798_v30, %v4211_v14 }
 0x183   : > { %v4561_v31 = vpop.permute.xlu2 %1281 }
 0x184   : > { %5660 = vst [vmem:[#allocation22_spill] sm:$0xff] %v4561_v31  ;;  %v1806_v2 = vrot.slane %v1800_v32, 2  ;;  %v1836_v32 = vstv %s3781_s23  ;;  %s4763_s23 = sld [smem:[#allocation4 + $0x52]] }
 0x185   : > { %v1839_v60 = vmul.f32 %v1836_v32, %v4276_v63 }
 0x186   : > { %1658 = vrot.lane.b32.xlu1 %v1655_v28, %s4031_s28  ;;  %1696 = vrot.lane.b32.xlu0 %v1693_v36, %s4030_s21  ;;  %v1786_v28 = vsel %vm851_vm3, %v1784_v11, %v1785_v19  ;;  %v1801_v36 = vmul.f32 %v1798_v30, %v4276_v63 }
 0x188   : > { %v4571_v59 = vpop.permute.xlu1 %1127  ;;  %v4573_v45 = vpop.permute.xlu0 %1141  ;;  %v1808_v41 = vrot.slane %v1801_v36, 2  ;;  %v1859_v36 = vmul.f32 %v1857_v33, %v4211_v14 }
 0x189   : > { %5661 = vst [vmem:[#allocation23_spill] sm:$0xff] %v4571_v59  ;;  %1739 = vrot.lane.b32.xlu2 %v1734_v50, %s4030_s21  ;;  %v1747_v50 = vmul.f32 %v1746_v37, %v4272_v3 }
 0x18a   : > { %5662 = vst [vmem:[#allocation24_spill] sm:$0xff] %v4573_v45 }
 0x18b   : > { %v4578_v9 = vpop.permute.xlu2 %1331 }
 0x18c   : > { %5663 = vst [vmem:[#allocation25_spill] sm:$0xff] %v4578_v9  ;;  %v1837_v9 = vmul.f32 %v1836_v32, %v4272_v3 }
 0x18e   : > { %1698 = vrot.lane.b32.xlu1 %v1695_v7, %s4030_s21  ;;  %1719 = vrot.lane.b32.xlu0 %v1716_v15, %s4031_s28  ;;  %v1809_v15 = vsel %vm851_vm3, %v1806_v2, %v1808_v41  ;;  %v1799_v41 = vmul.f32 %v1798_v30, %v4272_v3  ;;  %v1843_v30 = vrot.slane %v1837_v9, 4 }
 0x190   : > { %v4586_v24 = vpop.permute.xlu1 %1143  ;;  %v4588_v43 = vpop.permute.xlu0 %1181 }
 0x191   : > { %5664 = vst [vmem:[#allocation26_spill] sm:$0xff] %v4586_v24  ;;  %1789 = vrot.lane.b32.xlu2 %v1786_v28, %s4030_s21  ;;  %v1787_v28 = vrot.slane %v1780_v62, 2  ;;  %v1865_v62 = vrot.slane %v1859_v36, 4 }
 0x192   : > { %5665 = vst [vmem:[#allocation27_spill] sm:$0xff] %v4588_v43  ;;  %v2038_v43 = vstv %s4681_s11  ;;  %s3777_s11 = sld [smem:[#allocation4 + $0x39]] }
 0x193   : > { %v4594_v17 = vpop.permute.xlu2 %1354 }
 0x194   : > { %5666 = vst [vmem:[#allocation28_spill] sm:$0xff] %v4594_v17  ;;  %v1788_v17 = vsel %vm851_vm3, %v1785_v19, %v1787_v28  ;;  %v1805_v19 = vrot.slane %v1799_v41, 2 }
 0x196   : > { %1737 = vrot.lane.b32.xlu1 %v1733_v38, %s4030_s21  ;;  %1751 = vrot.lane.b32.xlu0 %v1747_v50, %s4031_s28  ;;  %v1748_v38 = vmul.f32 %v1746_v37, %v4211_v14  ;;  %v1864_v50 = vrot.slane %v1858_v35, 4 }
 0x198   : > { %v4602_v11 = vpop.permute.xlu1 %1200  ;;  %v4604_v7 = vpop.permute.xlu0 %1238 }
 0x199   : > { %5667 = vst [vmem:[#allocation29_spill] sm:$0xff] %v4602_v11  ;;  %1812 = vrot.lane.b32.xlu2 %v1809_v15, %s4031_s28  ;;  %v1838_v15 = vmul.f32 %v1836_v32, %v4211_v14 }
 0x19a   : > { %5668 = vst [vmem:[#allocation30_spill] sm:$0xff] %v4604_v7 }
 0x19b   : > { %v4610_v57 = vpop.permute.xlu2 %1411  ;;  %v1844_v31 = vrot.slane %v1838_v15, 4  ;;  %v1846_v15 = vrot.slane %v1839_v60, 4 }
 0x19c   : > { %5669 = vst [vmem:[#allocation31_spill] sm:$0xff] %v4610_v57  ;;  %v1866_v57 = vsel %vm911_vm4, %v1864_v50, %v1865_v62  ;;  %v1929_v50 = vstv %s3787_s27  ;;  %s3807_s27 = sld [smem:[#allocation4 + $0x56]] }
 0x19d   : > { %v1845_v36 = vsel %vm911_vm4, %v1843_v30, %v1844_v31 }
 0x19e   : > { %1753 = vrot.lane.b32.xlu1 %v1748_v38, %s4031_s28  ;;  %1791 = vrot.lane.b32.xlu0 %v1788_v17, %s4030_s21  ;;  %v1884_v38 = vstv %s4613_s25  ;;  %v1807_v17 = vsel %vm851_vm3, %v1805_v19, %v1806_v2  ;;  %v1930_v2 = vmul.f32 %v1929_v50, %v4298_v25  ;;  %s3806_s25 = sld [smem:[#allocation4 + $0x55]] }
 0x1a0   : > { %v4621_v37 = vpop.permute.xlu1 %1240  ;;  %v4623_v35 = vpop.permute.xlu0 %1261  ;;  %v1936_v30 = vrot.slane %v1930_v2, 2  ;;  %v1898_v2 = vstv %s4646_s30  ;;  %s4799_s30 = sld [smem:[#allocation4 + $0x53]] }
 0x1a1   : > { %5670 = vst [vmem:[#allocation32_spill] sm:$0xff] %v4621_v37  ;;  %1869 = vrot.lane.b32.xlu2 %v1866_v57, %s4031_s28  ;;  %v1860_v37 = vmul.f32 %v1857_v33, %v4276_v63  ;;  %v1886_v57 = vmul.f32 %v1884_v38, %v4217_v20  ;;  %v1931_v33 = vmul.f32 %v1929_v50, %v4217_v20 }
 0x1a2   : > { %5671 = vst [vmem:[#allocation33_spill] sm:$0xff] %v4623_v35 }
 0x1a3   : > { %v4627_v28 = vpop.permute.xlu2 %1435  ;;  %v1867_v32 = vrot.slane %v1860_v37, 4 }
 0x1a6   : > { %1810 = vrot.lane.b32.xlu1 %v1807_v17, %s4031_s28  ;;  %1848 = vrot.lane.b32.xlu0 %v1845_v36, %s4030_s21  ;;  %v1847_v17 = vsel %vm911_vm4, %v1844_v31, %v1846_v15  ;;  %v1868_v36 = vsel %vm911_vm4, %v1865_v62, %v1867_v32  ;;  %v1885_v15 = vmul.f32 %v1884_v38, %v4298_v25 }
 0x1a7   : > { %v1899_v32 = vmul.f32 %v1898_v2, %v4298_v25 }
 0x1a8   : > { %v4637_v9 = vpop.permute.xlu1 %1279  ;;  %v4639_v41 = vpop.permute.xlu0 %1293 }
 0x1a9   : > { %5672 = vst [vmem:[#allocation34_spill] sm:$0xff] %v4637_v9  ;;  %1891 = vrot.lane.b32.xlu2 %v1886_v57, %s4030_s21  ;;  %v1950_v57 = vstv %s3788_s29  ;;  %s3771_s29 = sld [smem:[#allocation4 + $0x33]] }
 0x1aa   : > { %5673 = vst [vmem:[#allocation35_spill] sm:$0xff] %v4639_v41  ;;  %v1937_v41 = vrot.slane %v1931_v33, 2  ;;  %v1953_v35 = vmul.f32 %v1950_v57, %v4302_v26  ;;  %v1952_v31 = vmul.f32 %v1950_v57, %v4217_v20 }
 0x1ab   : > { %v4644_v19 = vpop.permute.xlu2 %1485 }
 0x1ac   : > { %v1938_v9 = vsel %vm851_vm3, %v1936_v30, %v1937_v41  ;;  %v1960_v33 = vrot.slane %v1953_v35, 2  ;;  %v1958_v30 = vrot.slane %v1952_v31, 2  ;;  %v1900_v31 = vmul.f32 %v1898_v2, %v4217_v20 }
 0x1ae   : > { %1850 = vrot.lane.b32.xlu1 %v1847_v17, %s4030_s21  ;;  %1871 = vrot.lane.b32.xlu0 %v1868_v36, %s4031_s28  ;;  %v1932_v17 = vmul.f32 %v1929_v50, %v4302_v26  ;;  %v2009_v36 = vstv %s3791_s8  ;;  %s3810_s8 = sld [smem:[#allocation4 + $0x59]] }
 0x1af   : > { %v2010_v38 = vmul.f32 %v2009_v36, %v4298_v25  ;;  %v2011_v7 = vmul.f32 %v2009_v36, %v4217_v20 }
 0x1b0   : > { %v4652_v60 = vpop.permute.xlu1 %1295  ;;  %v4654_v37 = vpop.permute.xlu0 %1333  ;;  %v1939_v35 = vrot.slane %v1932_v17, 2 }
 0x1b1   : > { %5674 = vst [vmem:[#allocation36_spill] sm:$0xff] %v4652_v60  ;;  %1941 = vrot.lane.b32.xlu2 %v1938_v9, %s4030_s21  ;;  %v1961_v60 = vsel %vm851_vm3, %v1958_v30, %v1960_v33  ;;  %v1951_v33 = vmul.f32 %v1950_v57, %v4298_v25  ;;  %v2017_v17 = vrot.slane %v2011_v7, 4 }
 0x1b2   : > { %5675 = vst [vmem:[#allocation37_spill] sm:$0xff] %v4654_v37 }
 0x1b3   : > { %v4660_v62 = vpop.permute.xlu2 %1508  ;;  %v1957_v57 = vrot.slane %v1951_v33, 2  ;;  %v2040_v33 = vmul.f32 %v2038_v43, %v4188_v1 }
 0x1b5   : > { %v1959_v11 = vsel %vm851_vm3, %v1957_v57, %v1958_v30 }
 0x1b6   : > { %1889 = vrot.lane.b32.xlu1 %v1885_v15, %s4030_s21  ;;  %1903 = vrot.lane.b32.xlu0 %v1899_v32, %s4031_s28  ;;  %v2016_v15 = vrot.slane %v2010_v38, 4  ;;  %v1988_v32 = vstv %s3790_s9  ;;  %s3809_s9 = sld [smem:[#allocation4 + $0x58]] }
 0x1b8   : > { %v4668_v9 = vpop.permute.xlu1 %1352  ;;  %v4670_v37 = vpop.permute.xlu0 %1390 }
 0x1b9   : > { %5676 = vst [vmem:[#allocation38_spill] sm:$0xff] %v4668_v9  ;;  %1964 = vrot.lane.b32.xlu2 %v1961_v60, %s4031_s28  ;;  %v1989_v60 = vmul.f32 %v1988_v32, %v4298_v25  ;;  %v1990_v9 = vmul.f32 %v1988_v32, %v4217_v20 }
 0x1ba   : > { %5677 = vst [vmem:[#allocation39_spill] sm:$0xff] %v4670_v37  ;;  %v1940_v37 = vsel %vm851_vm3, %v1937_v41, %v1939_v35  ;;  %v2018_v41 = vsel %vm911_vm4, %v2016_v15, %v2017_v17  ;;  %v2012_v15 = vmul.f32 %v2009_v36, %v4302_v26 }
 0x1bb   : > { %v4678_v50 = vpop.permute.xlu2 %1565  ;;  %v1995_v35 = vrot.slane %v1989_v60, 4  ;;  %v1996_v7 = vrot.slane %v1990_v9, 4  ;;  %v2083_v60 = vstv %s3797_s12  ;;  %v1420_v9 = vstv %s4689_s13  ;;  %s4842_s12 = sld [smem:[#allocation4 + $0x5b]] }
 0x1bc   : > { %v2084_v30 = vmul.f32 %v2083_v60, %v4222_v23  ;;  %s3815_s13 = sld [smem:[#allocation4 + $0x5e]] }
 0x1be   : > { %1905 = vrot.lane.b32.xlu1 %v1900_v31, %s4031_s28  ;;  %1943 = vrot.lane.b32.xlu0 %v1940_v37, %s4030_s21  ;;  %v1422_v37 = vstv %s4676_s10  ;;  %v2090_v59 = vrot.slane %v2084_v30, 2  ;;  %s4830_s10 = sld [smem:[#allocation4 + $0x36]] }
 0x1bf   : > { %v1423_v34 = vmul.f32 %v1422_v37, %v4222_v23 }
 0x1c0   : > { %v4691_v2 = vpop.permute.xlu1 %1392  ;;  %v4693_v38 = vpop.permute.xlu0 %1413 }
 0x1c1   : > { %5678 = vst [vmem:[#allocation40_spill] sm:$0xff] %v4691_v2  ;;  %2021 = vrot.lane.b32.xlu2 %v2018_v41, %s4031_s28  ;;  %v1997_v2 = vsel %vm911_vm4, %v1995_v35, %v1996_v7  ;;  %v1424_v41 = vmul.f32 %v1422_v37, %v4188_v1  ;;  %v1425_v57 = vadd.f32 %v1423_v34, %v1420_v9  ;;  %v1456_v35 = vstv %s3759_s14  ;;  %s3816_s14 = sld [smem:[#allocation4 + $0x5f]] }
 0x1c2   : > { %5679 = vst [vmem:[#allocation41_spill] sm:$0xff] %v4693_v38  ;;  %v1991_v38 = vmul.f32 %v1988_v32, %v4302_v26  ;;  %v2019_v32 = vrot.slane %v2012_v15, 4  ;;  %v1458_v37 = vmul.f32 %v1456_v35, %v4188_v1  ;;  %v1459_v34 = vmul.f32 %v1456_v35, %v4245_v40 }
 0x1c3   : > { %v4698_v31 = vpop.permute.xlu2 %1587  ;;  %v1426_v22 = vadd.f32 %v1424_v41, %v1420_v9 }
 0x1c4   : > { %v1998_v36 = vrot.slane %v1991_v38, 4  ;;  %v2020_v15 = vsel %vm911_vm4, %v2017_v17, %v2019_v32  ;;  %v1466_v9 = vrot.slane %v1459_v34, 2  ;;  %v2107_v17 = vmul.f32 %v2104_v0, %v4245_v40 }
 0x1c5   : > { %v1515_v32 = vstv %s3762_s16  ;;  %s4878_s16 = sld [smem:[#allocation4 + $0x5c]] }
 0x1c6   : > { %1962 = vrot.lane.b32.xlu1 %v1959_v11, %s4031_s28  ;;  %2000 = vrot.lane.b32.xlu0 %v1997_v2, %s4030_s21  ;;  %v1457_v11 = vmul.f32 %v1456_v35, %v4222_v23  ;;  %v4715_v2 = vmul.f32 %v2083_v60, %v4188_v1  ;;  %v1999_v38 = vsel %vm911_vm4, %v1996_v7, %v1998_v36  ;;  %v1464_v35 = vrot.slane %v1458_v37, 2 }
 0x1c7   : > { %v2052_v37 = vstv %s4719_s17  ;;  %s3819_s17 = sld [smem:[#allocation4 + $0x62]] }
 0x1c8   : > { %v1434_v18 = vpop.permute.xlu1 %1433  ;;  %v1448_v24 = vpop.permute.xlu0 %1447  ;;  %v2053_v34 = vmul.f32 %v2052_v37, %v4222_v23 }
 0x1c9   : > { %2045 = vrot.lane.b32.xlu2 %v2040_v33, %s4030_s21  ;;  %v1439_v53 = vadd.f32 %v1434_v18, %v1425_v57  ;;  %v1463_v33 = vrot.slane %v1457_v11, 2  ;;  %v2091_v18 = vrot.slane %v4715_v2, 2  ;;  %v1440_v57 = vadd.f32 %v4627_v28, %v1426_v22 }
 0x1ca   : > { %v1516_v22 = vmul.f32 %v1515_v32, %v4222_v23  ;;  %v2039_v2 = vmul.f32 %v2038_v43, %v4222_v23 }
 0x1cb   : > { %v4717_v45 = vpop.permute.xlu2 %1637  ;;  %v1453_v21 = vadd.f32 %v1448_v24, %v1439_v53  ;;  %v2092_v7 = vsel %vm851_vm3, %v2090_v59, %v2091_v18  ;;  %v1465_v11 = vsel %vm851_vm3, %v1463_v33, %v1464_v35  ;;  %v4735_v53 = vmul.f32 %v2104_v0, %v4188_v1 }
 0x1cc   : > { %v1467_v59 = vsel %vm851_vm3, %v1464_v35, %v1466_v9 }
 0x1cd   : > { %v1470_v24 = vadd.f32 %v1465_v11, %v1453_v21  ;;  %v1522_v21 = vrot.slane %v1516_v22, 4 }
 0x1ce   : > { %2002 = vrot.lane.b32.xlu1 %v1999_v38, %s4030_s21  ;;  %2023 = vrot.lane.b32.xlu0 %v2020_v15, %s4031_s28  ;;  %v1517_v38 = vmul.f32 %v1515_v32, %v4188_v1  ;;  %v2114_v15 = vrot.slane %v2107_v17, 2  ;;  %v1518_v17 = vmul.f32 %v1515_v32, %v4245_v40 }
 0x1cf   : > { %v1491_v43 = vadd.f32 %v4644_v19, %v1470_v24 }
 0x1d0   : > { %v1450_v30 = vpop.permute.xlu1 %1449  ;;  %v1488_v41 = vpop.permute.xlu0 %1487  ;;  %v1523_v9 = vrot.slane %v1517_v38, 4  ;;  %v1525_v32 = vrot.slane %v1518_v17, 4 }
 0x1d1   : > { %v1454_v36 = vadd.f32 %v1450_v30, %v1440_v57  ;;  %2095 = vrot.lane.b32.xlu2 %v2092_v7, %s4030_s21  ;;  %v2086_v57 = vmul.f32 %v2083_v60, %v4245_v40  ;;  %v2112_v30 = vrot.slane %v4735_v53, 2  ;;  %v2163_v7 = vstv %s3801_s18  ;;  %s3818_s18 = sld [smem:[#allocation4 + $0x61]] }
 0x1d2   : > { %v1524_v22 = vsel %vm911_vm4, %v1522_v21, %v1523_v9  ;;  %v4757_v19 = vmul.f32 %v2163_v7, %v4188_v1 }
 0x1d3   : > { %v4737_v28 = vpop.permute.xlu2 %1660  ;;  %v1471_v33 = vadd.f32 %v1467_v59, %v1454_v36  ;;  %v2115_v51 = vsel %vm851_vm3, %v2112_v30, %v2114_v15  ;;  %v2164_v36 = vmul.f32 %v2163_v7, %v4222_v23  ;;  %v2142_v15 = vstv %s3800_s19  ;;  %s4908_s19 = sld [smem:[#allocation4 + $0x3f]] }
 0x1d5   : > { %v1492_v60 = vadd.f32 %v1488_v41, %v1471_v33  ;;  %v2170_v38 = vrot.slane %v2164_v36, 4  ;;  %v2105_v41 = vmul.f32 %v2104_v0, %v4222_v23  ;;  %v1526_v0 = vsel %vm911_vm4, %v1523_v9, %v1525_v32 }
 0x1d6   : > { %2043 = vrot.lane.b32.xlu1 %v2039_v2, %s4030_s21  ;;  %2057 = vrot.lane.b32.xlu0 %v2053_v34, %s4031_s28  ;;  %v2093_v2 = vrot.slane %v2086_v57, 2  ;;  %v2054_v34 = vmul.f32 %v2052_v37, %v4188_v1  ;;  %v2143_v57 = vmul.f32 %v2142_v15, %v4222_v23  ;;  %v2171_v37 = vrot.slane %v4757_v19, 4 }
 0x1d7   : > { %v2111_v17 = vrot.slane %v2105_v41, 2  ;;  %v1608_v19 = vstv %s3768_s22  ;;  %v2190_v32 = vstv %s4763_s23  ;;  %s4919_s22 = sld [smem:[#allocation4 + $0x64]] }
 0x1d8   : > { %v1507_v35 = vpop.permute.xlu1 %1506  ;;  %v1545_v11 = vpop.permute.xlu0 %1544  ;;  %v2094_v33 = vsel %vm851_vm3, %v2091_v18, %v2093_v2  ;;  %v2172_v18 = vsel %vm911_vm4, %v2170_v38, %v2171_v37  ;;  %s3824_s23 = sld [smem:[#allocation4 + $0x67]] }
 0x1d9   : > { %v1512_v59 = vadd.f32 %v1507_v35, %v1491_v43  ;;  %2118 = vrot.lane.b32.xlu2 %v2115_v51, %s4031_s28  ;;  %v1513_v51 = vadd.f32 %v4660_v62, %v1492_v60  ;;  %v2144_v43 = vmul.f32 %v2142_v15, %v4188_v1  ;;  %v2149_v60 = vrot.slane %v2143_v57, 4 }
 0x1da   : > { %v2113_v9 = vsel %vm851_vm3, %v2111_v17, %v2112_v30  ;;  %v2192_v30 = vmul.f32 %v2190_v32, %v4199_v8 }
 0x1db   : > { %v1529_v53 = vadd.f32 %v1524_v22, %v1512_v59  ;;  %v4759_v24 = vpop.permute.xlu2 %1717  ;;  %v1530_v36 = vadd.f32 %v1526_v0, %v1513_v51  ;;  %v2150_v22 = vrot.slane %v2144_v43, 4  ;;  %v2145_v51 = vmul.f32 %v2142_v15, %v4245_v40 }
 0x1dc   : > { %v2235_v43 = vstv %s3806_s25  ;;  %s3825_s25 = sld [smem:[#allocation4 + $0x68]] }
 0x1dd   : > { %v1550_v21 = vadd.f32 %v1545_v11, %v1529_v53  ;;  %v1574_v53 = vstv %s4754_s20  ;;  %v2151_v38 = vsel %vm911_vm4, %v2149_v60, %v2150_v22  ;;  %v2236_v17 = vmul.f32 %v2235_v43, %v4262_v58  ;;  %s3786_s20 = sld [smem:[#allocation4 + $0x42]] }
 0x1de   : > { %2059 = vrot.lane.b32.xlu1 %v2054_v34, %s4031_s28  ;;  %2097 = vrot.lane.b32.xlu0 %v2094_v33, %s4030_s21  ;;  %v1609_v34 = vmul.f32 %v1608_v19, %v4262_v58  ;;  %v1575_v41 = vmul.f32 %v1574_v53, %v4262_v58  ;;  %v2166_v33 = vmul.f32 %v2163_v7, %v4245_v40 }
 0x1df   : > { %v1571_v59 = vadd.f32 %v4678_v50, %v1550_v21  ;;  %v1610_v50 = vmul.f32 %v1608_v19, %v4199_v8  ;;  %v1576_v15 = vmul.f32 %v1574_v53, %v4199_v8 }
 0x1e0   : > { %v1547_v35 = vpop.permute.xlu1 %1546  ;;  %v1568_v62 = vpop.permute.xlu0 %1567  ;;  %v2173_v60 = vrot.slane %v2166_v33, 4 }
 0x1e1   : > { %2175 = vrot.lane.b32.xlu2 %v2172_v18, %s4031_s28  ;;  %v1551_v2 = vadd.f32 %v1547_v35, %v1530_v36  ;;  %v1577_v21 = vadd.f32 %v1575_v41, %v1571_v59  ;;  %v1615_v35 = vrot.slane %v1609_v34, 2  ;;  %v2152_v36 = vrot.slane %v2145_v51, 4 }
 0x1e2   : > { %v4795_v59 = vmul.f32 %v2235_v43, %v4199_v8  ;;  %v2242_v41 = vrot.slane %v2236_v17, 2  ;;  %v2174_v33 = vsel %vm911_vm4, %v2171_v37, %v2173_v60 }
 0x1e3   : > { %v4776_v11 = vpop.permute.xlu2 %1739  ;;  %v1572_v57 = vadd.f32 %v1568_v62, %v1551_v2  ;;  %v1611_v62 = vmul.f32 %v1608_v19, %v4308_v55  ;;  %v2153_v51 = vsel %vm911_vm4, %v2150_v22, %v2152_v36 }
 0x1e5   : > { %v1578_v2 = vadd.f32 %v1576_v15, %v1572_v57  ;;  %v1618_v19 = vrot.slane %v1611_v62, 2  ;;  %v1667_v15 = vstv %s3771_s29  ;;  %v2204_v62 = vstv %s4799_s30  ;;  %s4954_s29 = sld [smem:[#allocation4 + $0x65]] }
 0x1e6   : > { %2116 = vrot.lane.b32.xlu1 %v2113_v9, %s4031_s28  ;;  %2154 = vrot.lane.b32.xlu0 %v2151_v38, %s4030_s21  ;;  %v1616_v9 = vrot.slane %v1610_v50, 2  ;;  %v2243_v50 = vrot.slane %v4795_v59, 2  ;;  %v1668_v36 = vmul.f32 %v1667_v15, %v4262_v58  ;;  %v2191_v59 = vmul.f32 %v2190_v32, %v4262_v58  ;;  %s4981_s30 = sld [smem:[#allocation4 + $0x6e]] }
 0x1e7   : > { %v1592_v57 = vadd.f32 %v4698_v31, %v1578_v2  ;;  %v2205_v2 = vmul.f32 %v2204_v62, %v4262_v58 }
 0x1e8   : > { %v1586_v0 = vpop.permute.xlu1 %1585  ;;  %v1600_v18 = vpop.permute.xlu0 %1599  ;;  %v1617_v53 = vsel %vm851_vm3, %v1615_v35, %v1616_v9  ;;  %v2244_v22 = vsel %vm851_vm3, %v2242_v41, %v2243_v50 }
 0x1e9   : > { %v1591_v7 = vadd.f32 %v1586_v0, %v1577_v21  ;;  %2197 = vrot.lane.b32.xlu2 %v2192_v30, %s4030_s21  ;;  %v2256_v0 = vstv %s3807_s27  ;;  %s3789_s27 = sld [smem:[#allocation4 + $0x45]] }
 0x1ea   : > { %v2259_v37 = vmul.f32 %v2256_v0, %v4308_v55  ;;  %v4815_v31 = vmul.f32 %v2256_v0, %v4199_v8 }
 0x1eb   : > { %v1605_v38 = vadd.f32 %v1600_v18, %v1591_v7  ;;  %v4797_v34 = vpop.permute.xlu2 %1789  ;;  %v1619_v7 = vsel %vm851_vm3, %v1616_v9, %v1618_v19  ;;  %v2238_v9 = vmul.f32 %v2235_v43, %v4308_v55  ;;  %v2315_v19 = vstv %s3810_s8  ;;  %s3834_s8 = sld [smem:[#allocation4 + $0x70]] }
 0x1ec   : > { %v2316_v43 = vmul.f32 %v2315_v19, %v4262_v58 }
 0x1ed   : > { %v1622_v21 = vadd.f32 %v1617_v53, %v1605_v38  ;;  %v1669_v38 = vmul.f32 %v1667_v15, %v4199_v8  ;;  %v2266_v53 = vrot.slane %v2259_v37, 2 }
 0x1ee   : > { %2156 = vrot.lane.b32.xlu1 %v2153_v51, %s4030_s21  ;;  %2177 = vrot.lane.b32.xlu0 %v2174_v33, %s4031_s28  ;;  %v2264_v51 = vrot.slane %v4815_v31, 2  ;;  %v1670_v33 = vmul.f32 %v1667_v15, %v4308_v55  ;;  %v4836_v15 = vmul.f32 %v2315_v19, %v4199_v8 }
 0x1ef   : > { %v1643_v30 = vadd.f32 %v4717_v45, %v1622_v21  ;;  %v1674_v21 = vrot.slane %v1668_v36, 4 }
 0x1f0   : > { %v1602_v35 = vpop.permute.xlu1 %1601  ;;  %v1640_v18 = vpop.permute.xlu0 %1639  ;;  %v2267_v37 = vsel %vm851_vm3, %v2264_v51, %v2266_v53  ;;  %v1677_v36 = vrot.slane %v1670_v33, 4 }
 0x1f1   : > { %v1606_v17 = vadd.f32 %v1602_v35, %v1592_v57  ;;  %2247 = vrot.lane.b32.xlu2 %v2244_v22, %s4030_s21  ;;  %v1675_v35 = vrot.slane %v1669_v38, 4 }
 0x1f3   : > { %v1623_v45 = vadd.f32 %v1619_v7, %v1606_v17  ;;  %v4817_v60 = vpop.permute.xlu2 %1812  ;;  %v2245_v17 = vrot.slane %v2238_v9, 2  ;;  %v1676_v7 = vsel %vm911_vm4, %v1674_v21, %v1675_v35  ;;  %v1678_v9 = vsel %vm911_vm4, %v1675_v35, %v1677_v36 }
 0x1f5   : > { %v1644_v41 = vadd.f32 %v1640_v18, %v1623_v45  ;;  %v2206_v45 = vmul.f32 %v2204_v62, %v4199_v8  ;;  %v2246_v53 = vsel %vm851_vm3, %v2243_v50, %v2245_v17  ;;  %v2323_v62 = vrot.slane %v4836_v15, 4 }
 0x1f6   : > { %2195 = vrot.lane.b32.xlu1 %v2191_v59, %s4030_s21  ;;  %2209 = vrot.lane.b32.xlu0 %v2205_v2, %s4031_s28  ;;  %v2322_v59 = vrot.slane %v2316_v43, 4  ;;  %v2257_v2 = vmul.f32 %v2256_v0, %v4262_v58 }
 0x1f7   : > { %v1665_v32 = vadd.f32 %v4737_v28, %v1644_v41 }
 0x1f8   : > { %v1659_v57 = vpop.permute.xlu1 %1658  ;;  %v1697_v22 = vpop.permute.xlu0 %1696  ;;  %v2263_v43 = vrot.slane %v2257_v2, 2 }
 0x1f9   : > { %v1664_v18 = vadd.f32 %v1659_v57, %v1643_v30  ;;  %2270 = vrot.lane.b32.xlu2 %v2267_v37, %s4031_s28  ;;  %v2294_v30 = vstv %s3809_s9  ;;  %v1682_v33 = vadd.f32 %v1678_v9, %v1665_v32  ;;  %v2324_v37 = vsel %vm911_vm4, %v2322_v59, %v2323_v62  ;;  %s4985_s9 = sld [smem:[#allocation4 + $0x48]] }
 0x1fa   : > { %v2295_v41 = vmul.f32 %v2294_v30, %v4262_v58  ;;  %v2296_v0 = vmul.f32 %v2294_v30, %v4199_v8  ;;  %v1760_v32 = vstv %s3777_s11  ;;  %v2265_v15 = vsel %vm851_vm3, %v2263_v43, %v2264_v51  ;;  %s4991_s11 = sld [smem:[#allocation4 + $0x6d]] }
 0x1fb   : > { %v1681_v28 = vadd.f32 %v1676_v7, %v1664_v18  ;;  %v4838_v31 = vpop.permute.xlu2 %1869  ;;  %v1762_v9 = vmul.f32 %v1760_v32, %v4211_v14 }
 0x1fc   : > { %v2301_v17 = vrot.slane %v2295_v41, 4  ;;  %v2318_v41 = vmul.f32 %v2315_v19, %v4308_v55 }
 0x1fd   : > { %v1702_v38 = vadd.f32 %v1697_v22, %v1681_v28  ;;  %v1726_v22 = vstv %s4830_s10  ;;  %s3796_s10 = sld [smem:[#allocation4 + $0x4b]] }
 0x1fe   : > { %2211 = vrot.lane.b32.xlu1 %v2206_v45, %s4031_s28  ;;  %2249 = vrot.lane.b32.xlu0 %v2246_v53, %s4030_s21  ;;  %v1728_v35 = vmul.f32 %v1726_v22, %v4211_v14  ;;  %v1727_v28 = vmul.f32 %v1726_v22, %v4272_v3  ;;  %v1761_v45 = vmul.f32 %v1760_v32, %v4272_v3 }
 0x1ff   : > { %v1723_v21 = vadd.f32 %v4759_v24, %v1702_v38  ;;  %v2302_v24 = vrot.slane %v2296_v0, 4  ;;  %v2342_v38 = vstv %s4842_s12  ;;  %v2297_v53 = vmul.f32 %v2294_v30, %v4308_v55  ;;  %s4996_s12 = sld [smem:[#allocation6 + $0x2]] }
 0x200   : > { %v1699_v57 = vpop.permute.xlu1 %1698  ;;  %v1720_v50 = vpop.permute.xlu0 %1719  ;;  %v2344_v51 = vmul.f32 %v2342_v38, %v4211_v14 }
 0x201   : > { %v1703_v18 = vadd.f32 %v1699_v57, %v1682_v33  ;;  %2327 = vrot.lane.b32.xlu2 %v2324_v37, %s4031_s28  ;;  %v2303_v2 = vsel %vm911_vm4, %v2301_v17, %v2302_v24  ;;  %v1729_v33 = vadd.f32 %v1727_v28, %v1723_v21  ;;  %v2387_v57 = vstv %s3815_s13  ;;  %s3837_s13 = sld [smem:[#allocation4 + $0x73]] }
 0x202   : > { %v2388_v30 = vmul.f32 %v2387_v57, %v4272_v3  ;;  %v2304_v19 = vrot.slane %v2297_v53, 4  ;;  %v1768_v17 = vrot.slane %v1762_v9, 2  ;;  %v1763_v21 = vmul.f32 %v1760_v32, %v4276_v63 }
 0x203   : > { %v1724_v7 = vadd.f32 %v1720_v50, %v1703_v18  ;;  %v4856_v36 = vpop.permute.xlu2 %1891  ;;  %v1767_v50 = vrot.slane %v1761_v45, 2  ;;  %v2325_v18 = vrot.slane %v2318_v41, 4  ;;  %v2408_v9 = vstv %s3816_s14  ;;  %s3835_s14 = sld [smem:[#allocation4 + $0x71]] }
 0x204   : > { %v2394_v28 = vrot.slane %v2388_v30, 2  ;;  %v1770_v32 = vrot.slane %v1763_v21, 2  ;;  %v2343_v21 = vmul.f32 %v2342_v38, %v4272_v3 }
 0x205   : > { %v1730_v59 = vadd.f32 %v1728_v35, %v1724_v7  ;;  %v4874_v35 = vmul.f32 %v2387_v57, %v4211_v14 }
 0x206   : > { %2268 = vrot.lane.b32.xlu1 %v2265_v15, %s4031_s28  ;;  %2306 = vrot.lane.b32.xlu0 %v2303_v2, %s4030_s21  ;;  %v1769_v15 = vsel %vm851_vm3, %v1767_v50, %v1768_v17  ;;  %v2326_v2 = vsel %vm911_vm4, %v2323_v62, %v2325_v18  ;;  %v1819_v62 = vstv %s3780_s15  ;;  %v2356_v18 = vstv %s4878_s16  ;;  %s3838_s15 = sld [smem:[#allocation4 + $0x74]] }
 0x207   : > { %v1744_v0 = vadd.f32 %v4776_v11, %v1730_v59  ;;  %v2305_v59 = vsel %vm911_vm4, %v2302_v24, %v2304_v19  ;;  %v2395_v53 = vrot.slane %v4874_v35, 2  ;;  %v2411_v24 = vmul.f32 %v2408_v9, %v4276_v63  ;;  %s3799_s16 = sld [smem:[#allocation4 + $0x4e]] }
 0x208   : > { %v1738_v22 = vpop.permute.xlu1 %1737  ;;  %v1752_v37 = vpop.permute.xlu0 %1751  ;;  %v1820_v30 = vmul.f32 %v1819_v62, %v4272_v3  ;;  %v2357_v35 = vmul.f32 %v2356_v18, %v4272_v3 }
 0x209   : > { %v1743_v43 = vadd.f32 %v1738_v22, %v1729_v33  ;;  %2349 = vrot.lane.b32.xlu2 %v2344_v51, %s4030_s21  ;;  %v2396_v22 = vsel %vm851_vm3, %v2394_v28, %v2395_v53 }
 0x20a   : > { %v1826_v28 = vrot.slane %v1820_v30, 4 }
 0x20b   : > { %v1757_v11 = vadd.f32 %v1752_v37, %v1743_v43  ;;  %v4876_v7 = vpop.permute.xlu2 %1941  ;;  %v1771_v37 = vsel %vm851_vm3, %v1768_v17, %v1770_v32  ;;  %v4893_v43 = vmul.f32 %v2408_v9, %v4211_v14  ;;  %v2390_v17 = vmul.f32 %v2387_v57, %v4276_v63 }
 0x20d   : > { %v1774_v45 = vadd.f32 %v1769_v15, %v1757_v11  ;;  %v2418_v11 = vrot.slane %v2411_v24, 2 }
 0x20e   : > { %2308 = vrot.lane.b32.xlu1 %v2305_v59, %s4030_s21  ;;  %2329 = vrot.lane.b32.xlu0 %v2326_v2, %s4031_s28  ;;  %v1822_v59 = vmul.f32 %v1819_v62, %v4276_v63  ;;  %v2467_v2 = vstv %s3819_s17  ;;  %s5066_s17 = sld [smem:[#allocation4 + $0x77]] }
 0x20f   : > { %v1795_v41 = vadd.f32 %v4797_v34, %v1774_v45  ;;  %v2416_v45 = vrot.slane %v4893_v43, 2  ;;  %v2468_v57 = vmul.f32 %v2467_v2, %v4272_v3 }
 0x210   : > { %v1754_v33 = vpop.permute.xlu1 %1753  ;;  %v1792_v51 = vpop.permute.xlu0 %1791  ;;  %v1829_v30 = vrot.slane %v1822_v59, 4 }
 0x211   : > { %v1758_v50 = vadd.f32 %v1754_v33, %v1744_v0  ;;  %2399 = vrot.lane.b32.xlu2 %v2396_v22, %s4030_s21  ;;  %v1821_v0 = vmul.f32 %v1819_v62, %v4211_v14  ;;  %v2419_v24 = vsel %vm851_vm3, %v2416_v45, %v2418_v11  ;;  %v4914_v62 = vmul.f32 %v2467_v2, %v4211_v14 }
 0x212   : > { %v2409_v11 = vmul.f32 %v2408_v9, %v4272_v3 }
 0x213   : > { %v1775_v34 = vadd.f32 %v1771_v37, %v1758_v50  ;;  %v4895_v19 = vpop.permute.xlu2 %1964  ;;  %v1827_v33 = vrot.slane %v1821_v0, 4  ;;  %v2397_v50 = vrot.slane %v2390_v17, 2 }
 0x215   : > { %v1796_v15 = vadd.f32 %v1792_v51, %v1775_v34  ;;  %v1828_v37 = vsel %vm911_vm4, %v1826_v28, %v1827_v33  ;;  %v2358_v34 = vmul.f32 %v2356_v18, %v4211_v14  ;;  %v2398_v0 = vsel %vm851_vm3, %v2395_v53, %v2397_v50 }
 0x216   : > { %2347 = vrot.lane.b32.xlu1 %v2343_v21, %s4030_s21  ;;  %2361 = vrot.lane.b32.xlu0 %v2357_v35, %s4031_s28  ;;  %v2474_v21 = vrot.slane %v2468_v57, 4  ;;  %v2446_v35 = vstv %s3818_s18  ;;  %v1830_v17 = vsel %vm911_vm4, %v1827_v33, %v1829_v30  ;;  %v2475_v18 = vrot.slane %v4914_v62, 4  ;;  %s3843_s18 = sld [smem:[#allocation4 + $0x79]] }
 0x217   : > { %v1817_v38 = vadd.f32 %v4817_v60, %v1796_v15  ;;  %v2447_v15 = vmul.f32 %v2446_v35, %v4272_v3 }
 0x218   : > { %v1811_v32 = vpop.permute.xlu1 %1810  ;;  %v1849_v22 = vpop.permute.xlu0 %1848 }
 0x219   : > { %v1816_v51 = vadd.f32 %v1811_v32, %v1795_v41  ;;  %2422 = vrot.lane.b32.xlu2 %v2419_v24, %s4031_s28  ;;  %v1834_v59 = vadd.f32 %v1830_v17, %v1817_v38  ;;  %v2448_v32 = vmul.f32 %v2446_v35, %v4211_v14  ;;  %v2476_v24 = vsel %vm911_vm4, %v2474_v21, %v2475_v18 }
 0x21a   : > { %v2453_v50 = vrot.slane %v2447_v15, 4  ;;  %v1912_v38 = vstv %s3786_s20  ;;  %s5074_s20 = sld [smem:[#allocation4 + $0x76]] }
 0x21b   : > { %v1833_v60 = vadd.f32 %v1828_v37, %v1816_v51  ;;  %v4916_v43 = vpop.permute.xlu2 %2021  ;;  %v2415_v51 = vrot.slane %v2409_v11, 2  ;;  %v1913_v62 = vmul.f32 %v1912_v38, %v4298_v25  ;;  %v1914_v17 = vmul.f32 %v1912_v38, %v4217_v20 }
 0x21d   : > { %v1854_v41 = vadd.f32 %v1849_v22, %v1833_v60  ;;  %v1878_v22 = vstv %s4908_s19  ;;  %v2494_v60 = vstv %s4919_s22  ;;  %s5070_s19 = sld [smem:[#allocation4 + $0x51]] }
 0x21e   : > { %2363 = vrot.lane.b32.xlu1 %v2358_v34, %s4031_s28  ;;  %2401 = vrot.lane.b32.xlu0 %v2398_v0, %s4030_s21  ;;  %v1880_v33 = vmul.f32 %v1878_v22, %v4217_v20  ;;  %v2449_v34 = vmul.f32 %v2446_v35, %v4276_v63  ;;  %v2417_v0 = vsel %vm851_vm3, %v2415_v51, %v2416_v45  ;;  %s3805_s22 = sld [smem:[#allocation4 + $0x54]] }
 0x21f   : > { %v1875_v28 = vadd.f32 %v4838_v31, %v1854_v41  ;;  %v2454_v31 = vrot.slane %v2448_v32, 4  ;;  %v2470_v41 = vmul.f32 %v2467_v2, %v4276_v63  ;;  %v1879_v15 = vmul.f32 %v1878_v22, %v4298_v25 }
 0x220   : > { %v1851_v53 = vpop.permute.xlu1 %1850  ;;  %v1872_v9 = vpop.permute.xlu0 %1871  ;;  %v2496_v32 = vmul.f32 %v2494_v60, %v4217_v20  ;;  %v2456_v22 = vrot.slane %v2449_v34, 4 }
 0x221   : > { %v1855_v57 = vadd.f32 %v1851_v53, %v1834_v59  ;;  %2479 = vrot.lane.b32.xlu2 %v2476_v24, %s4031_s28  ;;  %v2455_v11 = vsel %vm911_vm4, %v2453_v50, %v2454_v31  ;;  %v1881_v59 = vadd.f32 %v1879_v15, %v1875_v28  ;;  %v2539_v53 = vstv %s3824_s23  ;;  %s3846_s23 = sld [smem:[#allocation4 + $0x7c]] }
 0x222   : > { %v2540_v24 = vmul.f32 %v2539_v53, %v4298_v25  ;;  %v2477_v51 = vrot.slane %v2470_v41, 4  ;;  %v1920_v50 = vrot.slane %v1914_v17, 2  ;;  %v1915_v28 = vmul.f32 %v1912_v38, %v4302_v26 }
 0x223   : > { %v1876_v37 = vadd.f32 %v1872_v9, %v1855_v57  ;;  %v4934_v30 = vpop.permute.xlu2 %2045  ;;  %v1919_v9 = vrot.slane %v1913_v62, 2  ;;  %v2560_v17 = vstv %s3825_s25  ;;  %s3844_s25 = sld [smem:[#allocation4 + $0x7a]] }
 0x224   : > { %v2478_v34 = vsel %vm911_vm4, %v2475_v18, %v2477_v51  ;;  %v1922_v38 = vrot.slane %v1915_v28, 2  ;;  %v1971_v18 = vstv %s3789_s27  ;;  %v2508_v51 = vstv %s4954_s29  ;;  %s3847_s27 = sld [smem:[#allocation4 + $0x7d]] }
 0x225   : > { %v1882_v21 = vadd.f32 %v1880_v33, %v1876_v37  ;;  %v2541_v33 = vmul.f32 %v2539_v53, %v4217_v20  ;;  %v1921_v62 = vsel %vm851_vm3, %v1919_v9, %v1920_v50  ;;  %v2563_v9 = vmul.f32 %v2560_v17, %v4302_v26  ;;  %s3808_s29 = sld [smem:[#allocation4 + $0x57]] }
 0x226   : > { %2420 = vrot.lane.b32.xlu1 %v2417_v0, %s4031_s28  ;;  %2458 = vrot.lane.b32.xlu0 %v2455_v11, %s4030_s21  ;;  %v2457_v11 = vsel %vm911_vm4, %v2454_v31, %v2456_v22  ;;  %v1923_v31 = vsel %vm851_vm3, %v1920_v50, %v1922_v38  ;;  %v2495_v28 = vmul.f32 %v2494_v60, %v4298_v25 }
 0x227   : > { %v1896_v35 = vadd.f32 %v4856_v36, %v1882_v21  ;;  %v2546_v21 = vrot.slane %v2540_v24, 2  ;;  %v2547_v41 = vrot.slane %v2541_v33, 2  ;;  %v1972_v24 = vmul.f32 %v1971_v18, %v4298_v25 }
 0x228   : > { %v1890_v2 = vpop.permute.xlu1 %1889  ;;  %v1904_v45 = vpop.permute.xlu0 %1903  ;;  %v2509_v33 = vmul.f32 %v2508_v51, %v4298_v25 }
 0x229   : > { %v1895_v57 = vadd.f32 %v1890_v2, %v1881_v59  ;;  %2501 = vrot.lane.b32.xlu2 %v2496_v32, %s4030_s21  ;;  %v2548_v2 = vsel %vm851_vm3, %v2546_v21, %v2547_v41  ;;  %v2542_v21 = vmul.f32 %v2539_v53, %v4302_v26  ;;  %v1978_v50 = vrot.slane %v1972_v24, 4 }
 0x22b   : > { %v1909_v37 = vadd.f32 %v1904_v45, %v1895_v57  ;;  %v4952_v36 = vpop.permute.xlu2 %2095  ;;  %v4968_v57 = vmul.f32 %v2560_v17, %v4217_v20 }
 0x22d   : > { %v1926_v0 = vadd.f32 %v1921_v62, %v1909_v37  ;;  %v2570_v37 = vrot.slane %v2563_v9, 2 }
 0x22e   : > { %2460 = vrot.lane.b32.xlu1 %v2457_v11, %s4030_s21  ;;  %2481 = vrot.lane.b32.xlu0 %v2478_v34, %s4031_s28  ;;  %v1974_v11 = vmul.f32 %v1971_v18, %v4302_v26 }
 0x22f   : > { %v1947_v15 = vadd.f32 %v4876_v7, %v1926_v0  ;;  %v2568_v0 = vrot.slane %v4968_v57, 2 }
 0x230   : > { %v1906_v59 = vpop.permute.xlu1 %1905  ;;  %v1944_v32 = vpop.permute.xlu0 %1943 }
 0x231   : > { %v1910_v45 = vadd.f32 %v1906_v59, %v1896_v35  ;;  %2551 = vrot.lane.b32.xlu2 %v2548_v2, %s4030_s21  ;;  %v1973_v35 = vmul.f32 %v1971_v18, %v4217_v20  ;;  %v2549_v2 = vrot.slane %v2542_v21, 2 }
 0x233   : > { %v1927_v22 = vadd.f32 %v1923_v31, %v1910_v45  ;;  %v4970_v7 = vpop.permute.xlu2 %2118  ;;  %v1979_v38 = vrot.slane %v1973_v35, 4  ;;  %v1981_v45 = vrot.slane %v1974_v11, 4  ;;  %v2550_v57 = vsel %vm851_vm3, %v2547_v41, %v2549_v2 }
 0x234   : > { %v2693_v41 = vstv %s3834_s8  ;;  %v2032_v11 = vstv %s4985_s9  ;;  %s3852_s8 = sld [smem:[#allocation4 + $0x82]] }
 0x235   : > { %v1948_v62 = vadd.f32 %v1944_v32, %v1927_v22  ;;  %v2571_v32 = vsel %vm851_vm3, %v2568_v0, %v2570_v37  ;;  %v1980_v9 = vsel %vm911_vm4, %v1978_v50, %v1979_v38  ;;  %v1982_v22 = vsel %vm911_vm4, %v1979_v38, %v1981_v45  ;;  %s5148_s9 = sld [smem:[#allocation4 + $0x5a]] }
 0x236   : > { %2499 = vrot.lane.b32.xlu1 %v2495_v28, %s4030_s21  ;;  %2513 = vrot.lane.b32.xlu0 %v2509_v33, %s4031_s28  ;;  %v2662_v28 = vstv %s4981_s30  ;;  %s5144_s30 = sld [smem:[#allocation4 + $0x80]] }
 0x237   : > { %v1969_v60 = vadd.f32 %v4895_v19, %v1948_v62  ;;  %v2510_v19 = vmul.f32 %v2508_v51, %v4217_v20  ;;  %v2663_v35 = vmul.f32 %v2662_v28, %v4222_v23  ;;  %v2696_v62 = vmul.f32 %v2693_v41, %v4245_v40 }
 0x238   : > { %v1963_v34 = vpop.permute.xlu1 %1962  ;;  %v2001_v59 = vpop.permute.xlu0 %2000 }
 0x239   : > { %v1968_v53 = vadd.f32 %v1963_v34, %v1947_v15  ;;  %2574 = vrot.lane.b32.xlu2 %v2571_v32, %s4031_s28  ;;  %v2561_v15 = vmul.f32 %v2560_v17, %v4298_v25  ;;  %v1986_v51 = vadd.f32 %v1982_v22, %v1969_v60  ;;  %v2066_v34 = vstv %s3796_s10  ;;  %s5152_s10 = sld [smem:[#allocation4 + $0x7f]] }
 0x23a   : > { %v2033_v32 = vmul.f32 %v2032_v11, %v4222_v23  ;;  %v2752_v22 = vstv %s3837_s13  ;;  %s3853_s13 = sld [smem:[#allocation4 + $0x83]] }
 0x23b   : > { %v1985_v18 = vadd.f32 %v1980_v9, %v1968_v53  ;;  %v4989_v31 = vpop.permute.xlu2 %2175  ;;  %v2567_v50 = vrot.slane %v2561_v15, 2  ;;  %v2067_v53 = vmul.f32 %v2066_v34, %v4222_v23  ;;  %v2703_v9 = vrot.slane %v2696_v62, 2 }
 0x23d   : > { %v2006_v24 = vadd.f32 %v2001_v59, %v1985_v18  ;;  %v2648_v59 = vstv %s4991_s11  ;;  %v2569_v45 = vsel %vm851_vm3, %v2567_v50, %v2568_v0  ;;  %v2068_v18 = vmul.f32 %v2066_v34, %v4188_v1  ;;  %s3814_s11 = sld [smem:[#allocation4 + $0x5d]] }
 0x23e   : > { %2515 = vrot.lane.b32.xlu1 %v2510_v19, %s4031_s28  ;;  %2553 = vrot.lane.b32.xlu0 %v2550_v57, %s4030_s21  ;;  %v2649_v2 = vmul.f32 %v2648_v59, %v4222_v23  ;;  %v2030_v19 = vstv %s4996_s12  ;;  %v2073_v15 = vrot.slane %v2067_v53, 2  ;;  %v2034_v0 = vmul.f32 %v2032_v11, %v4188_v1  ;;  %s3855_s12 = sld [smem:[#allocation4 + $0x85]] }
 0x23f   : > { %v5003_v33 = vadd.f32 %v4916_v43, %v2006_v24  ;;  %v5010_v43 = vmul.f32 %v2693_v41, %v4188_v1  ;;  %v2035_v57 = vadd.f32 %v2033_v32, %v2030_v19  ;;  %v2069_v50 = vmul.f32 %v2066_v34, %v4245_v40 }
 0x240   : > { %v2003_v17 = vpop.permute.xlu1 %2002  ;;  %v2024_v37 = vpop.permute.xlu0 %2023 }
 0x241   : > { %5680 = vst [vmem:[#allocation42_spill] sm:$0xff] %v5003_v33  ;;  %v2007_v21 = vadd.f32 %v2003_v17, %v1986_v51  ;;  %2667 = vrot.lane.b32.xlu2 %v2663_v35, %s4031_s28  ;;  %v2701_v24 = vrot.slane %v5010_v43, 2  ;;  %v5032_v43 = vmul.f32 %v2752_v22, %v4188_v1 }
 0x243   : > { %v5012_v38 = vadd.f32 %v2024_v37, %v2007_v21  ;;  %v5014_v60 = vpop.permute.xlu2 %2197  ;;  %v2704_v17 = vsel %vm851_vm3, %v2701_v24, %v2703_v9  ;;  %v2753_v37 = vmul.f32 %v2752_v22, %v4222_v23  ;;  %v2074_v21 = vrot.slane %v2068_v18, 2 }
 0x244   : > { %v2650_v9 = vmul.f32 %v2648_v59, %v4188_v1  ;;  %v2694_v18 = vmul.f32 %v2693_v41, %v4222_v23 }
 0x245   : > { %5681 = vst [vmem:[#allocation43_spill] sm:$0xff] %v5012_v38  ;;  %v2075_v32 = vsel %vm851_vm3, %v2073_v15, %v2074_v21  ;;  %v2759_v11 = vrot.slane %v2753_v37, 4  ;;  %v2076_v15 = vrot.slane %v2069_v50, 2  ;;  %v2773_v37 = vstv %s3838_s15  ;;  %s3817_s15 = sld [smem:[#allocation4 + $0x60]] }
 0x246   : > { %2572 = vrot.lane.b32.xlu1 %v2569_v45, %s4031_s28  ;;  %2653 = vrot.lane.b32.xlu0 %v2649_v2, %s4030_s21  ;;  %v2664_v45 = vmul.f32 %v2662_v28, %v4188_v1 }
 0x248   : > { %v2044_v51 = vpop.permute.xlu1 %2043  ;;  %v2058_v35 = vpop.permute.xlu0 %2057 }
 0x249   : > { %v2049_v62 = vadd.f32 %v2044_v51, %v2035_v57  ;;  %2707 = vrot.lane.b32.xlu2 %v2704_v17, %s4030_s21  ;;  %v2714_v57 = vstv %s3835_s14  ;;  %v2036_v51 = vadd.f32 %v2034_v0, %v2030_v19  ;;  %v2700_v0 = vrot.slane %v2694_v18, 2  ;;  %s3856_s14 = sld [smem:[#allocation4 + $0x86]] }
 0x24a   : > { %v2715_v34 = vmul.f32 %v2714_v57, %v4222_v23  ;;  %v2716_v59 = vmul.f32 %v2714_v57, %v4188_v1 }
 0x24b   : > { %v2063_v53 = vadd.f32 %v2058_v35, %v2049_v62  ;;  %v5035_v2 = vpop.permute.xlu2 %2247  ;;  %v2760_v35 = vrot.slane %v5032_v43, 4  ;;  %v2050_v62 = vadd.f32 %v4934_v30, %v2036_v51  ;;  %v2077_v43 = vsel %vm851_vm3, %v2074_v21, %v2076_v15 }
 0x24c   : > { %v2721_v50 = vrot.slane %v2715_v34, 2  ;;  %v2755_v21 = vmul.f32 %v2752_v22, %v4245_v40 }
 0x24d   : > { %v2080_v17 = vadd.f32 %v2075_v32, %v2063_v53  ;;  %v2761_v19 = vsel %vm911_vm4, %v2759_v11, %v2760_v35  ;;  %v2776_v32 = vmul.f32 %v2773_v37, %v4245_v40  ;;  %v2702_v11 = vsel %vm851_vm3, %v2700_v0, %v2701_v24 }
 0x24e   : > { %2655 = vrot.lane.b32.xlu1 %v2650_v9, %s4030_s21  ;;  %2669 = vrot.lane.b32.xlu0 %v2664_v45, %s4031_s28  ;;  %v2125_v9 = vstv %s3799_s16  ;;  %v5053_v45 = vmul.f32 %v2773_v37, %v4188_v1  ;;  %s5222_s16 = sld [smem:[#allocation4 + $0x89]] }
 0x24f   : > { %v2101_v28 = vadd.f32 %v4952_v36, %v2080_v17  ;;  %v2126_v30 = vmul.f32 %v2125_v9, %v4222_v23  ;;  %v2722_v17 = vrot.slane %v2716_v59, 2  ;;  %v2127_v18 = vmul.f32 %v2125_v9, %v4188_v1 }
 0x250   : > { %v2060_v41 = vpop.permute.xlu1 %2059  ;;  %v2098_v38 = vpop.permute.xlu0 %2097  ;;  %v2128_v59 = vmul.f32 %v2125_v9, %v4245_v40 }
 0x251   : > { %v2064_v53 = vadd.f32 %v2060_v41, %v2050_v62  ;;  %2764 = vrot.lane.b32.xlu2 %v2761_v19, %s4030_s21  ;;  %v2783_v62 = vrot.slane %v2776_v32, 4  ;;  %v2723_v34 = vsel %vm851_vm3, %v2721_v50, %v2722_v17  ;;  %v2717_v19 = vmul.f32 %v2714_v57, %v4245_v40 }
 0x252   : > { %v2132_v15 = vrot.slane %v2126_v30, 4  ;;  %v2133_v0 = vrot.slane %v2127_v18, 4  ;;  %v2135_v30 = vrot.slane %v2128_v59, 4  ;;  %v2774_v18 = vmul.f32 %v2773_v37, %v4222_v23 }
 0x253   : > { %v2081_v36 = vadd.f32 %v2077_v43, %v2064_v53  ;;  %v5055_v51 = vpop.permute.xlu2 %2270  ;;  %v2781_v53 = vrot.slane %v5053_v45, 4  ;;  %v2724_v50 = vrot.slane %v2717_v19, 2  ;;  %v2762_v43 = vrot.slane %v2755_v21, 4 }
 0x254   : > { %v2134_v9 = vsel %vm911_vm4, %v2132_v15, %v2133_v0  ;;  %v2845_v15 = vstv %s3843_s18  ;;  %v2184_v59 = vstv %s5070_s19  ;;  %s5226_s18 = sld [smem:[#allocation4 + $0x63]] }
 0x255   : > { %v2102_v41 = vadd.f32 %v2098_v38, %v2081_v36  ;;  %v2784_v57 = vsel %vm911_vm4, %v2781_v53, %v2783_v62  ;;  %v2136_v62 = vsel %vm911_vm4, %v2133_v0, %v2135_v30  ;;  %v2848_v37 = vmul.f32 %v2845_v15, %v4308_v55  ;;  %s5230_s19 = sld [smem:[#allocation4 + $0x88]] }
 0x256   : > { %2705 = vrot.lane.b32.xlu1 %v2702_v11, %s4030_s21  ;;  %2726 = vrot.lane.b32.xlu0 %v2723_v34, %s4031_s28  ;;  %v2725_v11 = vsel %vm851_vm3, %v2722_v17, %v2724_v50  ;;  %v5091_v0 = vmul.f32 %v2845_v15, %v4199_v8  ;;  %v2218_v50 = vstv %s3805_s22  ;;  %s3864_s22 = sld [smem:[#allocation4 + $0x8e]] }
 0x257   : > { %v2123_v24 = vadd.f32 %v4970_v7, %v2102_v41  ;;  %v2814_v41 = vstv %s5066_s17  ;;  %v2855_v30 = vrot.slane %v2848_v37, 2  ;;  %s3861_s17 = sld [smem:[#allocation4 + $0x8b]] }
 0x258   : > { %v2117_v38 = vpop.permute.xlu1 %2116  ;;  %v2155_v32 = vpop.permute.xlu0 %2154  ;;  %v2815_v21 = vmul.f32 %v2814_v41, %v4262_v58 }
 0x259   : > { %v2122_v22 = vadd.f32 %v2117_v38, %v2101_v28  ;;  %2787 = vrot.lane.b32.xlu2 %v2784_v57, %s4031_s28  ;;  %v2763_v28 = vsel %vm911_vm4, %v2760_v35, %v2762_v43  ;;  %v2140_v19 = vadd.f32 %v2136_v62, %v2123_v24 }
 0x25b   : > { %v2139_v7 = vadd.f32 %v2134_v9, %v2122_v22  ;;  %v5076_v45 = vpop.permute.xlu2 %2327  ;;  %v2800_v22 = vstv %s5074_s20  ;;  %v2219_v9 = vmul.f32 %v2218_v50, %v4262_v58  ;;  %s3823_s20 = sld [smem:[#allocation4 + $0x66]] }
 0x25c   : > { %v2801_v43 = vmul.f32 %v2800_v22, %v4262_v58 }
 0x25d   : > { %v2160_v36 = vadd.f32 %v2155_v32, %v2139_v7  ;;  %v2780_v32 = vrot.slane %v2774_v18, 4  ;;  %v2853_v18 = vrot.slane %v5091_v0, 2 }
 0x25e   : > { %2728 = vrot.lane.b32.xlu1 %v2725_v11, %s4031_s28  ;;  %2766 = vrot.lane.b32.xlu0 %v2763_v28, %s4030_s21  ;;  %v2185_v11 = vmul.f32 %v2184_v59, %v4262_v58  ;;  %v2220_v28 = vmul.f32 %v2218_v50, %v4199_v8 }
 0x25f   : > { %v2181_v34 = vadd.f32 %v4989_v31, %v2160_v36  ;;  %v2186_v31 = vmul.f32 %v2184_v59, %v4199_v8  ;;  %v2782_v36 = vsel %vm911_vm4, %v2780_v32, %v2781_v53  ;;  %v2856_v53 = vsel %vm851_vm3, %v2853_v18, %v2855_v30 }
 0x260   : > { %v2157_v17 = vpop.permute.xlu1 %2156  ;;  %v2178_v35 = vpop.permute.xlu0 %2177  ;;  %v2226_v32 = vrot.slane %v2220_v28, 2 }
 0x261   : > { %v2161_v38 = vadd.f32 %v2157_v17, %v2140_v19  ;;  %2819 = vrot.lane.b32.xlu2 %v2815_v21, %s4031_s28  ;;  %v2187_v62 = vadd.f32 %v2185_v11, %v2181_v34  ;;  %v2904_v21 = vstv %s3846_s23  ;;  %s3862_s23 = sld [smem:[#allocation4 + $0x8c]] }
 0x262   : > { %v2905_v59 = vmul.f32 %v2904_v21, %v4262_v58  ;;  %v5111_v34 = vmul.f32 %v2904_v21, %v4199_v8 }
 0x263   : > { %v2182_v57 = vadd.f32 %v2178_v35, %v2161_v38  ;;  %v5094_v24 = vpop.permute.xlu2 %2349  ;;  %v2225_v35 = vrot.slane %v2219_v9, 2 }
 0x264   : > { %v2911_v30 = vrot.slane %v2905_v59, 4 }
 0x265   : > { %v2188_v7 = vadd.f32 %v2186_v31, %v2182_v57  ;;  %v2221_v31 = vmul.f32 %v2218_v50, %v4308_v55  ;;  %v2802_v57 = vmul.f32 %v2800_v22, %v4199_v8  ;;  %v2227_v9 = vsel %vm851_vm3, %v2225_v35, %v2226_v32 }
 0x266   : > { %2785 = vrot.lane.b32.xlu1 %v2782_v36, %s4031_s28  ;;  %2805 = vrot.lane.b32.xlu0 %v2801_v43, %s4030_s21  ;;  %v2816_v43 = vmul.f32 %v2814_v41, %v4199_v8  ;;  %v2866_v36 = vstv %s3844_s25  ;;  %s3827_s25 = sld [smem:[#allocation4 + $0x6a]] }
 0x267   : > { %v2202_v19 = vadd.f32 %v5014_v60, %v2188_v7  ;;  %v2846_v7 = vmul.f32 %v2845_v15, %v4262_v58  ;;  %v2867_v28 = vmul.f32 %v2866_v36, %v4262_v58  ;;  %v2228_v50 = vrot.slane %v2221_v31, 2 }
 0x268   : > { %v2196_v17 = vpop.permute.xlu1 %2195  ;;  %v2210_v37 = vpop.permute.xlu0 %2209  ;;  %v2868_v22 = vmul.f32 %v2866_v36, %v4199_v8 }
 0x269   : > { %v2201_v38 = vadd.f32 %v2196_v17, %v2187_v62  ;;  %2859 = vrot.lane.b32.xlu2 %v2856_v53, %s4030_s21  ;;  %v2912_v62 = vrot.slane %v5111_v34, 4  ;;  %v2925_v17 = vstv %s3847_s27  ;;  %v2852_v53 = vrot.slane %v2846_v7, 2  ;;  %s5269_s27 = sld [smem:[#allocation4]] }
 0x26a   : > { %v2928_v59 = vmul.f32 %v2925_v17, %v4308_v55  ;;  %v2229_v31 = vsel %vm851_vm3, %v2226_v32, %v2228_v50  ;;  %v2907_v32 = vmul.f32 %v2904_v21, %v4308_v55 }
 0x26b   : > { %v2215_v60 = vadd.f32 %v2210_v37, %v2201_v38  ;;  %v5113_v0 = vpop.permute.xlu2 %2399  ;;  %v2913_v15 = vsel %vm911_vm4, %v2911_v30, %v2912_v62  ;;  %v2854_v30 = vsel %vm851_vm3, %v2852_v53, %v2853_v18 }
 0x26d   : > { %v2232_v11 = vadd.f32 %v2227_v9, %v2215_v60  ;;  %v2873_v60 = vrot.slane %v2867_v28, 2 }
 0x26e   : > { %2807 = vrot.lane.b32.xlu1 %v2802_v57, %s4030_s21  ;;  %2821 = vrot.lane.b32.xlu0 %v2816_v43, %s4031_s28  ;;  %v2277_v57 = vstv %s3808_s29  ;;  %v5131_v43 = vmul.f32 %v2925_v17, %v4199_v8  ;;  %s5273_s29 = sld [smem:[#allocation4 + $0x3]] }
 0x26f   : > { %v2253_v41 = vadd.f32 %v5035_v2, %v2232_v11  ;;  %v2278_v34 = vmul.f32 %v2277_v57, %v4262_v58  ;;  %v2874_v11 = vrot.slane %v2868_v22, 2  ;;  %v2279_v7 = vmul.f32 %v2277_v57, %v4199_v8 }
 0x270   : > { %v2212_v35 = vpop.permute.xlu1 %2211  ;;  %v2250_v37 = vpop.permute.xlu0 %2249  ;;  %v2280_v22 = vmul.f32 %v2277_v57, %v4308_v55 }
 0x271   : > { %v2216_v38 = vadd.f32 %v2212_v35, %v2202_v19  ;;  %2916 = vrot.lane.b32.xlu2 %v2913_v15, %s4030_s21  ;;  %v2935_v19 = vrot.slane %v2928_v59, 4  ;;  %v2875_v28 = vsel %vm851_vm3, %v2873_v60, %v2874_v11  ;;  %v2869_v15 = vmul.f32 %v2866_v36, %v4308_v55 }
 0x272   : > { %v2284_v50 = vrot.slane %v2278_v34, 4  ;;  %v2285_v53 = vrot.slane %v2279_v7, 4  ;;  %v2287_v34 = vrot.slane %v2280_v22, 4  ;;  %v2926_v7 = vmul.f32 %v2925_v17, %v4262_v58 }
 0x273   : > { %v2233_v2 = vadd.f32 %v2229_v31, %v2216_v38  ;;  %v5133_v9 = vpop.permute.xlu2 %2422  ;;  %v2933_v38 = vrot.slane %v5131_v43, 4  ;;  %v2876_v60 = vrot.slane %v2869_v15, 2  ;;  %v2914_v31 = vrot.slane %v2907_v32, 4 }
 0x274   : > { %v2286_v57 = vsel %vm911_vm4, %v2284_v50, %v2285_v53  ;;  %v2997_v50 = vstv %s3852_s8  ;;  %v2336_v22 = vstv %s5148_s9  ;;  %s5287_s8 = sld [smem:[#allocation4 + $0x6b]] }
 0x275   : > { %v2254_v35 = vadd.f32 %v2250_v37, %v2233_v2  ;;  %v2936_v36 = vsel %vm911_vm4, %v2933_v38, %v2935_v19  ;;  %v2288_v19 = vsel %vm911_vm4, %v2285_v53, %v2287_v34  ;;  %v3000_v17 = vmul.f32 %v2997_v50, %v4276_v63  ;;  %s5293_s9 = sld [smem:[#allocation4 + $0x6c]] }
 0x276   : > { %2857 = vrot.lane.b32.xlu1 %v2854_v30, %s4030_s21  ;;  %2878 = vrot.lane.b32.xlu0 %v2875_v28, %s4031_s28  ;;  %v2877_v30 = vsel %vm851_vm3, %v2874_v11, %v2876_v60  ;;  %v5169_v53 = vmul.f32 %v2997_v50, %v4211_v14  ;;  %v2370_v60 = vstv %s3814_s11  ;;  %s5304_s11 = sld [smem:[#allocation4 + $0x6]] }
 0x277   : > { %v2275_v18 = vadd.f32 %v5055_v51, %v2254_v35  ;;  %v2966_v35 = vstv %s5144_s30  ;;  %v3007_v34 = vrot.slane %v3000_v17, 2  ;;  %s5280_s30 = sld [smem:[#allocation6]] }
 0x278   : > { %v2269_v37 = vpop.permute.xlu1 %2268  ;;  %v2307_v59 = vpop.permute.xlu0 %2306  ;;  %v2967_v32 = vmul.f32 %v2966_v35, %v4272_v3 }
 0x279   : > { %v2274_v21 = vadd.f32 %v2269_v37, %v2253_v41  ;;  %2939 = vrot.lane.b32.xlu2 %v2936_v36, %s4031_s28  ;;  %v2915_v41 = vsel %vm911_vm4, %v2912_v62, %v2914_v31  ;;  %v2292_v15 = vadd.f32 %v2288_v19, %v2275_v18 }
 0x27b   : > { %v2291_v51 = vadd.f32 %v2286_v57, %v2274_v21  ;;  %v5154_v43 = vpop.permute.xlu2 %2479  ;;  %v2952_v21 = vstv %s5152_s10  ;;  %v2371_v57 = vmul.f32 %v2370_v60, %v4272_v3  ;;  %s5302_s10 = sld [smem:[#allocation4 + $0x8f]] }
 0x27c   : > { %v2953_v31 = vmul.f32 %v2952_v21, %v4272_v3 }
 0x27d   : > { %v2312_v2 = vadd.f32 %v2307_v59, %v2291_v51  ;;  %v2932_v59 = vrot.slane %v2926_v7, 4  ;;  %v3005_v7 = vrot.slane %v5169_v53, 2 }
 0x27e   : > { %2880 = vrot.lane.b32.xlu1 %v2877_v30, %s4031_s28  ;;  %2918 = vrot.lane.b32.xlu0 %v2915_v41, %s4030_s21  ;;  %v2337_v30 = vmul.f32 %v2336_v22, %v4272_v3  ;;  %v2372_v41 = vmul.f32 %v2370_v60, %v4211_v14 }
 0x27f   : > { %v2333_v28 = vadd.f32 %v5076_v45, %v2312_v2  ;;  %v2338_v45 = vmul.f32 %v2336_v22, %v4211_v14  ;;  %v2934_v2 = vsel %vm911_vm4, %v2932_v59, %v2933_v38  ;;  %v3008_v38 = vsel %vm851_vm3, %v3005_v7, %v3007_v34 }
 0x280   : > { %v2309_v11 = vpop.permute.xlu1 %2308  ;;  %v2330_v62 = vpop.permute.xlu0 %2329  ;;  %v2378_v59 = vrot.slane %v2372_v41, 2 }
 0x281   : > { %v2313_v37 = vadd.f32 %v2309_v11, %v2292_v15  ;;  %2971 = vrot.lane.b32.xlu2 %v2967_v32, %s4031_s28  ;;  %v2339_v19 = vadd.f32 %v2337_v30, %v2333_v28  ;;  %v3056_v32 = vstv %s3855_s12  ;;  %s5312_s12 = sld [smem:[#allocation6 + $0x3]] }
 0x282   : > { %v3057_v22 = vmul.f32 %v3056_v32, %v4272_v3  ;;  %v5189_v28 = vmul.f32 %v3056_v32, %v4211_v14 }
 0x283   : > { %v2334_v36 = vadd.f32 %v2330_v62, %v2313_v37  ;;  %v5172_v18 = vpop.permute.xlu2 %2501  ;;  %v2377_v62 = vrot.slane %v2371_v57, 2 }
 0x284   : > { %v3063_v34 = vrot.slane %v3057_v22, 4 }
 0x285   : > { %v2340_v51 = vadd.f32 %v2338_v45, %v2334_v36  ;;  %v2373_v45 = vmul.f32 %v2370_v60, %v4276_v63  ;;  %v2954_v36 = vmul.f32 %v2952_v21, %v4211_v14  ;;  %v2379_v57 = vsel %vm851_vm3, %v2377_v62, %v2378_v59 }
 0x286   : > { %2937 = vrot.lane.b32.xlu1 %v2934_v2, %s4031_s28  ;;  %2957 = vrot.lane.b32.xlu0 %v2953_v31, %s4030_s21  ;;  %v2968_v31 = vmul.f32 %v2966_v35, %v4211_v14  ;;  %v3018_v2 = vstv %s3853_s13  ;;  %s5324_s13 = sld [smem:[#allocation4 + $0x6f]] }
 0x287   : > { %v2354_v15 = vadd.f32 %v5094_v24, %v2340_v51  ;;  %v2998_v51 = vmul.f32 %v2997_v50, %v4272_v3  ;;  %v3019_v41 = vmul.f32 %v3018_v2, %v4272_v3  ;;  %v2380_v60 = vrot.slane %v2373_v45, 2 }
 0x288   : > { %v2348_v11 = vpop.permute.xlu1 %2347  ;;  %v2362_v17 = vpop.permute.xlu0 %2361  ;;  %v3020_v21 = vmul.f32 %v3018_v2, %v4211_v14 }
 0x289   : > { %v2353_v37 = vadd.f32 %v2348_v11, %v2339_v19  ;;  %3011 = vrot.lane.b32.xlu2 %v3008_v38, %s4030_s21  ;;  %v3064_v19 = vrot.slane %v5189_v28, 4  ;;  %v3077_v11 = vstv %s3856_s14  ;;  %v3004_v38 = vrot.slane %v2998_v51, 2  ;;  %s5361_s14 = sld [smem:[#allocation4 + $0x72]] }
 0x28a   : > { %v3080_v22 = vmul.f32 %v3077_v11, %v4276_v63  ;;  %v2381_v45 = vsel %vm851_vm3, %v2378_v59, %v2380_v60  ;;  %v3059_v59 = vmul.f32 %v3056_v32, %v4276_v63 }
 0x28b   : > { %v2367_v24 = vadd.f32 %v2362_v17, %v2353_v37  ;;  %v5191_v53 = vpop.permute.xlu2 %2551  ;;  %v3065_v50 = vsel %vm911_vm4, %v3063_v34, %v3064_v19  ;;  %v3006_v34 = vsel %vm851_vm3, %v3004_v38, %v3005_v7 }
 0x28d   : > { %v2384_v30 = vadd.f32 %v2379_v57, %v2367_v24  ;;  %v3025_v24 = vrot.slane %v3019_v41, 2 }
 0x28e   : > { %2959 = vrot.lane.b32.xlu1 %v2954_v36, %s4030_s21  ;;  %2973 = vrot.lane.b32.xlu0 %v2968_v31, %s4031_s28  ;;  %v2429_v36 = vstv %s3817_s15  ;;  %v5209_v31 = vmul.f32 %v3077_v11, %v4211_v14  ;;  %s3731_s15 = sld [smem:[#allocation4 + $0xc]] }
 0x28f   : > { %v2405_v35 = vadd.f32 %v5113_v0, %v2384_v30  ;;  %v2430_v28 = vmul.f32 %v2429_v36, %v4272_v3  ;;  %v3026_v30 = vrot.slane %v3020_v21, 2  ;;  %v2431_v51 = vmul.f32 %v2429_v36, %v4211_v14 }
 0x290   : > { %v2364_v62 = vpop.permute.xlu1 %2363  ;;  %v2402_v17 = vpop.permute.xlu0 %2401  ;;  %v2432_v21 = vmul.f32 %v2429_v36, %v4276_v63 }
 0x291   : > { %v2368_v37 = vadd.f32 %v2364_v62, %v2354_v15  ;;  %3068 = vrot.lane.b32.xlu2 %v3065_v50, %s4030_s21  ;;  %v3087_v15 = vrot.slane %v3080_v22, 4  ;;  %v3027_v41 = vsel %vm851_vm3, %v3025_v24, %v3026_v30  ;;  %v3021_v50 = vmul.f32 %v3018_v2, %v4276_v63 }
 0x292   : > { %v2436_v60 = vrot.slane %v2430_v28, 4  ;;  %v2437_v38 = vrot.slane %v2431_v51, 4  ;;  %v2439_v28 = vrot.slane %v2432_v21, 4  ;;  %v3078_v51 = vmul.f32 %v3077_v11, %v4272_v3 }
 0x293   : > { %v2385_v0 = vadd.f32 %v2381_v45, %v2368_v37  ;;  %v5211_v57 = vpop.permute.xlu2 %2574  ;;  %v3085_v37 = vrot.slane %v5209_v31, 4  ;;  %v3028_v24 = vrot.slane %v3021_v50, 2  ;;  %v3066_v45 = vrot.slane %v3059_v59, 4 }
 0x294   : > { %v2438_v36 = vsel %vm911_vm4, %v2436_v60, %v2437_v38  ;;  %v3149_v60 = vstv %s3861_s17  ;;  %v2488_v21 = vstv %s5226_s18  ;;  %s3734_s17 = sld [smem:[#allocation4 + $0xf]] }
 0x295   : > { %v2406_v62 = vadd.f32 %v2402_v17, %v2385_v0  ;;  %v3088_v2 = vsel %vm911_vm4, %v3085_v37, %v3087_v15  ;;  %v2440_v15 = vsel %vm911_vm4, %v2437_v38, %v2439_v28  ;;  %v3152_v11 = vmul.f32 %v3149_v60, %v4302_v26  ;;  %s3845_s18 = sld [smem:[#allocation4 + $0x7b]] }
 0x296   : > { %3009 = vrot.lane.b32.xlu1 %v3006_v34, %s4030_s21  ;;  %3030 = vrot.lane.b32.xlu0 %v3027_v41, %s4031_s28  ;;  %v3029_v34 = vsel %vm851_vm3, %v3026_v30, %v3028_v24  ;;  %v5247_v38 = vmul.f32 %v3149_v60, %v4217_v20  ;;  %v2522_v24 = vstv %s3823_s20  ;;  %s3740_s20 = sld [smem:[#allocation4 + $0x15]] }
 0x297   : > { %v2427_v7 = vadd.f32 %v5133_v9, %v2406_v62  ;;  %v3118_v62 = vstv %s5222_s16  ;;  %v3159_v28 = vrot.slane %v3152_v11, 2  ;;  %s3842_s16 = sld [smem:[#allocation4 + $0x78]] }
 0x298   : > { %v2421_v17 = vpop.permute.xlu1 %2420  ;;  %v2459_v22 = vpop.permute.xlu0 %2458  ;;  %v3119_v59 = vmul.f32 %v3118_v62, %v4298_v25 }
 0x299   : > { %v2426_v32 = vadd.f32 %v2421_v17, %v2405_v35  ;;  %3091 = vrot.lane.b32.xlu2 %v3088_v2, %s4031_s28  ;;  %v3067_v35 = vsel %vm911_vm4, %v3064_v19, %v3066_v45  ;;  %v2444_v50 = vadd.f32 %v2440_v15, %v2427_v7 }
 0x29b   : > { %v2443_v9 = vadd.f32 %v2438_v36, %v2426_v32  ;;  %v5232_v31 = vpop.permute.xlu2 %2667  ;;  %v3104_v32 = vstv %s5230_s19  ;;  %v2523_v36 = vmul.f32 %v2522_v24, %v4298_v25  ;;  %s5452_s19 = sld [smem:[#allocation4 + $0x12]] }
 0x29c   : > { %v3105_v45 = vmul.f32 %v3104_v32, %v4298_v25 }
 0x29d   : > { %v2464_v0 = vadd.f32 %v2459_v22, %v2443_v9  ;;  %v3084_v22 = vrot.slane %v3078_v51, 4  ;;  %v3157_v51 = vrot.slane %v5247_v38, 2 }
 0x29e   : > { %3032 = vrot.lane.b32.xlu1 %v3029_v34, %s4031_s28  ;;  %3070 = vrot.lane.b32.xlu0 %v3067_v35, %s4030_s21  ;;  %v2489_v34 = vmul.f32 %v2488_v21, %v4298_v25  ;;  %v2524_v35 = vmul.f32 %v2522_v24, %v4217_v20 }
 0x29f   : > { %v2485_v41 = vadd.f32 %v5154_v43, %v2464_v0  ;;  %v2490_v43 = vmul.f32 %v2488_v21, %v4217_v20  ;;  %v3086_v0 = vsel %vm911_vm4, %v3084_v22, %v3085_v37  ;;  %v3160_v37 = vsel %vm851_vm3, %v3157_v51, %v3159_v28 }
 0x2a0   : > { %v2461_v30 = vpop.permute.xlu1 %2460  ;;  %v2482_v19 = vpop.permute.xlu0 %2481  ;;  %v2530_v22 = vrot.slane %v2524_v35, 2  ;;  %v3150_v28 = vmul.f32 %v3149_v60, %v4298_v25 }
 0x2a1   : > { %v2465_v17 = vadd.f32 %v2461_v30, %v2444_v50  ;;  %3123 = vrot.lane.b32.xlu2 %v3119_v59, %s4031_s28  ;;  %v2491_v15 = vadd.f32 %v2489_v34, %v2485_v41  ;;  %v3208_v59 = vstv %s3864_s22  ;;  %v3106_v41 = vmul.f32 %v3104_v32, %v4217_v20  ;;  %s5459_s22 = sld [smem:[#allocation4 + $0x7e]] }
 0x2a2   : > { %v3209_v21 = vmul.f32 %v3208_v59, %v4298_v25  ;;  %v5267_v38 = vmul.f32 %v3208_v59, %v4217_v20 }
 0x2a3   : > { %v2486_v2 = vadd.f32 %v2482_v19, %v2465_v17  ;;  %v5250_v7 = vpop.permute.xlu2 %2707  ;;  %v2529_v19 = vrot.slane %v2523_v36, 2 }
 0x2a4   : > { %v3215_v36 = vrot.slane %v3209_v21, 4  ;;  %v3216_v32 = vrot.slane %v5267_v38, 4 }
 0x2a5   : > { %v2492_v9 = vadd.f32 %v2490_v43, %v2486_v2  ;;  %v2525_v43 = vmul.f32 %v2522_v24, %v4302_v26  ;;  %v3120_v2 = vmul.f32 %v3118_v62, %v4217_v20 }
 0x2a6   : > { %3089 = vrot.lane.b32.xlu1 %v3086_v0, %s4031_s28  ;;  %3109 = vrot.lane.b32.xlu0 %v3105_v45, %s4030_s21  ;;  %v2531_v45 = vsel %vm851_vm3, %v2529_v19, %v2530_v22 }
 0x2a7   : > { %v2506_v50 = vadd.f32 %v5172_v18, %v2492_v9  ;;  %v3170_v9 = vstv %s3862_s23  ;;  %v2532_v62 = vrot.slane %v2525_v43, 2  ;;  %s3851_s23 = sld [smem:[#allocation4 + $0x81]] }
 0x2a8   : > { %v2500_v30 = vpop.permute.xlu1 %2499  ;;  %v2514_v11 = vpop.permute.xlu0 %2513  ;;  %v3171_v34 = vmul.f32 %v3170_v9, %v4298_v25  ;;  %v3172_v35 = vmul.f32 %v3170_v9, %v4217_v20 }
 0x2a9   : > { %v2505_v17 = vadd.f32 %v2500_v30, %v2491_v15  ;;  %3163 = vrot.lane.b32.xlu2 %v3160_v37, %s4030_s21  ;;  %v2598_v15 = vstv %s3827_s25  ;;  %v3156_v37 = vrot.slane %v3150_v28, 2  ;;  %v2533_v38 = vsel %vm851_vm3, %v2530_v22, %v2532_v62  ;;  %s3743_s25 = sld [smem:[#allocation4 + $0x18]] }
 0x2aa   : > { %v2601_v21 = vmul.f32 %v2598_v15, %v4302_v26  ;;  %v3177_v43 = vrot.slane %v3171_v34, 2  ;;  %v3173_v34 = vmul.f32 %v3170_v9, %v4302_v26  ;;  %v3211_v62 = vmul.f32 %v3208_v59, %v4302_v26 }
 0x2ab   : > { %v2519_v18 = vadd.f32 %v2514_v11, %v2505_v17  ;;  %v5277_v24 = vpop.permute.xlu2 %2764  ;;  %v3217_v11 = vsel %vm911_vm4, %v3215_v36, %v3216_v32  ;;  %v844_v36 = vstv %s5273_s29  ;;  %v3158_v28 = vsel %vm851_vm3, %v3156_v37, %v3157_v51  ;;  %s5504_s29 = sld [smem:[#allocation4 + $0x1b]] }
 0x2ac   : > { %v2619_v59 = vstv %s5287_s8  ;;  %s5511_s8 = sld [smem:[#allocation4 + $0x87]] }
 0x2ad   : > { %v2536_v0 = vadd.f32 %v2531_v45, %v2519_v18  ;;  %v810_v18 = vstv %s5269_s27  ;;  %s3854_s27 = sld [smem:[#allocation4 + $0x84]] }
 0x2ae   : > { %3111 = vrot.lane.b32.xlu1 %v3106_v41, %s4030_s21  ;;  %3125 = vrot.lane.b32.xlu0 %v3120_v2, %s4031_s28  ;;  %v3178_v2 = vrot.slane %v3172_v35, 2  ;;  %v811_v45 = vmul.f32 %v810_v18, %v4222_v23  ;;  %v812_v35 = vmul.f32 %v810_v18, %v4188_v1  ;;  %v2620_v18 = vmul.f32 %v2619_v59, %v4298_v25 }
 0x2af   : > { %v2557_v60 = vadd.f32 %v5191_v53, %v2536_v0  ;;  %v5296_v53 = vmul.f32 %v2598_v15, %v4217_v20 }
 0x2b0   : > { %v2516_v30 = vpop.permute.xlu1 %2515  ;;  %v2554_v19 = vpop.permute.xlu0 %2553  ;;  %v3179_v0 = vsel %vm851_vm3, %v3177_v43, %v3178_v2 }
 0x2b1   : > { %v2520_v17 = vadd.f32 %v2516_v30, %v2506_v50  ;;  %3220 = vrot.lane.b32.xlu2 %v3217_v11, %s4030_s21  ;;  %v2608_v50 = vrot.slane %v2601_v21, 4  ;;  %v808_v30 = vstv %s5280_s30  ;;  %v5636_v51 = vrot.slane %v5296_v53, 4  ;;  %s3749_s30 = sld [smem:[#allocation4 + $0x1e]] }
 0x2b2   : > { %v5317_v11 = vmul.f32 %v844_v36, %v4188_v1  ;;  %v813_v37 = vadd.f32 %v811_v45, %v808_v30  ;;  %v845_v21 = vmul.f32 %v844_v36, %v4222_v23 }
 0x2b3   : > { %v2537_v41 = vadd.f32 %v2533_v38, %v2520_v17  ;;  %v5322_v9 = vpop.permute.xlu2 %2787  ;;  %v2609_v38 = vsel %vm911_vm4, %v5636_v51, %v2608_v50  ;;  %v3229_v51 = vstv %s5302_s10  ;;  %s3752_s10 = sld [smem:[#allocation4 + $0x21]] }
 0x2b4   : > { %v827_v45 = vadd.f32 %v4439_v54, %v813_v37  ;;  %v852_v50 = vrot.slane %v845_v21, 2  ;;  %v2599_v54 = vmul.f32 %v2598_v15, %v4298_v25  ;;  %v3230_v37 = vmul.f32 %v3229_v51, %v4298_v25 }
 0x2b5   : > { %v2558_v22 = vadd.f32 %v2554_v19, %v2537_v41  ;;  %v904_v21 = vstv %s5304_s11  ;;  %s3863_s11 = sld [smem:[#allocation4 + $0x8d]] }
 0x2b6   : > { %3161 = vrot.lane.b32.xlu1 %v3158_v28, %s4030_s21  ;;  %3182 = vrot.lane.b32.xlu0 %v3179_v0, %s4031_s28  ;;  %v3218_v28 = vrot.slane %v3211_v62, 4  ;;  %v5338_v0 = vmul.f32 %v2619_v59, %v4217_v20  ;;  %v906_v25 = vmul.f32 %v904_v21, %v4188_v1 }
 0x2b7   : > { %v5320_v19 = vadd.f32 %v5211_v57, %v2558_v22  ;;  %v3180_v57 = vrot.slane %v3173_v34, 2  ;;  %v2642_v22 = vstv %s5293_s9  ;;  %s3860_s9 = sld [smem:[#allocation4 + $0x8a]] }
 0x2b8   : > { %v2573_v17 = vpop.permute.xlu1 %2572  ;;  %v2654_v43 = vpop.permute.xlu0 %2653  ;;  %v2643_v33 = vmul.f32 %v2642_v22, %v4222_v23  ;;  %v3219_v62 = vsel %vm911_vm4, %v3216_v32, %v3218_v28  ;;  %v3231_v32 = vmul.f32 %v3229_v51, %v4217_v20  ;;  %v2644_v14 = vmul.f32 %v2642_v22, %v4188_v1 }
 0x2b9   : > { %5682 = vst [vmem:[#allocation44_spill] sm:$0xff] %v5320_v19  ;;  %v5332_v41 = vadd.f32 %v2573_v17, %v2557_v60  ;;  %2612 = vrot.lane.b32.xlu2 %v2609_v38, %s4030_s21  ;;  %v814_v19 = vadd.f32 %v812_v35, %v808_v30  ;;  %v853_v60 = vrot.slane %v5317_v11, 2  ;;  %v2626_v17 = vrot.slane %v2620_v18, 4 }
 0x2ba   : > { %v3181_v34 = vsel %vm851_vm3, %v3178_v2, %v3180_v57  ;;  %v841_v38 = vadd.f32 %v4441_v56, %v827_v45  ;;  %v847_v30 = vmul.f32 %v844_v36, %v4245_v40  ;;  %v2640_v35 = vstv %s5312_s12  ;;  %s3826_s12 = sld [smem:[#allocation4 + $0x69]] }
 0x2bb   : > { %5683 = vst [vmem:[#allocation45_spill] sm:$0xff] %v5332_v41  ;;  %v5643_v11 = vrot.slane %v5338_v0, 4  ;;  %v2645_v18 = vadd.f32 %v2643_v33, %v2640_v35  ;;  %v2676_v2 = vstv %s5324_s13  ;;  %v854_v15 = vsel %vm851_vm3, %v852_v50, %v853_v60  ;;  %s4034_s13 = smov 32  }
 0x2bc   : > { %v2677_v36 = vmul.f32 %v2676_v2, %v4222_v23  ;;  %v828_v45 = vadd.f32 %v4381_v49, %v814_v19  ;;  %v2605_v33 = vrot.slane %v2599_v54, 4  ;;  %v3236_v41 = vrot.slane %v3230_v37, 4 }
 0x2bd   : > { %v2628_v56 = vsel %vm911_vm4, %v2626_v17, %v5643_v11  ;;  %v859_v50 = vadd.f32 %v854_v15, %v841_v38  ;;  %v855_v20 = vrot.slane %v847_v30, 2  ;;  %v2678_v63 = vmul.f32 %v2676_v2, %v4188_v1 }
 0x2be   : > { %3184 = vrot.lane.b32.xlu1 %v3181_v34, %s4031_s28  ;;  %3222 = vrot.lane.b32.xlu0 %v3219_v62, %s4030_s21  ;;  %v2659_v34 = vadd.f32 %v2654_v43, %v2645_v18  ;;  %v5364_v62 = vpop.permute.xlu2 %2819  ;;  %v842_v17 = vadd.f32 %v4454_v44, %v828_v45  ;;  %v905_v11 = vmul.f32 %v904_v21, %v4222_v23  ;;  %v3237_v49 = vrot.slane %v3231_v32, 4 }
 0x2bf   : > { %v2683_v19 = vrot.slane %v2677_v36, 2  ;;  %v3232_v43 = vmul.f32 %v3229_v51, %v4302_v26  ;;  %v5684_v54 = vrot.slane %v5296_v53, 4  ;;  %v2622_v30 = vmul.f32 %v2619_v59, %v4302_v26 }
 0x2c0   : > { %v2656_v57 = vpop.permute.xlu1 %2655  ;;  %v2670_v28 = vpop.permute.xlu0 %2669  ;;  %v2673_v18 = vadd.f32 %v5232_v31, %v2659_v34  ;;  %v3238_v38 = vsel %vm911_vm4, %v3236_v41, %v3237_v49  ;;  %v856_v44 = vsel %vm851_vm3, %v853_v60, %v855_v20  ;;  %v880_v15 = vadd.f32 %v4405_v16, %v859_v50 }
 0x2c1   : > { %2631 = vrot.lane.b32.xlu2 %v2628_v56, %s4031_s28  ;;  %v2607_v37 = vsel %vm911_vm4, %v2605_v33, %v5684_v54  ;;  %v2684_v22 = vrot.slane %v2678_v63, 2  ;;  %v860_v51 = vadd.f32 %v856_v44, %v842_v17  ;;  %v912_v31 = vrot.slane %v905_v11, 4 }
 0x2c2   : > { %v913_v32 = vrot.slane %v906_v25, 4  ;;  %v2646_v53 = vadd.f32 %v2644_v14, %v2640_v35  ;;  %v901_v56 = vadd.f32 %v4489_v47, %v880_v15  ;;  %v2679_v36 = vmul.f32 %v2676_v2, %v4245_v40 }
 0x2c3   : > { %v2685_v41 = vsel %vm851_vm3, %v2683_v19, %v2684_v22  ;;  %v2735_v45 = vstv %s5361_s14  ;;  %v3239_v63 = vrot.slane %v3232_v43, 4  ;;  %v2629_v34 = vrot.slane %v2622_v30, 4  ;;  %s4035_s14 = smov 16  }
 0x2c4   : > { %v2660_v60 = vadd.f32 %v2656_v57, %v2646_v53  ;;  %v2690_v16 = vadd.f32 %v2685_v41, %v2673_v18  ;;  %v907_v33 = vmul.f32 %v904_v21, %v4245_v40  ;;  %v2736_v50 = vmul.f32 %v2735_v45, %v4222_v23 }
 0x2c5   : > { %v881_v25 = vadd.f32 %v4472_v27, %v860_v51  ;;  %v914_v14 = vsel %vm911_vm4, %v912_v31, %v913_v32  ;;  %v2686_v2 = vrot.slane %v2679_v36, 2  ;;  %v2737_v17 = vmul.f32 %v2735_v45, %v4188_v1 }
 0x2c6   : > { %2610 = vrot.lane.b32.xlu1 %v2607_v37, %s4030_s21  ;;  %3241 = vrot.lane.b32.xlu0 %v3238_v38, %s4031_s28  ;;  %v5391_v47 = vpop.permute.xlu2 %2859  ;;  %v919_v11 = vadd.f32 %v914_v14, %v901_v56  ;;  %s5394_s21 = sld [smem:[#allocation4 + $0x9]]  ;;  %v2674_v57 = vadd.f32 %v2670_v28, %v2660_v60  ;;  %v3240_v19 = vsel %vm911_vm4, %v3237_v49, %v3239_v63  ;;  %v5685_v21 = vrot.slane %v5338_v0, 4 }
 0x2c7   : > { %v915_v43 = vrot.slane %v907_v33, 4  ;;  %v2742_v27 = vrot.slane %v2736_v50, 4  ;;  %v902_v18 = vadd.f32 %v4429_v39, %v881_v25  ;;  %v2687_v28 = vsel %vm851_vm3, %v2684_v22, %v2686_v2 }
 0x2c8   : > { %v2706_v59 = vpop.permute.xlu1 %2705  ;;  %v2727_v20 = vpop.permute.xlu0 %2726  ;;  %v2630_v23 = vsel %vm911_vm4, %v5685_v21, %v2629_v34  ;;  %v940_v1 = vadd.f32 %v4456_v6, %v919_v11  ;;  %v2743_v37 = vrot.slane %v2737_v17, 4  ;;  %v2691_v0 = vadd.f32 %v2687_v28, %v2674_v57 }
 0x2c9   : > { %v2711_v35 = vadd.f32 %v2706_v59, %v2690_v16  ;;  %v916_v30 = vsel %vm911_vm4, %v913_v32, %v915_v43  ;;  %v2738_v15 = vmul.f32 %v2735_v45, %v4245_v40  ;;  %v2828_v57 = vstv %s3842_s16  ;;  %s4039_s16 = smov 96  }
 0x2ca   : > { %v2744_v44 = vsel %vm911_vm4, %v2742_v27, %v2743_v37  ;;  %v920_v39 = vadd.f32 %v916_v30, %v902_v18  ;;  %v961_v31 = vadd.f32 %v4416_v13, %v940_v1  ;;  %v2712_v56 = vadd.f32 %v5250_v7, %v2691_v0 }
 0x2cb   : > { %v2732_v54 = vadd.f32 %v2727_v20, %v2711_v35  ;;  %v2745_v36 = vrot.slane %v2738_v15, 4  ;;  %v2829_v43 = vmul.f32 %v2828_v57, %v4262_v58 }
 0x2cc   : > { %v941_v6 = vadd.f32 %v4505_v10, %v920_v39  ;;  %v964_v22 = vstv %s5394_s21  ;;  %v998_v10 = vstv %s3731_s15  ;;  %s4036_s21 = smov 48   ;;  %s4037_s15 = smov 80  }
 0x2cd   : > { %v2749_v51 = vadd.f32 %v2744_v44, %v2732_v54  ;;  %v965_v32 = vmul.f32 %v964_v22, %v4262_v58  ;;  %v2746_v16 = vsel %vm911_vm4, %v2743_v37, %v2745_v36  ;;  %v999_v34 = vmul.f32 %v998_v10, %v4262_v58 }
 0x2ce   : > { %3243 = vrot.lane.b32.xlu1 %v3240_v19, %s4031_s28  ;;  %2633 = vrot.lane.b32.xlu0 %v2630_v23, %s4031_s28  ;;  %s5408_s28 = sld [smem:[#allocation4 + $0x75]]  ;;  %v5413_v53 = vpop.permute.xlu2 %2916  ;;  %v962_v13 = vadd.f32 %v4491_v48, %v941_v6  ;;  %v966_v7 = vmul.f32 %v964_v22, %v4199_v8  ;;  %v1000_v25 = vmul.f32 %v998_v10, %v4199_v8  ;;  %v1057_v37 = vstv %s3734_s17  ;;  %s4040_s17 = smov 112  }
 0x2cf   : > { %v2770_v40 = vadd.f32 %v5277_v24, %v2749_v51  ;;  %v967_v59 = vadd.f32 %v965_v32, %v961_v31  ;;  %v1005_v48 = vrot.slane %v999_v34, 2  ;;  %v1001_v11 = vmul.f32 %v998_v10, %v4308_v55 }
 0x2d0   : > { %v2729_v49 = vpop.permute.xlu1 %2728  ;;  %v2767_v38 = vpop.permute.xlu0 %2766  ;;  %v968_v14 = vadd.f32 %v966_v7, %v962_v13  ;;  %v1006_v27 = vrot.slane %v1000_v25, 2  ;;  %v2830_v54 = vmul.f32 %v2828_v57, %v4199_v8  ;;  %v2835_v0 = vrot.slane %v2829_v43, 2 }
 0x2d1   : > { %v2733_v41 = vadd.f32 %v2729_v49, %v2712_v56  ;;  %v981_v24 = vadd.f32 %v4470_v46, %v967_v59  ;;  %v1008_v28 = vrot.slane %v1001_v11, 2  ;;  %v1059_v51 = vmul.f32 %v1057_v37, %v4199_v8 }
 0x2d2   : > { %v982_v46 = vadd.f32 %v4395_v5, %v968_v14  ;;  %v1007_v1 = vsel %vm851_vm3, %v1005_v48, %v1006_v27  ;;  %v2836_v15 = vrot.slane %v2830_v54, 2  ;;  %v2887_v59 = vstv %s3845_s18  ;;  %v5688_v54 = vld [vmem:[#allocation20_spill] sm:$0xff]  ;;  %s3872_s18 = sshll.u32 %s5727_s1, 3 }
 0x2d3   : > { %v2750_v33 = vadd.f32 %v2746_v16, %v2733_v41  ;;  %v995_v19 = vadd.f32 %v4507_v52, %v981_v24  ;;  %v1058_v52 = vmul.f32 %v1057_v37, %v4262_v58  ;;  %v1009_v39 = vsel %vm851_vm3, %v1006_v27, %v1008_v28 }
 0x2d4   : > { %v2794_v63 = vstv %s5408_s28  ;;  %v996_v30 = vadd.f32 %v4520_v12, %v982_v46  ;;  %v2837_v56 = vsel %vm851_vm3, %v2835_v0, %v2836_v15  ;;  %v1065_v13 = vrot.slane %v1059_v51, 4  ;;  %s4038_s28 = smov 64  }
 0x2d5   : > { %v2795_v50 = vmul.f32 %v2794_v63, %v4262_v58  ;;  %v2771_v2 = vadd.f32 %v2767_v38, %v2750_v33  ;;  %v1012_v38 = vadd.f32 %v1007_v1, %v995_v19  ;;  %v2796_v5 = vmul.f32 %v2794_v63, %v4199_v8 }
 0x2d6   : > { %v5427_v17 = vpop.permute.xlu2 %2939  ;;  %v1064_v22 = vrot.slane %v1058_v52, 4  ;;  %v1013_v12 = vadd.f32 %v1009_v39, %v996_v30  ;;  %v2889_v16 = vmul.f32 %v2887_v59, %v4199_v8  ;;  %v1116_v28 = vstv %s5452_s19 }
 0x2d7   : > { %v2792_v49 = vadd.f32 %v5322_v9, %v2771_v2  ;;  %v1033_v6 = vadd.f32 %v4446_v61, %v1012_v38  ;;  %v2831_v9 = vmul.f32 %v2828_v57, %v4308_v55  ;;  %v1060_v61 = vmul.f32 %v1057_v37, %v4308_v55 }
 0x2d8   : > { %v2786_v45 = vpop.permute.xlu1 %2785  ;;  %v2806_v20 = vpop.permute.xlu0 %2805  ;;  %v1034_v63 = vadd.f32 %v4522_v29, %v1013_v12  ;;  %v1066_v34 = vsel %vm911_vm4, %v1064_v22, %v1065_v13  ;;  %v2895_v25 = vrot.slane %v2889_v16, 4  ;;  %v5686_v29 = vld [vmem:[#allocation18_spill] sm:$0xff]  ;;  %v2890_v57 = vmul.f32 %v2887_v59, %v4308_v55 }
 0x2d9   : > { %v2791_v60 = vadd.f32 %v2786_v45, %v2770_v40  ;;  %v2798_v31 = vadd.f32 %v2796_v5, %v2792_v49  ;;  %v1054_v45 = vadd.f32 %v4536_v42, %v1033_v6  ;;  %v2838_v10 = vrot.slane %v2831_v9, 2  ;;  %v5691_v9 = vld [vmem:[#allocation10_spill] sm:$0xff] }
 0x2da   : > { %v1067_v42 = vrot.slane %v1060_v61, 4  ;;  %v1055_v48 = vadd.f32 %v4462_v4, %v1034_v63  ;;  %v5687_v4 = vld [vmem:[#allocation14_spill] sm:$0xff]  ;;  %v1117_v49 = vmul.f32 %v1116_v28, %v4272_v3 }
 0x2db   : > { %v2797_v35 = vadd.f32 %v2795_v50, %v2791_v60  ;;  %v1071_v33 = vadd.f32 %v1066_v34, %v1054_v45 }
 0x2dd   : > { %v2811_v18 = vadd.f32 %v2806_v20, %v2797_v35  ;;  %v2888_v20 = vmul.f32 %v2887_v59, %v4262_v58  ;;  %v2839_v58 = vsel %vm851_vm3, %v2836_v15, %v2838_v10  ;;  %v1092_v11 = vadd.f32 %v5686_v29, %v1071_v33  ;;  %v5689_v15 = vld [vmem:[#allocation21_spill] sm:$0xff]  ;;  %v5695_v29 = vld [vmem:[#allocation26_spill] sm:$0xff] }
 0x2de   : > { %v5444_v41 = vpop.permute.xlu2 %2971 }
 0x2df   : > { %v2825_v44 = vadd.f32 %v5364_v62, %v2811_v18  ;;  %v2894_v50 = vrot.slane %v2888_v20, 4  ;;  %v1113_v46 = vadd.f32 %v5687_v4, %v1092_v11  ;;  %v2897_v18 = vrot.slane %v2890_v57, 4 }
 0x2e0   : > { %v2808_v21 = vpop.permute.xlu1 %2807  ;;  %v2822_v23 = vpop.permute.xlu0 %2821 }
 0x2e1   : > { %v2812_v62 = vadd.f32 %v2808_v21, %v2798_v31  ;;  %v2842_v40 = vadd.f32 %v2837_v56, %v2825_v44  ;;  %v2896_v2 = vsel %vm911_vm4, %v2894_v50, %v2895_v25  ;;  %v1119_v30 = vadd.f32 %v1117_v49, %v1113_v46  ;;  %v5696_v46 = vld [vmem:[#allocation16_spill] sm:$0xff] }
 0x2e2   : > { %v1150_v44 = vstv %s3740_s20  ;;  %v2898_v5 = vsel %vm911_vm4, %v2895_v25, %v2897_v18  ;;  %v1118_v56 = vmul.f32 %v1116_v28, %v5691_v9  ;;  %v1209_v25 = vstv %s3743_s25 }
 0x2e3   : > { %v2826_v7 = vadd.f32 %v2822_v23, %v2812_v62  ;;  %v1068_v23 = vsel %vm911_vm4, %v1065_v13, %v1067_v42  ;;  %v1151_v51 = vmul.f32 %v1150_v44, %v4272_v3  ;;  %v5692_v62 = vld [vmem:[#allocation12_spill] sm:$0xff]  ;;  %v2980_v13 = vstv %s3851_s23  ;;  %v5694_v42 = vld [vmem:[#allocation15_spill] sm:$0xff]  ;;  %s3718_s23 = sshll.u32 %s5727_s1, 2 }
 0x2e4   : > { %v1072_v43 = vadd.f32 %v1068_v23, %v1055_v48  ;;  %v2981_v63 = vmul.f32 %v2980_v13, %v4272_v3  ;;  %v2982_v50 = vmul.f32 %v2980_v13, %v5691_v9  ;;  %v1210_v48 = vmul.f32 %v1209_v25, %v4272_v3 }
 0x2e5   : > { %v2843_v8 = vadd.f32 %v2839_v58, %v2826_v7  ;;  %v1157_v45 = vrot.slane %v1151_v51, 2  ;;  %v5698_v51 = vld [vmem:[#allocation27_spill] sm:$0xff] }
 0x2e6   : > { %v5461_v19 = vpop.permute.xlu2 %3011  ;;  %v1093_v1 = vadd.f32 %v5688_v54, %v1072_v43  ;;  %v1211_v43 = vmul.f32 %v1209_v25, %v5691_v9  ;;  %v1216_v18 = vrot.slane %v1210_v48, 4  ;;  %v2983_v54 = vmul.f32 %v2980_v13, %v5692_v62 }
 0x2e7   : > { %v2864_v27 = vadd.f32 %v5391_v47, %v2843_v8  ;;  %v2946_v47 = vstv %s5459_s22  ;;  %v2987_v8 = vrot.slane %v2981_v63, 2  ;;  %s540_s22 = scalar_lea.vmem %s5631_s5, %s3872_s18 }
 0x2e8   : > { %v2858_v32 = vpop.permute.xlu1 %2857  ;;  %v2879_v36 = vpop.permute.xlu0 %2878  ;;  %v1114_v39 = vadd.f32 %v5689_v15, %v1093_v1  ;;  %v2947_v6 = vmul.f32 %v2946_v47, %v4272_v3  ;;  %v2948_v57 = vmul.f32 %v2946_v47, %v5691_v9  ;;  %v1212_v47 = vmul.f32 %v1209_v25, %v5692_v62  ;;  %v5702_v25 = vld [vmem:[#allocation32_spill] sm:$0xff] }
 0x2e9   : > { %v2863_v60 = vadd.f32 %v2858_v32, %v2842_v40  ;;  %v1152_v32 = vmul.f32 %v1150_v44, %v5691_v9  ;;  %v1153_v40 = vmul.f32 %v1150_v44, %v5692_v62  ;;  %v1217_v44 = vrot.slane %v1211_v43, 4 }
 0x2ea   : > { %v1120_v59 = vadd.f32 %v1118_v56, %v1114_v39  ;;  %v2990_v15 = vrot.slane %v2983_v54, 2  ;;  %v3098_v43 = vstv %s5511_s8 }
 0x2eb   : > { %v2884_v24 = vadd.f32 %v2879_v36, %v2863_v60  ;;  %v5693_v60 = vld [vmem:[#allocation24_spill] sm:$0xff]  ;;  %v1158_v34 = vrot.slane %v1152_v32, 2  ;;  %v1160_v33 = vrot.slane %v1153_v40, 2 }
 0x2ec   : > { %v1134_v58 = vadd.f32 %v5694_v42, %v1120_v59 }
 0x2ed   : > { %v2901_v21 = vadd.f32 %v2896_v2, %v2884_v24  ;;  %v1159_v24 = vsel %vm851_vm3, %v1157_v45, %v1158_v34  ;;  %v1161_v23 = vsel %vm851_vm3, %v1158_v34, %v1160_v33 }
 0x2ee   : > { %v5478_v36 = vpop.permute.xlu2 %3068  ;;  %v1148_v11 = vadd.f32 %v5695_v29, %v1134_v58 }
 0x2ef   : > { %v2922_v55 = vadd.f32 %v5413_v53, %v2901_v21  ;;  %v5690_v53 = vld [vmem:[#allocation23_spill] sm:$0xff]  ;;  %v2988_v21 = vrot.slane %v2982_v50, 2 }
 0x2f0   : > { %v2881_v14 = vpop.permute.xlu1 %2880  ;;  %v2919_v35 = vpop.permute.xlu0 %2918  ;;  %v1133_v22 = vadd.f32 %v5690_v53, %v1119_v30 }
 0x2f1   : > { %v2885_v37 = vadd.f32 %v2881_v14, %v2864_v27  ;;  %v2989_v1 = vsel %vm851_vm3, %v2987_v8, %v2988_v21 }
 0x2f2   : > { %v1147_v61 = vadd.f32 %v5693_v60, %v1133_v22 }
 0x2f3   : > { %v2902_v31 = vadd.f32 %v2898_v5, %v2885_v37 }
 0x2f5   : > { %v2923_v20 = vadd.f32 %v2919_v35, %v2902_v31  ;;  %v1164_v35 = vadd.f32 %v1159_v24, %v1147_v61  ;;  %v5700_v61 = vld [vmem:[#allocation30_spill] sm:$0xff]  ;;  %v5701_v24 = vld [vmem:[#allocation19_spill] sm:$0xff] }
 0x2f6   : > { %v5493_v27 = vpop.permute.xlu2 %3091 }
 0x2f7   : > { %v2944_v14 = vadd.f32 %v5427_v17, %v2923_v20  ;;  %v1185_v17 = vadd.f32 %v5696_v46, %v1164_v35  ;;  %v5699_v20 = vld [vmem:[#allocation17_spill] sm:$0xff]  ;;  %v1268_v35 = vstv %s5504_s29  ;;  %s548_s29 = scalar_lea.vmem %s5632_s6, %s3718_s23 }
 0x2f8   : > { %v2938_v38 = vpop.permute.xlu1 %2937  ;;  %v2958_v52 = vpop.permute.xlu0 %2957 }
 0x2f9   : > { %v2943_v0 = vadd.f32 %v2938_v38, %v2922_v55  ;;  %v2950_v4 = vadd.f32 %v2948_v57, %v2944_v14  ;;  %v3039_v38 = vstv %s3854_s27 }
 0x2fa   : > { %v3040_v30 = vmul.f32 %v3039_v38, %v4272_v3  ;;  %v3041_v39 = vmul.f32 %v3039_v38, %v5691_v9  ;;  %v2991_v3 = vsel %vm851_vm3, %v2988_v21, %v2990_v15  ;;  %v3042_v63 = vmul.f32 %v3039_v38, %v5692_v62  ;;  %v5703_v62 = vld [vmem:[#allocation13_spill] sm:$0xff] }
 0x2fb   : > { %v2949_v12 = vadd.f32 %v2947_v6, %v2943_v0  ;;  %v1218_v6 = vsel %vm911_vm4, %v1216_v18, %v1217_v44  ;;  %v1269_v29 = vmul.f32 %v1268_v35, %v5703_v62 }
 0x2fc   : > { %v3046_v56 = vrot.slane %v3040_v30, 4  ;;  %v3047_v40 = vrot.slane %v3041_v39, 4  ;;  %v3049_v58 = vrot.slane %v3042_v63, 4  ;;  %v3132_v30 = vstv %s3860_s9  ;;  %s555_s9 = scalar_lea.vmem %s5633_s7, %s3718_s23 }
 0x2fd   : > { %v2963_v7 = vadd.f32 %v2958_v52, %v2949_v12  ;;  %v5697_v52 = vld [vmem:[#allocation29_spill] sm:$0xff]  ;;  %v1219_v12 = vrot.slane %v1212_v47, 4 }
 0x2fe   : > { %v1206_v0 = vadd.f32 %v5697_v52, %v1185_v17  ;;  %v3124_v9 = vpop.permute.xlu2 %3123 }
 0x2ff   : > { %v2977_v2 = vadd.f32 %v5444_v41, %v2963_v7  ;;  %v1165_v41 = vadd.f32 %v1161_v23, %v1148_v11  ;;  %v1220_v7 = vsel %vm911_vm4, %v1217_v44, %v1219_v12  ;;  %v1302_v23 = vstv %s3749_s30  ;;  %v5707_v44 = vld [vmem:[#allocation35_spill] sm:$0xff] }
 0x300   : > { %v2960_v10 = vpop.permute.xlu1 %2959  ;;  %v2974_v16 = vpop.permute.xlu0 %2973  ;;  %v1223_v22 = vadd.f32 %v1218_v6, %v1206_v0  ;;  %v1303_v17 = vmul.f32 %v1302_v23, %v5703_v62  ;;  %v1305_v47 = vmul.f32 %v1302_v23, %v4302_v26 }
 0x301   : > { %v2964_v55 = vadd.f32 %v2960_v10, %v2950_v4  ;;  %v2994_v49 = vadd.f32 %v2989_v1, %v2977_v2  ;;  %v1186_v31 = vadd.f32 %v5698_v51, %v1165_v41  ;;  %v5704_v4 = vld [vmem:[#allocation33_spill] sm:$0xff]  ;;  %v5705_v1 = vld [vmem:[#allocation34_spill] sm:$0xff]  ;;  %v3133_v51 = vmul.f32 %v3132_v30, %v5703_v62 }
 0x302   : > { %v1244_v10 = vadd.f32 %v5700_v61, %v1223_v22  ;;  %v1309_v52 = vrot.slane %v1303_v17, 2 }
 0x303   : > { %v2978_v53 = vadd.f32 %v2974_v16, %v2964_v55  ;;  %v1207_v13 = vadd.f32 %v5699_v20, %v1186_v31  ;;  %v3048_v16 = vsel %vm911_vm4, %v3046_v56, %v3047_v40  ;;  %v3139_v20 = vrot.slane %v3133_v51, 2 }
 0x304   : > { %v1265_v42 = vadd.f32 %v5701_v24, %v1244_v10  ;;  %v5710_v24 = vld [vmem:[#allocation25_spill] sm:$0xff] }
 0x305   : > { %v2995_v60 = vadd.f32 %v2991_v3, %v2978_v53  ;;  %v1224_v33 = vadd.f32 %v1220_v7, %v1207_v13  ;;  %v1361_v53 = vstv %s3752_s10  ;;  %v5709_v13 = vld [vmem:[#allocation36_spill] sm:$0xff] }
 0x306   : > { %v1271_v21 = vadd.f32 %v1269_v29, %v1265_v42  ;;  %v5524_v18 = vpop.permute.xlu2 %3163  ;;  %v1362_v3 = vmul.f32 %v1361_v53, %v5703_v62  ;;  %v5711_v29 = vld [vmem:[#allocation38_spill] sm:$0xff] }
 0x307   : > { %v3016_v50 = vadd.f32 %v5461_v19, %v2995_v60  ;;  %v1245_v14 = vadd.f32 %v5702_v25, %v1224_v33  ;;  %v3050_v19 = vsel %vm911_vm4, %v3047_v40, %v3049_v58 }
 0x308   : > { %v3010_v28 = vpop.permute.xlu1 %3009  ;;  %v3031_v37 = vpop.permute.xlu0 %3030  ;;  %v1368_v7 = vrot.slane %v1362_v3, 4 }
 0x309   : > { %v3015_v5 = vadd.f32 %v3010_v28, %v2994_v49  ;;  %v1266_v46 = vadd.f32 %v5704_v4, %v1245_v14  ;;  %v1285_v28 = vadd.f32 %v5705_v1, %v1271_v21  ;;  %v5712_v4 = vld [vmem:[#allocation37_spill] sm:$0xff] }
 0x30b   : > { %v3036_v32 = vadd.f32 %v3031_v37, %v3015_v5  ;;  %v5706_v37 = vld [vmem:[#allocation11_spill] sm:$0xff]  ;;  %v1299_v5 = vadd.f32 %v5707_v44, %v1285_v28 }
 0x30c   : > { %v1270_v41 = vmul.f32 %v1268_v35, %v5706_v37  ;;  %v1304_v55 = vmul.f32 %v1302_v23, %v5706_v37  ;;  %v3134_v22 = vmul.f32 %v3132_v30, %v5706_v37  ;;  %v1364_v23 = vmul.f32 %v1361_v53, %v4302_v26 }
 0x30d   : > { %v3053_v34 = vadd.f32 %v3048_v16, %v3036_v32  ;;  %v5708_v32 = vld [vmem:[#allocation22_spill] sm:$0xff]  ;;  %v3100_v16 = vmul.f32 %v3098_v43, %v5706_v37 }
 0x30e   : > { %v1272_v38 = vadd.f32 %v1270_v41, %v1266_v46  ;;  %v1310_v31 = vrot.slane %v1304_v55, 2  ;;  %v3221_v61 = vpop.permute.xlu2 %3220  ;;  %v3140_v63 = vrot.slane %v3134_v22, 2 }
 0x30f   : > { %v3074_v8 = vadd.f32 %v5478_v36, %v3053_v34  ;;  %v3099_v36 = vmul.f32 %v3098_v43, %v5703_v62  ;;  %v1363_v34 = vmul.f32 %v1361_v53, %v5706_v37 }
 0x310   : > { %v3033_v59 = vpop.permute.xlu1 %3032  ;;  %v3071_v45 = vpop.permute.xlu0 %3070  ;;  %v1311_v56 = vsel %vm851_vm3, %v1309_v52, %v1310_v31  ;;  %v1286_v12 = vadd.f32 %v5708_v32, %v1272_v38  ;;  %v3141_v58 = vsel %vm851_vm3, %v3139_v20, %v3140_v63  ;;  %v4032_v32 = vmov 1983009808  }
 0x311   : > { %v3037_v48 = vadd.f32 %v3033_v59, %v3016_v50  ;;  %v1316_v59 = vadd.f32 %v1311_v56, %v1299_v5  ;;  %v5713_v5 = vld [vmem:[#allocation28_spill] sm:$0xff] }
 0x312   : > { %v1300_v60 = vadd.f32 %v5709_v13, %v1286_v12  ;;  %v3255_v12 = vunpack.c.l.s4 %v4032_v32 }
 0x313   : > { %v3054_v54 = vadd.f32 %v3050_v19, %v3037_v48  ;;  %v1337_v42 = vadd.f32 %v5710_v24, %v1316_v59  ;;  %v5715_v59 = vld [vmem:[#allocation31_spill] sm:$0xff] }
 0x315   : > { %v3075_v0 = vadd.f32 %v3071_v45, %v3054_v54  ;;  %v1312_v45 = vrot.slane %v1305_v47, 2  ;;  %v2581_v54 = vstv %s3826_s12 }
 0x316   : > { %v2582_v41 = vmul.f32 %v2581_v54, %v5703_v62  ;;  %v2613_v55 = vpop.permute.xlu2 %2612  ;;  %v2583_v38 = vmul.f32 %v2581_v54, %v5706_v37  ;;  %v2584_v56 = vmul.f32 %v2581_v54, %v4302_v26 }
 0x317   : > { %v3096_v40 = vadd.f32 %v5493_v27, %v3075_v0  ;;  %v1313_v50 = vsel %vm851_vm3, %v1310_v31, %v1312_v45  ;;  %v3135_v27 = vmul.f32 %v3132_v30, %v4302_v26  ;;  %v5714_v31 = vld [vmem:[#allocation39_spill] sm:$0xff] }
 0x318   : > { %v3090_v11 = vpop.permute.xlu1 %3089  ;;  %v3110_v2 = vpop.permute.xlu0 %3109  ;;  %v1317_v35 = vadd.f32 %v1313_v50, %v1300_v60  ;;  %v3256_v50 = vunpack.c.0.s8 %v3255_v12 }
 0x319   : > { %v3095_v57 = vadd.f32 %v3090_v11, %v3074_v8  ;;  %v3102_v33 = vadd.f32 %v3100_v16, %v3096_v40  ;;  %v3191_v8 = vstv %s3863_s11  ;;  %v1358_v11 = vadd.f32 %v5711_v29, %v1337_v42  ;;  %v5716_v16 = vld [vmem:[#allocation45_spill] sm:$0xff] }
 0x31a   : > { %v3142_v19 = vrot.slane %v3135_v27, 2  ;;  %v3193_v43 = vmul.f32 %v3191_v8, %v5706_v37  ;;  %v1338_v46 = vadd.f32 %v5712_v4, %v1317_v35  ;;  %v3194_v53 = vmul.f32 %v3191_v8, %v4302_v26  ;;  %v5718_v27 = vld [vmem:[#allocation42_spill] sm:$0xff] }
 0x31b   : > { %v3101_v49 = vadd.f32 %v3099_v36, %v3095_v57  ;;  %v1369_v57 = vrot.slane %v1363_v34, 4  ;;  %v2589_v37 = vrot.slane %v2583_v38, 4  ;;  %v2591_v26 = vrot.slane %v2584_v56, 4 }
 0x31c   : > { %v3143_v52 = vsel %vm851_vm3, %v3140_v63, %v3142_v19  ;;  %v3199_v0 = vrot.slane %v3193_v43, 4  ;;  %v1359_v47 = vadd.f32 %v5713_v5, %v1338_v46  ;;  %v3201_v13 = vrot.slane %v3194_v53, 4 }
 0x31d   : > { %v3115_v6 = vadd.f32 %v3110_v2, %v3101_v49  ;;  %v3192_v2 = vmul.f32 %v3191_v8, %v5703_v62  ;;  %v1370_v17 = vsel %vm911_vm4, %v1368_v7, %v1369_v57  ;;  %v2588_v62 = vrot.slane %v2582_v41, 4  ;;  %v5717_v7 = vld [vmem:[#allocation40_spill] sm:$0xff] }
 0x31e   : > { %v1375_v1 = vadd.f32 %v1370_v17, %v1358_v11  ;;  %v2632_v35 = vpop.permute.xlu2 %2631  ;;  %v5719_v11 = vld [vmem:[#allocation41_spill] sm:$0xff] }
 0x31f   : > { %v3129_v10 = vadd.f32 %v3124_v9, %v3115_v6  ;;  %v3198_v28 = vrot.slane %v3192_v2, 4  ;;  %v2590_v60 = vsel %vm911_vm4, %v2588_v62, %v2589_v37 }
 0x320   : > { %v3112_v15 = vpop.permute.xlu1 %3111  ;;  %v3126_v39 = vpop.permute.xlu0 %3125  ;;  %v1396_v6 = vadd.f32 %v5714_v31, %v1375_v1  ;;  %v2595_v63 = vadd.f32 %v2590_v60, %v5716_v16  ;;  %v4033_v1 = vmov 1934713408   ;;  %v5721_v31 = vld [vmem:[#allocation43_spill] sm:$0xff] }
 0x321   : > { %v3116_v48 = vadd.f32 %v3112_v15, %v3102_v33  ;;  %v3146_v9 = vadd.f32 %v3141_v58, %v3129_v10  ;;  %v1371_v15 = vrot.slane %v1364_v23, 4  ;;  %v3264_v58 = vrot.slane %v5718_v27, 4  ;;  %v5720_v23 = vld [vmem:[#allocation44_spill] sm:$0xff] }
 0x322   : > { %v1417_v45 = vadd.f32 %v5715_v59, %v1396_v6  ;;  %v3320_v6 = vrot.slane %v5721_v31, 4 }
 0x323   : > { %v3130_v36 = vadd.f32 %v3126_v39, %v3116_v48  ;;  %v3200_v39 = vsel %vm911_vm4, %v3198_v28, %v3199_v0  ;;  %v1372_v3 = vsel %vm911_vm4, %v1369_v57, %v1371_v15  ;;  %v3202_v48 = vsel %vm911_vm4, %v3199_v0, %v3201_v13 }
 0x324   : > { %v1376_v20 = vadd.f32 %v1372_v3, %v1359_v47  ;;  %v2592_v57 = vsel %vm911_vm4, %v2589_v37, %v2591_v26  ;;  %v3279_v28 = vunpack.c.l.s4 %v4033_v1 }
 0x325   : > { %v3147_v51 = vadd.f32 %v3143_v52, %v3130_v36  ;;  %v2596_v19 = vadd.f32 %v2592_v57, %v5720_v23 }
 0x326   : > { %v1397_v33 = vadd.f32 %v5717_v7, %v1376_v20 }
 0x327   : > { %v3168_v40 = vadd.f32 %v5524_v18, %v3147_v51  ;;  %v2617_v41 = vadd.f32 %v2613_v55, %v2596_v19 }
 0x328   : > { %v3162_v25 = vpop.permute.xlu1 %3161  ;;  %v3183_v14 = vpop.permute.xlu0 %3182  ;;  %v1418_v2 = vadd.f32 %v5719_v11, %v1397_v33 }
 0x329   : > { %v3167_v21 = vadd.f32 %v3162_v25, %v3146_v9 }
 0x32a   : > { %v3308_v51 = vrot.slane %v1418_v2, 4 }
 0x32b   : > { %v3188_v49 = vadd.f32 %v3183_v14, %v3167_v21  ;;  %v3252_v14 = vrot.slane %v1417_v45, 4 }
 0x32d   : > { %v3205_v22 = vadd.f32 %v3200_v39, %v3188_v49 }
 0x32f   : > { %v3226_v34 = vadd.f32 %v3221_v61, %v3205_v22  ;;  %v3280_v22 = vunpack.c.0.s8 %v3279_v28 }
 0x330   : > { %v3185_v30 = vpop.permute.xlu1 %3184  ;;  %v3223_v44 = vpop.permute.xlu0 %3222 }
 0x331   : > { %v3189_v10 = vadd.f32 %v3185_v30, %v3168_v40 }
 0x333   : > { %v3206_v9 = vadd.f32 %v3202_v48, %v3189_v10 }
 0x335   : > { %v3227_v49 = vadd.f32 %v3223_v44, %v3206_v9 }
 0x338   : > { %v2611_v24 = vpop.permute.xlu1 %2610  ;;  %v3242_v42 = vpop.permute.xlu0 %3241 }
 0x339   : > { %v2616_v18 = vadd.f32 %v2611_v24, %v2595_v63  ;;  %v3247_v25 = vadd.f32 %v3242_v42, %v3226_v34 }
 0x33b   : > { %v2637_v8 = vadd.f32 %v2632_v35, %v2616_v18  ;;  %v3262_v29 = vrot.slane %v3247_v25, 4  ;;  %v3265_v61 = vsel %vm3250_vm5, %v3247_v25, %v3264_v58 }
 0x33c   : > { %v3273_v21 = vperm.slane %v3265_v61, %v3256_v50 }
 0x33d   : > { %v3249_v43 = vrot.slane %v2637_v8, 4  ;;  %v3253_v4 = vsel %vm3250_vm5, %v2637_v8, %v3252_v14  ;;  %v3263_v46 = vsel %vm3250_vm5, %v3262_v29, %v5718_v27 }
 0x33e   : > { %v3261_v17 = vperm.slane %v3253_v4, %v3256_v50  ;;  %v3269_v54 = vperm.slane %v3263_v46, %v3256_v50  ;;  %v3286_v36 = vrot.slane %v3273_v21, 4 }
 0x33f   : > { %v3251_v38 = vsel %vm3250_vm5, %v3249_v43, %v1417_v45 }
 0x340   : > { %v3257_v52 = vperm.slane %v3251_v38, %v3256_v50  ;;  %v3288_v0 = vrot.slane %v3261_v17, 4  ;;  %v3274_v30 = vrot.slane %v3269_v54, 4  ;;  %v3244_v5 = vpop.permute.xlu1 %3243  ;;  %v2634_v47 = vpop.permute.xlu0 %2633  ;;  %v3287_v15 = vsel %vm3250_vm5, %v3286_v36, %v3261_v17 }
 0x341   : > { %v3248_v39 = vadd.f32 %v3244_v5, %v3227_v49  ;;  %v2638_v53 = vadd.f32 %v2634_v47, %v2617_v41  ;;  %v3293_v8 = vperm.slane %v3287_v15, %v3280_v22 }
 0x342   : > { %v3276_v62 = vrot.slane %v3257_v52, 4  ;;  %v3275_v56 = vsel %vm3250_vm5, %v3274_v30, %v3257_v52  ;;  %v3289_v55 = vsel %vm3250_vm5, %v3273_v21, %v3288_v0 }
 0x343   : > { %v3318_v44 = vrot.slane %v3248_v39, 4  ;;  %v3321_v37 = vsel %vm3250_vm5, %v3248_v39, %v3320_v6  ;;  %v3306_v32 = vrot.slane %v2638_v53, 4  ;;  %v3309_v12 = vsel %vm3250_vm5, %v2638_v53, %v3308_v51 }
 0x344   : > { %v3329_v3 = vperm.slane %v3321_v37, %v3256_v50  ;;  %v3317_v40 = vperm.slane %v3309_v12, %v3256_v50  ;;  %v3277_v59 = vsel %vm3250_vm5, %v3269_v54, %v3276_v62  ;;  %v5582_v45 = vperm.slane %v3275_v56, %v3280_v22 }
 0x345   : > { %v3319_v20 = vsel %vm3250_vm5, %v3318_v44, %v5721_v31  ;;  %v3307_v13 = vsel %vm3250_vm5, %v3306_v32, %v1418_v2  ;;  %v3285_v60 = vperm.slane %v3277_v59, %v3280_v22  ;;  %v3302_v29 = vrot.slane %v3293_v8, 4 }
 0x346   : > { %v3325_v10 = vperm.slane %v3319_v20, %v3256_v50  ;;  %v3342_v16 = vrot.slane %v3329_v3, 4  ;;  %v3313_v63 = vperm.slane %v3307_v13, %v3256_v50  ;;  %v3344_v34 = vrot.slane %v3317_v40, 4 }
 0x347   : > { %3367 = vrot.lane.b32.xlu0 %v3285_v60, %s4034_s13  ;;  %v3298_v7 = vrot.slane %v5582_v45, 4  ;;  %v3300_v61 = vrot.slane %v3285_v60, 4  ;;  %v3303_v11 = vsel %vm3250_vm5, 0.0, %v3302_v29  ;;  %v3297_v43 = vperm.slane %v3289_v55, %v3280_v22 }
 0x348   : > { %v3330_v33 = vrot.slane %v3325_v10, 4  ;;  %v3332_v26 = vrot.slane %v3313_v63, 4  ;;  %v3343_v24 = vsel %vm3250_vm5, %v3342_v16, %v3317_v40  ;;  %v3345_v42 = vsel %vm3250_vm5, %v3329_v3, %v3344_v34 }
 0x349   : > { %v3299_v27 = vsel %vm3250_vm5, 0.0, %v3298_v7  ;;  %v3301_v2 = vsel %vm3250_vm5, 0.0, %v3300_v61  ;;  %v3349_v57 = vperm.slane %v3343_v24, %v3280_v22  ;;  %v3353_v23 = vperm.slane %v3345_v42, %v3280_v22 }
 0x34a   : > { %3363 = vrot.lane.b32.xlu1 %v3299_v27, %s4035_s14  ;;  %v3333_v58 = vsel %vm3250_vm5, %v3325_v10, %v3332_v26  ;;  %v3331_v18 = vsel %vm3250_vm5, %v3330_v33, %v3313_v63  ;;  %v3304_v4 = vrot.slane %v3297_v43, 4 }
 0x34b   : > { %v3341_v50 = vperm.slane %v3333_v58, %v3280_v22  ;;  %v3337_v25 = vperm.slane %v3331_v18, %v3280_v22  ;;  %v3358_v21 = vrot.slane %v3349_v57, 4  ;;  %v3360_v17 = vrot.slane %v3353_v23, 4 }
 0x34c   : > { %v3305_v46 = vsel %vm3250_vm5, 0.0, %v3304_v4 }
 0x34d   : > { %v3356_v14 = vrot.slane %v3341_v50, 4  ;;  %v3354_v35 = vrot.slane %v3337_v25, 4  ;;  %v3359_v19 = vsel %vm3250_vm5, 0.0, %v3358_v21  ;;  %v3361_v54 = vsel %vm3250_vm5, 0.0, %v3360_v17 }
 0x34f   : > { %v3357_v48 = vsel %vm3250_vm5, 0.0, %v3356_v14  ;;  %v3355_v9 = vsel %vm3250_vm5, 0.0, %v3354_v35 }
 0x350   : > { %3399 = vrot.lane.b32.xlu0 %v3357_v48, %s4036_s21  ;;  %3391 = vrot.lane.b32.xlu2 %v3355_v9, %s4035_s14 }
 0x352   : > { %3395 = vrot.lane.b32.xlu1 %v3341_v50, %s4034_s13 }
 0x358   : > { %3379 = vrot.lane.b32.xlu0 %v3303_v11, %s4037_s15  ;;  %3371 = vrot.lane.b32.xlu2 %v3301_v2, %s4036_s21 }
 0x35a   : > { %3375 = vrot.lane.b32.xlu1 %v3293_v8, %s4038_s28 }
 0x360   : > { %3411 = vrot.lane.b32.xlu0 %v3353_v23, %s4039_s16  ;;  %3403 = vrot.lane.b32.xlu2 %v3349_v57, %s4038_s28 }
 0x362   : > { %3407 = vrot.lane.b32.xlu1 %v3359_v19, %s4037_s15 }
 0x368   : > { %3383 = vrot.lane.b32.xlu2 %v3297_v43, %s4039_s16 }
 0x36a   : > { %3387 = vrot.lane.b32.xlu1 %v3305_v46, %s4040_s17 }
 0x370   : > { %3415 = vrot.lane.b32.xlu2 %v3361_v54, %s4040_s17 }
 0x3aa   : > { %v3392_v36 = vpop.permute.xlu2 %3391 }
 0x3ab   : > { %v3432_v47 = vsel %vm3418_vm6, %v3337_v25, %v3392_v36 }
 0x3b2   : > { %v3372_v1 = vpop.permute.xlu2 %3371 }
 0x3b9   : > { %v3368_v28 = vpop.permute.xlu0 %3367 }
 0x3ba   : > { %v3404_v49 = vpop.permute.xlu2 %3403 }
 0x3bc   : > { %v3364_v41 = vpop.permute.xlu1 %3363 }
 0x3bd   : > { %v3419_v51 = vsel %vm3418_vm6, %v5582_v45, %v3364_v41 }
 0x3be   : > { %v3421_v6 = vsel %vm3420_vm7, %v3419_v51, %v3368_v28 }
 0x3bf   : > { %v3423_v22 = vsel %vm3422_vm8, %v3421_v6, %v3372_v1 }
 0x3c2   : > { %v3400_v38 = vpop.permute.xlu0 %3399  ;;  %v3384_v30 = vpop.permute.xlu2 %3383 }
 0x3c4   : > { %v3396_v52 = vpop.permute.xlu1 %3395 }
 0x3c5   : > { %v3433_v15 = vsel %vm3420_vm7, %v3432_v47, %v3396_v52 }
 0x3c6   : > { %v3434_v31 = vsel %vm3422_vm8, %v3433_v15, %v3400_v38 }
 0x3c7   : > { %v3435_v62 = vsel %vm3424_vm9, %v3434_v31, %v3404_v49 }
 0x3ca   : > { %v3380_v0 = vpop.permute.xlu0 %3379  ;;  %v3416_v44 = vpop.permute.xlu2 %3415 }
 0x3cc   : > { %v3376_v5 = vpop.permute.xlu1 %3375 }
 0x3cd   : > { %v3425_v55 = vsel %vm3424_vm9, %v3423_v22, %v3376_v5 }
 0x3ce   : > { %v3427_v3 = vsel %vm3426_vm10, %v3425_v55, %v3380_v0 }
 0x3cf   : > { %v3429_v45 = vsel %vm3428_vm12, %v3427_v3, %v3384_v30 }
 0x3d2   : > { %v3412_v39 = vpop.permute.xlu0 %3411 }
 0x3d4   : > { %v3408_v53 = vpop.permute.xlu1 %3407 }
 0x3d5   : > { %v3436_v56 = vsel %vm3426_vm10, %v3435_v62, %v3408_v53 }
 0x3d6   : > { %v3437_v37 = vsel %vm3428_vm12, %v3436_v56, %v3412_v39 }
 0x3d7   : > { %v3438_v32 = vsel %vm3430_vm11, %v3437_v37, %v3416_v44 }
 0x3d8   : > { %v3442_v12 = vmul.f32 0.2, %v3438_v32  ;;  %vm3440_vm13 = vcmp.ge.f32.partialorder %v3438_v32, 0.0 }
 0x3da   : > { %v3444_v40 = vsel %vm3440_vm13, %v3438_v32, %v3442_v12 }
 0x3db   : > { %v3462_v60 = vrot.slane %v3444_v40, 4  ;;  %v3453_v10 = vmul.f32 %v3444_v40, %v3444_v40  ;;  %v3446_v33 = vsel %vm911_vm4, %v3444_v40, 0.0 }
 0x3dc   : > { %v3388_v59 = vpop.permute.xlu1 %3387 }
 0x3dd   : > { %v3431_v20 = vsel %vm3430_vm11, %v3429_v45, %v3388_v59  ;;  %v3455_v42 = vsel %vm911_vm4, %v3453_v10, 0.0 }
 0x3de   : > { %vm3439_vm14 = vcmp.ge.f32.partialorder %v3431_v20, 0.0  ;;  %v3441_v13 = vmul.f32 0.2, %v3431_v20 }
 0x3e0   : > { %v3443_v16 = vsel %vm3439_vm14, %v3431_v20, %v3441_v13 }
 0x3e1   : > { %v3452_v63 = vmul.f32 %v3443_v16, %v3443_v16  ;;  %v3463_v34 = vsel %vm911_vm4, %v3443_v16, %v3462_v60  ;;  %v3445_v7 = vsel %vm911_vm4, %v3443_v16, 0.0 }
 0x3e2   : > { %3465 = vst [vmem:[%s540_s22] sm:$0xff] %v3463_v34  ;;  %v3447_v26 = vadd.f32 %v3446_v33, %v3445_v7 }
 0x3e3   : > { %v3454_v24 = vsel %vm911_vm4, %v3452_v63, 0.0 }
 0x3e4   : > { %3448 = vadd.xlane.f32.xlu0 %v3447_v26  ;;  %v3456_v27 = vadd.f32 %v3455_v42, %v3454_v24 }
 0x3e6   : > { %3457 = vadd.xlane.f32.xlu1 %v3456_v27 }
 0x457   : > { %v3449_v58 = vpop.xlane.xlu0 %3448 }
 0x458   : > { %3451 = vst.msk [vmem:[%s548_s29] sm:$0xf] %vm3450_vm15, %v3449_v58 }
 0x459   : > { %v3458_v18 = vpop.xlane.xlu1 %3457 }
 0x45a   : > { %3459 = vst.msk [vmem:[%s555_s9] sm:$0xf] %vm3450_vm15, %v3458_v18 }
 0x45b PF: > { %s20_s24 = sadd.s32 1, %s4023_s24   ;;  %s5722_s1 = smov %s4019_s2 }
 0x45c   : > { %p17_p9 = scmp.ge.s32.totalorder %s20_s24, 4   ;;  %s5723_s2 = smov %s5725_s26 }
 0x45e   :  { %19 = sbr.rel (!%p17_p9) target bundleno = 3 (0x3), region = 195 }
 0x463   :  { %3536 = vsyncpa [#allocation5], 1 }
 0x464   :  { %3538 = vsyncpa [#allocation5 + $0x1], 1 }
 0x465   :  { %3539 = vsyncpa [#allocation7], 1 }

</bundles_post_ra>
